<compile_context>
chip_gen: v6e
topology: v6e:2x2x1
jax: 0.10.0
libtpu: 0.0.40
codegen_flags: <defaults>
</compile_context>

<pallas_src>
import functools

import jax
import jax.numpy as jnp
import numpy as np
from jax.experimental import pallas as pl
from jax.experimental.pallas import tpu as pltpu


def _seq2seq_kernel(xb_ref,      # (T, BT, 4Hp)  precomputed encoder x*W_ih^T + b
                    whh_e_ref,   # (Hp, 4Hp)     encoder W_hh^T (padded)
                    whh_d_ref,   # (Hp, 4Hp)     decoder W_hh^T (padded)  [step 0]
                    b_d_ref,     # (1, 4Hp)      decoder bias             [step 0]
                    w_fold_ref,  # (Hp, 4Hp)     decoder W_hh^T + feedback folded in
                    b_fold_ref,  # (1, 4Hp)      decoder bias  + feedback folded in
                    wlin_ref,    # (1, Hp)       Linear weight (padded)
                    out_ref,     # (TL, BT, 1)   per-step predictions (bias added outside)
                    hs_ref):     # scratch (TL, BT, Hp) decoder hidden states
    Hp = whh_e_ref.shape[0]
    T = xb_ref.shape[0]
    BT = xb_ref.shape[1]
    TL = out_ref.shape[0]

    # Hoist loop-invariant weight/bias loads out of the recurrences.
    whh_e = whh_e_ref[...]
    whh_d = whh_d_ref[...]
    b_d = b_d_ref[...]
    w_fold = w_fold_ref[...]
    b_fold = b_fold_ref[...]

    def lstm_cell(gates, c):
        # Gate slices land exactly on 128-lane vreg boundaries (Hp = k*128).
        i = jax.nn.sigmoid(gates[:, 0 * Hp:1 * Hp])
        f = jax.nn.sigmoid(gates[:, 1 * Hp:2 * Hp])
        g = jnp.tanh(gates[:, 2 * Hp:3 * Hp])
        o = jax.nn.sigmoid(gates[:, 3 * Hp:4 * Hp])
        c_new = f * c + i * g
        h_new = o * jnp.tanh(c_new)
        return h_new, c_new

    h = jnp.zeros((BT, Hp), jnp.float32)
    c = jnp.zeros((BT, Hp), jnp.float32)

    # ---- encoder: fully unrolled serial scan (static trip count) ----
    for t in range(T):
        gates = xb_ref[t] + jnp.dot(h, whh_e, preferred_element_type=jnp.float32)
        h, c = lstm_cell(gates, c)

    # ---- decoder step 0: zero input, encoder (h, c) as initial state ----
    gates = jnp.dot(h, whh_d, preferred_element_type=jnp.float32) + b_d
    h, c = lstm_cell(gates, c)
    hs_ref[0] = h

    # ---- decoder steps 1..TL-1: prediction feedback folded into w_fold/b_fold ----
    for t in range(1, TL):
        gates = jnp.dot(h, w_fold, preferred_element_type=jnp.float32) + b_fold
        h, c = lstm_cell(gates, c)
        hs_ref[t] = h

    # ---- batched Linear(H, 1) over all decoder steps, single dense write ----
    out_ref[...] = jnp.sum(hs_ref[...] * wlin_ref[...], axis=-1, keepdims=True)


def seq2seq_forward(x, params, target_len):
    """x: (T, B, 1) float32.  Returns (target_len, B, 1) float32 predictions."""
    T, B, _ = x.shape
    H = params["whh_e"].shape[0]
    Hp = ((H + 127) // 128) * 128          # hidden padded to whole 128-lane tiles
    BT = 8                                 # batch tile (sublane multiple)
    Bp = ((B + BT - 1) // BT) * BT
    G = 4 * Hp
    f32 = jnp.float32

    def pad_gates(w):
        # (..., 4H) -> (..., 4Hp): PyTorch gate order [i, f, g, o]; each gate
        # block is placed at lane offset k*Hp, padded lanes zero.
        pads = [(0, 0)] * (w.ndim - 1) + [(0, Hp - H)]
        return jnp.concatenate(
            [jnp.pad(w[..., k * H:(k + 1) * H], pads) for k in range(4)], axis=-1)

    def pad_rows(w):                       # (H, 4Hp) -> (Hp, 4Hp)
        return jnp.pad(w, ((0, Hp - H), (0, 0)))

    wih_e = pad_gates(params["wih_e"])                       # (1, G)
    b_e = pad_gates(params["b_e"])                           # (1, G)
    whh_e = pad_rows(pad_gates(params["whh_e"]))             # (Hp, G)
    wih_d = pad_gates(params["wih_d"])                       # (1, G)
    b_d = pad_gates(params["b_d"])                           # (1, G)
    whh_d = pad_rows(pad_gates(params["whh_d"]))             # (Hp, G)
    wlin = jnp.pad(params["wlin"], ((0, 0), (0, Hp - H)))    # (1, Hp)
    blin = params["blin"]                                    # (1, 1)

    # Encoder input projection hoisted off the serial critical path
    # (input_size == 1, so it is a broadcast multiply), zero-padded to Bp rows.
    xb = x.astype(f32) * wih_e + b_e                         # (T, B, G)
    xb = jnp.pad(xb, ((0, 0), (0, Bp - B), (0, 0)))          # (T, Bp, G)

    # Fold the autoregressive feedback (decoder input_t = Linear(h_{t-1})) into
    # the decoder recurrent weights (exact: the feedback is linear in h).
    w_fold = whh_d + wlin.T * wih_d                          # (Hp, G) outer product
    b_fold = b_d + blin * wih_d                              # (1, G)

    nb = Bp // BT
    wspec = lambda shape: pl.BlockSpec(shape, lambda b: (0, 0))

    out = pl.pallas_call(
        _seq2seq_kernel,
        out_shape=jax.ShapeDtypeStruct((target_len, Bp, 1), f32),
        grid=(nb,),
        in_specs=[
            pl.BlockSpec((T, BT, G), lambda b: (0, b, 0)),   # xb (batch-tiled)
            wspec((Hp, G)),                                  # whh_e
            wspec((Hp, G)),                                  # whh_d (step 0)
            wspec((1, G)),                                   # b_d   (step 0)
            wspec((Hp, G)),                                  # w_fold
            wspec((1, G)),                                   # b_fold
            wspec((1, Hp)),                                  # wlin
        ],
        out_specs=pl.BlockSpec((target_len, BT, 1), lambda b: (0, b, 0)),
        scratch_shapes=[pltpu.VMEM((target_len, BT, Hp), f32)],
        compiler_params=pltpu.CompilerParams(
            dimension_semantics=("parallel",)),
    )(xb, whh_e, whh_d, b_d, w_fold, b_fold, wlin)

    # Linear bias only affects the emitted predictions (its effect on the
    # feedback is already folded into b_fold); add it outside the kernel.
    return out[:, :B, :] + blin


def _ref_forward(x, p, target_len):
    """Pure-JAX reference with the module's literal math (correctness check)."""
    T, B, _ = x.shape
    H = p["whh_e"].shape[0]
    hi = jax.lax.Precision.HIGHEST

    def cell(x_t, h, c, wih_row, whh_T, b):
        gates = x_t * wih_row + jnp.dot(h, whh_T, precision=hi) + b
        i = jax.nn.sigmoid(gates[:, :H])
        f = jax.nn.sigmoid(gates[:, H:2 * H])
        g = jnp.tanh(gates[:, 2 * H:3 * H])
        o = jax.nn.sigmoid(gates[:, 3 * H:])
        c = f * c + i * g
        h = o * jnp.tanh(c)
        return h, c

    h = jnp.zeros((B, H), jnp.float32)
    c = jnp.zeros((B, H), jnp.float32)
    for t in range(T):
        h, c = cell(x[t], h, c, p["wih_e"], p["whh_e"], p["b_e"])
    x_in = jnp.zeros((B, 1), jnp.float32)
    outs = []
    for t in range(target_len):
        h, c = cell(x_in, h, c, p["wih_d"], p["whh_d"], p["b_d"])
        pred = jnp.sum(h * p["wlin"], axis=-1, keepdims=True) + p["blin"]
        outs.append(pred)
        x_in = pred
    return jnp.stack(outs, axis=0)


def _init_params(key, hidden_size):
    """Deterministic PyTorch-style init: uniform(-1/sqrt(H), 1/sqrt(H))."""
    H = hidden_size
    G = 4 * H
    k = 1.0 / np.sqrt(H)
    keys = jax.random.split(key, 10)

    def u(kk, shape):
        return jax.random.uniform(kk, shape, jnp.float32, -k, k)

    # nn.LSTM stores weight_ih (4H, in), weight_hh (4H, H), b_ih, b_hh (4H,).
    # We pass them transposed, biases summed. Gate order [i, f, g, o].
    params = dict(
        wih_e=u(keys[0], (4 * H, 1)).T,                    # (1, 4H)
        whh_e=u(keys[1], (4 * H, H)).T,                    # (H, 4H)
        b_e=(u(keys[2], (G,)) + u(keys[3], (G,)))[None],   # (1, 4H)
        wih_d=u(keys[4], (4 * H, 1)).T,                    # (1, 4H)
        whh_d=u(keys[5], (4 * H, H)).T,                    # (H, 4H)
        b_d=(u(keys[6], (G,)) + u(keys[7], (G,)))[None],   # (1, 4H)
        wlin=u(keys[8], (1, H)),                           # Linear weight (1, H)
        blin=u(keys[9], (1, 1)),                           # Linear bias
    )
    return params


if __name__ == "__main__":
    # Small shapes consistent with the module's forward:
    #   input_batch: (seq_len, batch, input_size=1) -> output: (target_len, batch, 1)
    seq_len, batch, hidden_size, target_len = 8, 4, 32, 16

    key = jax.random.PRNGKey(0)
    k_x, k_p = jax.random.split(key)
    x = jax.random.normal(k_x, (seq_len, batch, 1), jnp.float32)
    params = _init_params(k_p, hidden_size)

    fwd = jax.jit(functools.partial(seq2seq_forward, target_len=target_len))
    out = fwd(x, params)
    out = jax.block_until_ready(out)

    ref = _ref_forward(x, params, target_len)
    assert out.shape == (target_len, batch, 1), out.shape
    np.testing.assert_allclose(np.asarray(out), np.asarray(ref),
                               rtol=1e-4, atol=1e-4)
    print("KERNEL_OK")
</pallas_src>

<mosaic_0001>
module attributes {stable_mosaic.version = 11 : i64} {
  func.func @_seq2seq_kernel(%arg0: i32, %arg1: memref<8x8x512xf32, #tpu.memory_space<vmem>>, %arg2: memref<128x512xf32, #tpu.memory_space<vmem>>, %arg3: memref<128x512xf32, #tpu.memory_space<vmem>>, %arg4: memref<1x512xf32, #tpu.memory_space<vmem>>, %arg5: memref<128x512xf32, #tpu.memory_space<vmem>>, %arg6: memref<1x512xf32, #tpu.memory_space<vmem>>, %arg7: memref<1x128xf32, #tpu.memory_space<vmem>>, %arg8: memref<16x8x1xf32, #tpu.memory_space<vmem>>, %arg9: memref<16x8x128xf32, #tpu.memory_space<vmem>>) attributes {dimension_semantics = [#tpu.dimension_semantics<parallel>], iteration_bounds = array<i64: 1>, scalar_prefetch = 0 : i64, scratch_operands = 1 : i64, tpu.core_type = #tpu.core_type<tc>, window_params = [{transform_indices = @transform_0, window_bounds = array<i64: 8, 8, 512>}, {pipeline_mode = #tpu.pipeline_mode<synchronous>, transform_indices = @transform_1, window_bounds = array<i64: 128, 512>}, {pipeline_mode = #tpu.pipeline_mode<synchronous>, transform_indices = @transform_2, window_bounds = array<i64: 128, 512>}, {pipeline_mode = #tpu.pipeline_mode<synchronous>, transform_indices = @transform_3, window_bounds = array<i64: 1, 512>}, {pipeline_mode = #tpu.pipeline_mode<synchronous>, transform_indices = @transform_4, window_bounds = array<i64: 128, 512>}, {pipeline_mode = #tpu.pipeline_mode<synchronous>, transform_indices = @transform_5, window_bounds = array<i64: 1, 512>}, {pipeline_mode = #tpu.pipeline_mode<synchronous>, transform_indices = @transform_6, window_bounds = array<i64: 1, 128>}, {transform_indices = @transform_7, window_bounds = array<i64: 16, 8, 1>}]} {
    %c0 = arith.constant 0 : index
    %c0_0 = arith.constant 0 : index
    %0 = vector.load %arg2[%c0, %c0_0] : memref<128x512xf32, #tpu.memory_space<vmem>>, vector<128x512xf32>
    %c0_1 = arith.constant 0 : index
    %c0_2 = arith.constant 0 : index
    %1 = vector.load %arg3[%c0_1, %c0_2] : memref<128x512xf32, #tpu.memory_space<vmem>>, vector<128x512xf32>
    %c0_3 = arith.constant 0 : index
    %c0_4 = arith.constant 0 : index
    %2 = vector.load %arg4[%c0_3, %c0_4] : memref<1x512xf32, #tpu.memory_space<vmem>>, vector<1x512xf32>
    %c0_5 = arith.constant 0 : index
    %c0_6 = arith.constant 0 : index
    %3 = vector.load %arg5[%c0_5, %c0_6] : memref<128x512xf32, #tpu.memory_space<vmem>>, vector<128x512xf32>
    %c0_7 = arith.constant 0 : index
    %c0_8 = arith.constant 0 : index
    %4 = vector.load %arg6[%c0_7, %c0_8] : memref<1x512xf32, #tpu.memory_space<vmem>>, vector<1x512xf32>
    %cst = arith.constant 0.000000e+00 : f32
    %5 = vector.broadcast %cst : f32 to vector<8x128xf32>
    %cst_9 = arith.constant 0.000000e+00 : f32
    %6 = vector.broadcast %cst_9 : f32 to vector<8x128xf32>
    %c0_10 = arith.constant 0 : index
    %c0_11 = arith.constant 0 : index
    %c0_12 = arith.constant 0 : index
    %7 = vector.load %arg1[%c0_10, %c0_11, %c0_12] : memref<8x8x512xf32, #tpu.memory_space<vmem>>, vector<1x8x512xf32>
    %8 = vector.shape_cast %7 : vector<1x8x512xf32> to vector<8x512xf32>
    %cst_13 = arith.constant dense<0.000000e+00> : vector<8x512xf32>
    %9 = tpu.matmul %5, %0, %cst_13 {dimension_numbers = #tpu.dot_dimension_numbers<[1], [0], [0], [1], [0, 0, 1, 1], [], []>} : vector<8x128xf32>, vector<128x512xf32>, vector<8x512xf32> -> vector<8x512xf32>
    %10 = arith.addf %8, %9 : vector<8x512xf32>
    %11 = vector.extract_strided_slice %10 {offsets = [0, 0], sizes = [8, 128], strides = [1, 1]} : vector<8x512xf32> to vector<8x128xf32>
    %12 = arith.negf %11 : vector<8x128xf32>
    %13 = math.exp %12 : vector<8x128xf32>
    %cst_14 = arith.constant 1.000000e+00 : f32
    %14 = vector.broadcast %cst_14 : f32 to vector<8x128xf32>
    %15 = arith.addf %14, %13 : vector<8x128xf32>
    %16 = arith.divf %14, %15 : vector<8x128xf32>
    %17 = vector.extract_strided_slice %10 {offsets = [0, 128], sizes = [8, 128], strides = [1, 1]} : vector<8x512xf32> to vector<8x128xf32>
    %18 = arith.negf %17 : vector<8x128xf32>
    %19 = math.exp %18 : vector<8x128xf32>
    %cst_15 = arith.constant 1.000000e+00 : f32
    %20 = vector.broadcast %cst_15 : f32 to vector<8x128xf32>
    %21 = arith.addf %20, %19 : vector<8x128xf32>
    %22 = arith.divf %20, %21 : vector<8x128xf32>
    %23 = vector.extract_strided_slice %10 {offsets = [0, 256], sizes = [8, 128], strides = [1, 1]} : vector<8x512xf32> to vector<8x128xf32>
    %24 = math.tanh %23 : vector<8x128xf32>
    %25 = vector.extract_strided_slice %10 {offsets = [0, 384], sizes = [8, 128], strides = [1, 1]} : vector<8x512xf32> to vector<8x128xf32>
    %26 = arith.negf %25 : vector<8x128xf32>
    %27 = math.exp %26 : vector<8x128xf32>
    %cst_16 = arith.constant 1.000000e+00 : f32
    %28 = vector.broadcast %cst_16 : f32 to vector<8x128xf32>
    %29 = arith.addf %28, %27 : vector<8x128xf32>
    %30 = arith.divf %28, %29 : vector<8x128xf32>
    %31 = arith.mulf %22, %6 : vector<8x128xf32>
    %32 = arith.mulf %16, %24 : vector<8x128xf32>
    %33 = arith.addf %31, %32 : vector<8x128xf32>
    %34 = math.tanh %33 : vector<8x128xf32>
    %35 = arith.mulf %30, %34 : vector<8x128xf32>
    %c1 = arith.constant 1 : index
    %c0_17 = arith.constant 0 : index
    %c0_18 = arith.constant 0 : index
    %36 = vector.load %arg1[%c1, %c0_17, %c0_18] : memref<8x8x512xf32, #tpu.memory_space<vmem>>, vector<1x8x512xf32>
    %37 = vector.shape_cast %36 : vector<1x8x512xf32> to vector<8x512xf32>
    %cst_19 = arith.constant dense<0.000000e+00> : vector<8x512xf32>
    %38 = tpu.matmul %35, %0, %cst_19 {dimension_numbers = #tpu.dot_dimension_numbers<[1], [0], [0], [1], [0, 0, 1, 1], [], []>} : vector<8x128xf32>, vector<128x512xf32>, vector<8x512xf32> -> vector<8x512xf32>
    %39 = arith.addf %37, %38 : vector<8x512xf32>
    %40 = vector.extract_strided_slice %39 {offsets = [0, 0], sizes = [8, 128], strides = [1, 1]} : vector<8x512xf32> to vector<8x128xf32>
    %41 = arith.negf %40 : vector<8x128xf32>
    %42 = math.exp %41 : vector<8x128xf32>
    %cst_20 = arith.constant 1.000000e+00 : f32
    %43 = vector.broadcast %cst_20 : f32 to vector<8x128xf32>
    %44 = arith.addf %43, %42 : vector<8x128xf32>
    %45 = arith.divf %43, %44 : vector<8x128xf32>
    %46 = vector.extract_strided_slice %39 {offsets = [0, 128], sizes = [8, 128], strides = [1, 1]} : vector<8x512xf32> to vector<8x128xf32>
    %47 = arith.negf %46 : vector<8x128xf32>
    %48 = math.exp %47 : vector<8x128xf32>
    %cst_21 = arith.constant 1.000000e+00 : f32
    %49 = vector.broadcast %cst_21 : f32 to vector<8x128xf32>
    %50 = arith.addf %49, %48 : vector<8x128xf32>
    %51 = arith.divf %49, %50 : vector<8x128xf32>
    %52 = vector.extract_strided_slice %39 {offsets = [0, 256], sizes = [8, 128], strides = [1, 1]} : vector<8x512xf32> to vector<8x128xf32>
    %53 = math.tanh %52 : vector<8x128xf32>
    %54 = vector.extract_strided_slice %39 {offsets = [0, 384], sizes = [8, 128], strides = [1, 1]} : vector<8x512xf32> to vector<8x128xf32>
    %55 = arith.negf %54 : vector<8x128xf32>
    %56 = math.exp %55 : vector<8x128xf32>
    %cst_22 = arith.constant 1.000000e+00 : f32
    %57 = vector.broadcast %cst_22 : f32 to vector<8x128xf32>
    %58 = arith.addf %57, %56 : vector<8x128xf32>
    %59 = arith.divf %57, %58 : vector<8x128xf32>
    %60 = arith.mulf %51, %33 : vector<8x128xf32>
    %61 = arith.mulf %45, %53 : vector<8x128xf32>
    %62 = arith.addf %60, %61 : vector<8x128xf32>
    %63 = math.tanh %62 : vector<8x128xf32>
    %64 = arith.mulf %59, %63 : vector<8x128xf32>
    %c2 = arith.constant 2 : index
    %c0_23 = arith.constant 0 : index
    %c0_24 = arith.constant 0 : index
    %65 = vector.load %arg1[%c2, %c0_23, %c0_24] : memref<8x8x512xf32, #tpu.memory_space<vmem>>, vector<1x8x512xf32>
    %66 = vector.shape_cast %65 : vector<1x8x512xf32> to vector<8x512xf32>
    %cst_25 = arith.constant dense<0.000000e+00> : vector<8x512xf32>
    %67 = tpu.matmul %64, %0, %cst_25 {dimension_numbers = #tpu.dot_dimension_numbers<[1], [0], [0], [1], [0, 0, 1, 1], [], []>} : vector<8x128xf32>, vector<128x512xf32>, vector<8x512xf32> -> vector<8x512xf32>
    %68 = arith.addf %66, %67 : vector<8x512xf32>
    %69 = vector.extract_strided_slice %68 {offsets = [0, 0], sizes = [8, 128], strides = [1, 1]} : vector<8x512xf32> to vector<8x128xf32>
    %70 = arith.negf %69 : vector<8x128xf32>
    %71 = math.exp %70 : vector<8x128xf32>
    %cst_26 = arith.constant 1.000000e+00 : f32
    %72 = vector.broadcast %cst_26 : f32 to vector<8x128xf32>
    %73 = arith.addf %72, %71 : vector<8x128xf32>
    %74 = arith.divf %72, %73 : vector<8x128xf32>
    %75 = vector.extract_strided_slice %68 {offsets = [0, 128], sizes = [8, 128], strides = [1, 1]} : vector<8x512xf32> to vector<8x128xf32>
    %76 = arith.negf %75 : vector<8x128xf32>
    %77 = math.exp %76 : vector<8x128xf32>
    %cst_27 = arith.constant 1.000000e+00 : f32
    %78 = vector.broadcast %cst_27 : f32 to vector<8x128xf32>
    %79 = arith.addf %78, %77 : vector<8x128xf32>
    %80 = arith.divf %78, %79 : vector<8x128xf32>
    %81 = vector.extract_strided_slice %68 {offsets = [0, 256], sizes = [8, 128], strides = [1, 1]} : vector<8x512xf32> to vector<8x128xf32>
    %82 = math.tanh %81 : vector<8x128xf32>
    %83 = vector.extract_strided_slice %68 {offsets = [0, 384], sizes = [8, 128], strides = [1, 1]} : vector<8x512xf32> to vector<8x128xf32>
    %84 = arith.negf %83 : vector<8x128xf32>
    %85 = math.exp %84 : vector<8x128xf32>
    %cst_28 = arith.constant 1.000000e+00 : f32
    %86 = vector.broadcast %cst_28 : f32 to vector<8x128xf32>
    %87 = arith.addf %86, %85 : vector<8x128xf32>
    %88 = arith.divf %86, %87 : vector<8x128xf32>
    %89 = arith.mulf %80, %62 : vector<8x128xf32>
    %90 = arith.mulf %74, %82 : vector<8x128xf32>
    %91 = arith.addf %89, %90 : vector<8x128xf32>
    %92 = math.tanh %91 : vector<8x128xf32>
    %93 = arith.mulf %88, %92 : vector<8x128xf32>
    %c3 = arith.constant 3 : index
    %c0_29 = arith.constant 0 : index
    %c0_30 = arith.constant 0 : index
    %94 = vector.load %arg1[%c3, %c0_29, %c0_30] : memref<8x8x512xf32, #tpu.memory_space<vmem>>, vector<1x8x512xf32>
    %95 = vector.shape_cast %94 : vector<1x8x512xf32> to vector<8x512xf32>
    %cst_31 = arith.constant dense<0.000000e+00> : vector<8x512xf32>
    %96 = tpu.matmul %93, %0, %cst_31 {dimension_numbers = #tpu.dot_dimension_numbers<[1], [0], [0], [1], [0, 0, 1, 1], [], []>} : vector<8x128xf32>, vector<128x512xf32>, vector<8x512xf32> -> vector<8x512xf32>
    %97 = arith.addf %95, %96 : vector<8x512xf32>
    %98 = vector.extract_strided_slice %97 {offsets = [0, 0], sizes = [8, 128], strides = [1, 1]} : vector<8x512xf32> to vector<8x128xf32>
    %99 = arith.negf %98 : vector<8x128xf32>
    %100 = math.exp %99 : vector<8x128xf32>
    %cst_32 = arith.constant 1.000000e+00 : f32
    %101 = vector.broadcast %cst_32 : f32 to vector<8x128xf32>
    %102 = arith.addf %101, %100 : vector<8x128xf32>
    %103 = arith.divf %101, %102 : vector<8x128xf32>
    %104 = vector.extract_strided_slice %97 {offsets = [0, 128], sizes = [8, 128], strides = [1, 1]} : vector<8x512xf32> to vector<8x128xf32>
    %105 = arith.negf %104 : vector<8x128xf32>
    %106 = math.exp %105 : vector<8x128xf32>
    %cst_33 = arith.constant 1.000000e+00 : f32
    %107 = vector.broadcast %cst_33 : f32 to vector<8x128xf32>
    %108 = arith.addf %107, %106 : vector<8x128xf32>
    %109 = arith.divf %107, %108 : vector<8x128xf32>
    %110 = vector.extract_strided_slice %97 {offsets = [0, 256], sizes = [8, 128], strides = [1, 1]} : vector<8x512xf32> to vector<8x128xf32>
    %111 = math.tanh %110 : vector<8x128xf32>
    %112 = vector.extract_strided_slice %97 {offsets = [0, 384], sizes = [8, 128], strides = [1, 1]} : vector<8x512xf32> to vector<8x128xf32>
    %113 = arith.negf %112 : vector<8x128xf32>
    %114 = math.exp %113 : vector<8x128xf32>
    %cst_34 = arith.constant 1.000000e+00 : f32
    %115 = vector.broadcast %cst_34 : f32 to vector<8x128xf32>
    %116 = arith.addf %115, %114 : vector<8x128xf32>
    %117 = arith.divf %115, %116 : vector<8x128xf32>
    %118 = arith.mulf %109, %91 : vector<8x128xf32>
    %119 = arith.mulf %103, %111 : vector<8x128xf32>
    %120 = arith.addf %118, %119 : vector<8x128xf32>
    %121 = math.tanh %120 : vector<8x128xf32>
    %122 = arith.mulf %117, %121 : vector<8x128xf32>
    %c4 = arith.constant 4 : index
    %c0_35 = arith.constant 0 : index
    %c0_36 = arith.constant 0 : index
    %123 = vector.load %arg1[%c4, %c0_35, %c0_36] : memref<8x8x512xf32, #tpu.memory_space<vmem>>, vector<1x8x512xf32>
    %124 = vector.shape_cast %123 : vector<1x8x512xf32> to vector<8x512xf32>
    %cst_37 = arith.constant dense<0.000000e+00> : vector<8x512xf32>
    %125 = tpu.matmul %122, %0, %cst_37 {dimension_numbers = #tpu.dot_dimension_numbers<[1], [0], [0], [1], [0, 0, 1, 1], [], []>} : vector<8x128xf32>, vector<128x512xf32>, vector<8x512xf32> -> vector<8x512xf32>
    %126 = arith.addf %124, %125 : vector<8x512xf32>
    %127 = vector.extract_strided_slice %126 {offsets = [0, 0], sizes = [8, 128], strides = [1, 1]} : vector<8x512xf32> to vector<8x128xf32>
    %128 = arith.negf %127 : vector<8x128xf32>
    %129 = math.exp %128 : vector<8x128xf32>
    %cst_38 = arith.constant 1.000000e+00 : f32
    %130 = vector.broadcast %cst_38 : f32 to vector<8x128xf32>
    %131 = arith.addf %130, %129 : vector<8x128xf32>
    %132 = arith.divf %130, %131 : vector<8x128xf32>
    %133 = vector.extract_strided_slice %126 {offsets = [0, 128], sizes = [8, 128], strides = [1, 1]} : vector<8x512xf32> to vector<8x128xf32>
    %134 = arith.negf %133 : vector<8x128xf32>
    %135 = math.exp %134 : vector<8x128xf32>
    %cst_39 = arith.constant 1.000000e+00 : f32
    %136 = vector.broadcast %cst_39 : f32 to vector<8x128xf32>
    %137 = arith.addf %136, %135 : vector<8x128xf32>
    %138 = arith.divf %136, %137 : vector<8x128xf32>
    %139 = vector.extract_strided_slice %126 {offsets = [0, 256], sizes = [8, 128], strides = [1, 1]} : vector<8x512xf32> to vector<8x128xf32>
    %140 = math.tanh %139 : vector<8x128xf32>
    %141 = vector.extract_strided_slice %126 {offsets = [0, 384], sizes = [8, 128], strides = [1, 1]} : vector<8x512xf32> to vector<8x128xf32>
    %142 = arith.negf %141 : vector<8x128xf32>
    %143 = math.exp %142 : vector<8x128xf32>
    %cst_40 = arith.constant 1.000000e+00 : f32
    %144 = vector.broadcast %cst_40 : f32 to vector<8x128xf32>
    %145 = arith.addf %144, %143 : vector<8x128xf32>
    %146 = arith.divf %144, %145 : vector<8x128xf32>
    %147 = arith.mulf %138, %120 : vector<8x128xf32>
    %148 = arith.mulf %132, %140 : vector<8x128xf32>
    %149 = arith.addf %147, %148 : vector<8x128xf32>
    %150 = math.tanh %149 : vector<8x128xf32>
    %151 = arith.mulf %146, %150 : vector<8x128xf32>
    %c5 = arith.constant 5 : index
    %c0_41 = arith.constant 0 : index
    %c0_42 = arith.constant 0 : index
    %152 = vector.load %arg1[%c5, %c0_41, %c0_42] : memref<8x8x512xf32, #tpu.memory_space<vmem>>, vector<1x8x512xf32>
    %153 = vector.shape_cast %152 : vector<1x8x512xf32> to vector<8x512xf32>
    %cst_43 = arith.constant dense<0.000000e+00> : vector<8x512xf32>
    %154 = tpu.matmul %151, %0, %cst_43 {dimension_numbers = #tpu.dot_dimension_numbers<[1], [0], [0], [1], [0, 0, 1, 1], [], []>} : vector<8x128xf32>, vector<128x512xf32>, vector<8x512xf32> -> vector<8x512xf32>
    %155 = arith.addf %153, %154 : vector<8x512xf32>
    %156 = vector.extract_strided_slice %155 {offsets = [0, 0], sizes = [8, 128], strides = [1, 1]} : vector<8x512xf32> to vector<8x128xf32>
    %157 = arith.negf %156 : vector<8x128xf32>
    %158 = math.exp %157 : vector<8x128xf32>
    %cst_44 = arith.constant 1.000000e+00 : f32
    %159 = vector.broadcast %cst_44 : f32 to vector<8x128xf32>
    %160 = arith.addf %159, %158 : vector<8x128xf32>
    %161 = arith.divf %159, %160 : vector<8x128xf32>
    %162 = vector.extract_strided_slice %155 {offsets = [0, 128], sizes = [8, 128], strides = [1, 1]} : vector<8x512xf32> to vector<8x128xf32>
    %163 = arith.negf %162 : vector<8x128xf32>
    %164 = math.exp %163 : vector<8x128xf32>
    %cst_45 = arith.constant 1.000000e+00 : f32
    %165 = vector.broadcast %cst_45 : f32 to vector<8x128xf32>
    %166 = arith.addf %165, %164 : vector<8x128xf32>
    %167 = arith.divf %165, %166 : vector<8x128xf32>
    %168 = vector.extract_strided_slice %155 {offsets = [0, 256], sizes = [8, 128], strides = [1, 1]} : vector<8x512xf32> to vector<8x128xf32>
    %169 = math.tanh %168 : vector<8x128xf32>
    %170 = vector.extract_strided_slice %155 {offsets = [0, 384], sizes = [8, 128], strides = [1, 1]} : vector<8x512xf32> to vector<8x128xf32>
    %171 = arith.negf %170 : vector<8x128xf32>
    %172 = math.exp %171 : vector<8x128xf32>
    %cst_46 = arith.constant 1.000000e+00 : f32
    %173 = vector.broadcast %cst_46 : f32 to vector<8x128xf32>
    %174 = arith.addf %173, %172 : vector<8x128xf32>
    %175 = arith.divf %173, %174 : vector<8x128xf32>
    %176 = arith.mulf %167, %149 : vector<8x128xf32>
    %177 = arith.mulf %161, %169 : vector<8x128xf32>
    %178 = arith.addf %176, %177 : vector<8x128xf32>
    %179 = math.tanh %178 : vector<8x128xf32>
    %180 = arith.mulf %175, %179 : vector<8x128xf32>
    %c6 = arith.constant 6 : index
    %c0_47 = arith.constant 0 : index
    %c0_48 = arith.constant 0 : index
    %181 = vector.load %arg1[%c6, %c0_47, %c0_48] : memref<8x8x512xf32, #tpu.memory_space<vmem>>, vector<1x8x512xf32>
    %182 = vector.shape_cast %181 : vector<1x8x512xf32> to vector<8x512xf32>
    %cst_49 = arith.constant dense<0.000000e+00> : vector<8x512xf32>
    %183 = tpu.matmul %180, %0, %cst_49 {dimension_numbers = #tpu.dot_dimension_numbers<[1], [0], [0], [1], [0, 0, 1, 1], [], []>} : vector<8x128xf32>, vector<128x512xf32>, vector<8x512xf32> -> vector<8x512xf32>
    %184 = arith.addf %182, %183 : vector<8x512xf32>
    %185 = vector.extract_strided_slice %184 {offsets = [0, 0], sizes = [8, 128], strides = [1, 1]} : vector<8x512xf32> to vector<8x128xf32>
    %186 = arith.negf %185 : vector<8x128xf32>
    %187 = math.exp %186 : vector<8x128xf32>
    %cst_50 = arith.constant 1.000000e+00 : f32
    %188 = vector.broadcast %cst_50 : f32 to vector<8x128xf32>
    %189 = arith.addf %188, %187 : vector<8x128xf32>
    %190 = arith.divf %188, %189 : vector<8x128xf32>
    %191 = vector.extract_strided_slice %184 {offsets = [0, 128], sizes = [8, 128], strides = [1, 1]} : vector<8x512xf32> to vector<8x128xf32>
    %192 = arith.negf %191 : vector<8x128xf32>
    %193 = math.exp %192 : vector<8x128xf32>
    %cst_51 = arith.constant 1.000000e+00 : f32
    %194 = vector.broadcast %cst_51 : f32 to vector<8x128xf32>
    %195 = arith.addf %194, %193 : vector<8x128xf32>
    %196 = arith.divf %194, %195 : vector<8x128xf32>
    %197 = vector.extract_strided_slice %184 {offsets = [0, 256], sizes = [8, 128], strides = [1, 1]} : vector<8x512xf32> to vector<8x128xf32>
    %198 = math.tanh %197 : vector<8x128xf32>
    %199 = vector.extract_strided_slice %184 {offsets = [0, 384], sizes = [8, 128], strides = [1, 1]} : vector<8x512xf32> to vector<8x128xf32>
    %200 = arith.negf %199 : vector<8x128xf32>
    %201 = math.exp %200 : vector<8x128xf32>
    %cst_52 = arith.constant 1.000000e+00 : f32
    %202 = vector.broadcast %cst_52 : f32 to vector<8x128xf32>
    %203 = arith.addf %202, %201 : vector<8x128xf32>
    %204 = arith.divf %202, %203 : vector<8x128xf32>
    %205 = arith.mulf %196, %178 : vector<8x128xf32>
    %206 = arith.mulf %190, %198 : vector<8x128xf32>
    %207 = arith.addf %205, %206 : vector<8x128xf32>
    %208 = math.tanh %207 : vector<8x128xf32>
    %209 = arith.mulf %204, %208 : vector<8x128xf32>
    %c7 = arith.constant 7 : index
    %c0_53 = arith.constant 0 : index
    %c0_54 = arith.constant 0 : index
    %210 = vector.load %arg1[%c7, %c0_53, %c0_54] : memref<8x8x512xf32, #tpu.memory_space<vmem>>, vector<1x8x512xf32>
    %211 = vector.shape_cast %210 : vector<1x8x512xf32> to vector<8x512xf32>
    %cst_55 = arith.constant dense<0.000000e+00> : vector<8x512xf32>
    %212 = tpu.matmul %209, %0, %cst_55 {dimension_numbers = #tpu.dot_dimension_numbers<[1], [0], [0], [1], [0, 0, 1, 1], [], []>} : vector<8x128xf32>, vector<128x512xf32>, vector<8x512xf32> -> vector<8x512xf32>
    %213 = arith.addf %211, %212 : vector<8x512xf32>
    %214 = vector.extract_strided_slice %213 {offsets = [0, 0], sizes = [8, 128], strides = [1, 1]} : vector<8x512xf32> to vector<8x128xf32>
    %215 = arith.negf %214 : vector<8x128xf32>
    %216 = math.exp %215 : vector<8x128xf32>
    %cst_56 = arith.constant 1.000000e+00 : f32
    %217 = vector.broadcast %cst_56 : f32 to vector<8x128xf32>
    %218 = arith.addf %217, %216 : vector<8x128xf32>
    %219 = arith.divf %217, %218 : vector<8x128xf32>
    %220 = vector.extract_strided_slice %213 {offsets = [0, 128], sizes = [8, 128], strides = [1, 1]} : vector<8x512xf32> to vector<8x128xf32>
    %221 = arith.negf %220 : vector<8x128xf32>
    %222 = math.exp %221 : vector<8x128xf32>
    %cst_57 = arith.constant 1.000000e+00 : f32
    %223 = vector.broadcast %cst_57 : f32 to vector<8x128xf32>
    %224 = arith.addf %223, %222 : vector<8x128xf32>
    %225 = arith.divf %223, %224 : vector<8x128xf32>
    %226 = vector.extract_strided_slice %213 {offsets = [0, 256], sizes = [8, 128], strides = [1, 1]} : vector<8x512xf32> to vector<8x128xf32>
    %227 = math.tanh %226 : vector<8x128xf32>
    %228 = vector.extract_strided_slice %213 {offsets = [0, 384], sizes = [8, 128], strides = [1, 1]} : vector<8x512xf32> to vector<8x128xf32>
    %229 = arith.negf %228 : vector<8x128xf32>
    %230 = math.exp %229 : vector<8x128xf32>
    %cst_58 = arith.constant 1.000000e+00 : f32
    %231 = vector.broadcast %cst_58 : f32 to vector<8x128xf32>
    %232 = arith.addf %231, %230 : vector<8x128xf32>
    %233 = arith.divf %231, %232 : vector<8x128xf32>
    %234 = arith.mulf %225, %207 : vector<8x128xf32>
    %235 = arith.mulf %219, %227 : vector<8x128xf32>
    %236 = arith.addf %234, %235 : vector<8x128xf32>
    %237 = math.tanh %236 : vector<8x128xf32>
    %238 = arith.mulf %233, %237 : vector<8x128xf32>
    %cst_59 = arith.constant dense<0.000000e+00> : vector<8x512xf32>
    %239 = tpu.matmul %238, %1, %cst_59 {dimension_numbers = #tpu.dot_dimension_numbers<[1], [0], [0], [1], [0, 0, 1, 1], [], []>} : vector<8x128xf32>, vector<128x512xf32>, vector<8x512xf32> -> vector<8x512xf32>
    %240 = vector.broadcast %2 : vector<1x512xf32> to vector<8x512xf32>
    %241 = arith.addf %239, %240 : vector<8x512xf32>
    %242 = vector.extract_strided_slice %241 {offsets = [0, 0], sizes = [8, 128], strides = [1, 1]} : vector<8x512xf32> to vector<8x128xf32>
    %243 = arith.negf %242 : vector<8x128xf32>
    %244 = math.exp %243 : vector<8x128xf32>
    %cst_60 = arith.constant 1.000000e+00 : f32
    %245 = vector.broadcast %cst_60 : f32 to vector<8x128xf32>
    %246 = arith.addf %245, %244 : vector<8x128xf32>
    %247 = arith.divf %245, %246 : vector<8x128xf32>
    %248 = vector.extract_strided_slice %241 {offsets = [0, 128], sizes = [8, 128], strides = [1, 1]} : vector<8x512xf32> to vector<8x128xf32>
    %249 = arith.negf %248 : vector<8x128xf32>
    %250 = math.exp %249 : vector<8x128xf32>
    %cst_61 = arith.constant 1.000000e+00 : f32
    %251 = vector.broadcast %cst_61 : f32 to vector<8x128xf32>
    %252 = arith.addf %251, %250 : vector<8x128xf32>
    %253 = arith.divf %251, %252 : vector<8x128xf32>
    %254 = vector.extract_strided_slice %241 {offsets = [0, 256], sizes = [8, 128], strides = [1, 1]} : vector<8x512xf32> to vector<8x128xf32>
    %255 = math.tanh %254 : vector<8x128xf32>
    %256 = vector.extract_strided_slice %241 {offsets = [0, 384], sizes = [8, 128], strides = [1, 1]} : vector<8x512xf32> to vector<8x128xf32>
    %257 = arith.negf %256 : vector<8x128xf32>
    %258 = math.exp %257 : vector<8x128xf32>
    %cst_62 = arith.constant 1.000000e+00 : f32
    %259 = vector.broadcast %cst_62 : f32 to vector<8x128xf32>
    %260 = arith.addf %259, %258 : vector<8x128xf32>
    %261 = arith.divf %259, %260 : vector<8x128xf32>
    %262 = arith.mulf %253, %236 : vector<8x128xf32>
    %263 = arith.mulf %247, %255 : vector<8x128xf32>
    %264 = arith.addf %262, %263 : vector<8x128xf32>
    %265 = math.tanh %264 : vector<8x128xf32>
    %266 = arith.mulf %261, %265 : vector<8x128xf32>
    %c0_63 = arith.constant 0 : index
    %c0_64 = arith.constant 0 : index
    %c0_65 = arith.constant 0 : index
    %267 = vector.load %arg9[%c0_63, %c0_64, %c0_65] : memref<16x8x128xf32, #tpu.memory_space<vmem>>, vector<1x8x128xf32>
    %268 = vector.shape_cast %267 : vector<1x8x128xf32> to vector<8x128xf32>
    %269 = vector.shape_cast %266 : vector<8x128xf32> to vector<1x8x128xf32>
    tpu.vector_store %arg9[%c0_63, %c0_64, %c0_65], %269 {strides = array<i32>} : memref<16x8x128xf32, #tpu.memory_space<vmem>>, vector<1x8x128xf32>,
    %cst_66 = arith.constant dense<0.000000e+00> : vector<8x512xf32>
    %270 = tpu.matmul %266, %3, %cst_66 {dimension_numbers = #tpu.dot_dimension_numbers<[1], [0], [0], [1], [0, 0, 1, 1], [], []>} : vector<8x128xf32>, vector<128x512xf32>, vector<8x512xf32> -> vector<8x512xf32>
    %271 = vector.broadcast %4 : vector<1x512xf32> to vector<8x512xf32>
    %272 = arith.addf %270, %271 : vector<8x512xf32>
    %273 = vector.extract_strided_slice %272 {offsets = [0, 0], sizes = [8, 128], strides = [1, 1]} : vector<8x512xf32> to vector<8x128xf32>
    %274 = arith.negf %273 : vector<8x128xf32>
    %275 = math.exp %274 : vector<8x128xf32>
    %cst_67 = arith.constant 1.000000e+00 : f32
    %276 = vector.broadcast %cst_67 : f32 to vector<8x128xf32>
    %277 = arith.addf %276, %275 : vector<8x128xf32>
    %278 = arith.divf %276, %277 : vector<8x128xf32>
    %279 = vector.extract_strided_slice %272 {offsets = [0, 128], sizes = [8, 128], strides = [1, 1]} : vector<8x512xf32> to vector<8x128xf32>
    %280 = arith.negf %279 : vector<8x128xf32>
    %281 = math.exp %280 : vector<8x128xf32>
    %cst_68 = arith.constant 1.000000e+00 : f32
    %282 = vector.broadcast %cst_68 : f32 to vector<8x128xf32>
    %283 = arith.addf %282, %281 : vector<8x128xf32>
    %284 = arith.divf %282, %283 : vector<8x128xf32>
    %285 = vector.extract_strided_slice %272 {offsets = [0, 256], sizes = [8, 128], strides = [1, 1]} : vector<8x512xf32> to vector<8x128xf32>
    %286 = math.tanh %285 : vector<8x128xf32>
    %287 = vector.extract_strided_slice %272 {offsets = [0, 384], sizes = [8, 128], strides = [1, 1]} : vector<8x512xf32> to vector<8x128xf32>
    %288 = arith.negf %287 : vector<8x128xf32>
    %289 = math.exp %288 : vector<8x128xf32>
    %cst_69 = arith.constant 1.000000e+00 : f32
    %290 = vector.broadcast %cst_69 : f32 to vector<8x128xf32>
    %291 = arith.addf %290, %289 : vector<8x128xf32>
    %292 = arith.divf %290, %291 : vector<8x128xf32>
    %293 = arith.mulf %284, %264 : vector<8x128xf32>
    %294 = arith.mulf %278, %286 : vector<8x128xf32>
    %295 = arith.addf %293, %294 : vector<8x128xf32>
    %296 = math.tanh %295 : vector<8x128xf32>
    %297 = arith.mulf %292, %296 : vector<8x128xf32>
    %c1_70 = arith.constant 1 : index
    %c0_71 = arith.constant 0 : index
    %c0_72 = arith.constant 0 : index
    %298 = vector.load %arg9[%c1_70, %c0_71, %c0_72] : memref<16x8x128xf32, #tpu.memory_space<vmem>>, vector<1x8x128xf32>
    %299 = vector.shape_cast %298 : vector<1x8x128xf32> to vector<8x128xf32>
    %300 = vector.shape_cast %297 : vector<8x128xf32> to vector<1x8x128xf32>
    tpu.vector_store %arg9[%c1_70, %c0_71, %c0_72], %300 {strides = array<i32>} : memref<16x8x128xf32, #tpu.memory_space<vmem>>, vector<1x8x128xf32>,
    %cst_73 = arith.constant dense<0.000000e+00> : vector<8x512xf32>
    %301 = tpu.matmul %297, %3, %cst_73 {dimension_numbers = #tpu.dot_dimension_numbers<[1], [0], [0], [1], [0, 0, 1, 1], [], []>} : vector<8x128xf32>, vector<128x512xf32>, vector<8x512xf32> -> vector<8x512xf32>
    %302 = vector.broadcast %4 : vector<1x512xf32> to vector<8x512xf32>
    %303 = arith.addf %301, %302 : vector<8x512xf32>
    %304 = vector.extract_strided_slice %303 {offsets = [0, 0], sizes = [8, 128], strides = [1, 1]} : vector<8x512xf32> to vector<8x128xf32>
    %305 = arith.negf %304 : vector<8x128xf32>
    %306 = math.exp %305 : vector<8x128xf32>
    %cst_74 = arith.constant 1.000000e+00 : f32
    %307 = vector.broadcast %cst_74 : f32 to vector<8x128xf32>
    %308 = arith.addf %307, %306 : vector<8x128xf32>
    %309 = arith.divf %307, %308 : vector<8x128xf32>
    %310 = vector.extract_strided_slice %303 {offsets = [0, 128], sizes = [8, 128], strides = [1, 1]} : vector<8x512xf32> to vector<8x128xf32>
    %311 = arith.negf %310 : vector<8x128xf32>
    %312 = math.exp %311 : vector<8x128xf32>
    %cst_75 = arith.constant 1.000000e+00 : f32
    %313 = vector.broadcast %cst_75 : f32 to vector<8x128xf32>
    %314 = arith.addf %313, %312 : vector<8x128xf32>
    %315 = arith.divf %313, %314 : vector<8x128xf32>
    %316 = vector.extract_strided_slice %303 {offsets = [0, 256], sizes = [8, 128], strides = [1, 1]} : vector<8x512xf32> to vector<8x128xf32>
    %317 = math.tanh %316 : vector<8x128xf32>
    %318 = vector.extract_strided_slice %303 {offsets = [0, 384], sizes = [8, 128], strides = [1, 1]} : vector<8x512xf32> to vector<8x128xf32>
    %319 = arith.negf %318 : vector<8x128xf32>
    %320 = math.exp %319 : vector<8x128xf32>
    %cst_76 = arith.constant 1.000000e+00 : f32
    %321 = vector.broadcast %cst_76 : f32 to vector<8x128xf32>
    %322 = arith.addf %321, %320 : vector<8x128xf32>
    %323 = arith.divf %321, %322 : vector<8x128xf32>
    %324 = arith.mulf %315, %295 : vector<8x128xf32>
    %325 = arith.mulf %309, %317 : vector<8x128xf32>
    %326 = arith.addf %324, %325 : vector<8x128xf32>
    %327 = math.tanh %326 : vector<8x128xf32>
    %328 = arith.mulf %323, %327 : vector<8x128xf32>
    %c2_77 = arith.constant 2 : index
    %c0_78 = arith.constant 0 : index
    %c0_79 = arith.constant 0 : index
    %329 = vector.load %arg9[%c2_77, %c0_78, %c0_79] : memref<16x8x128xf32, #tpu.memory_space<vmem>>, vector<1x8x128xf32>
    %330 = vector.shape_cast %329 : vector<1x8x128xf32> to vector<8x128xf32>
    %331 = vector.shape_cast %328 : vector<8x128xf32> to vector<1x8x128xf32>
    tpu.vector_store %arg9[%c2_77, %c0_78, %c0_79], %331 {strides = array<i32>} : memref<16x8x128xf32, #tpu.memory_space<vmem>>, vector<1x8x128xf32>,
    %cst_80 = arith.constant dense<0.000000e+00> : vector<8x512xf32>
    %332 = tpu.matmul %328, %3, %cst_80 {dimension_numbers = #tpu.dot_dimension_numbers<[1], [0], [0], [1], [0, 0, 1, 1], [], []>} : vector<8x128xf32>, vector<128x512xf32>, vector<8x512xf32> -> vector<8x512xf32>
    %333 = vector.broadcast %4 : vector<1x512xf32> to vector<8x512xf32>
    %334 = arith.addf %332, %333 : vector<8x512xf32>
    %335 = vector.extract_strided_slice %334 {offsets = [0, 0], sizes = [8, 128], strides = [1, 1]} : vector<8x512xf32> to vector<8x128xf32>
    %336 = arith.negf %335 : vector<8x128xf32>
    %337 = math.exp %336 : vector<8x128xf32>
    %cst_81 = arith.constant 1.000000e+00 : f32
    %338 = vector.broadcast %cst_81 : f32 to vector<8x128xf32>
    %339 = arith.addf %338, %337 : vector<8x128xf32>
    %340 = arith.divf %338, %339 : vector<8x128xf32>
    %341 = vector.extract_strided_slice %334 {offsets = [0, 128], sizes = [8, 128], strides = [1, 1]} : vector<8x512xf32> to vector<8x128xf32>
    %342 = arith.negf %341 : vector<8x128xf32>
    %343 = math.exp %342 : vector<8x128xf32>
    %cst_82 = arith.constant 1.000000e+00 : f32
    %344 = vector.broadcast %cst_82 : f32 to vector<8x128xf32>
    %345 = arith.addf %344, %343 : vector<8x128xf32>
    %346 = arith.divf %344, %345 : vector<8x128xf32>
    %347 = vector.extract_strided_slice %334 {offsets = [0, 256], sizes = [8, 128], strides = [1, 1]} : vector<8x512xf32> to vector<8x128xf32>
    %348 = math.tanh %347 : vector<8x128xf32>
    %349 = vector.extract_strided_slice %334 {offsets = [0, 384], sizes = [8, 128], strides = [1, 1]} : vector<8x512xf32> to vector<8x128xf32>
    %350 = arith.negf %349 : vector<8x128xf32>
    %351 = math.exp %350 : vector<8x128xf32>
    %cst_83 = arith.constant 1.000000e+00 : f32
    %352 = vector.broadcast %cst_83 : f32 to vector<8x128xf32>
    %353 = arith.addf %352, %351 : vector<8x128xf32>
    %354 = arith.divf %352, %353 : vector<8x128xf32>
    %355 = arith.mulf %346, %326 : vector<8x128xf32>
    %356 = arith.mulf %340, %348 : vector<8x128xf32>
    %357 = arith.addf %355, %356 : vector<8x128xf32>
    %358 = math.tanh %357 : vector<8x128xf32>
    %359 = arith.mulf %354, %358 : vector<8x128xf32>
    %c3_84 = arith.constant 3 : index
    %c0_85 = arith.constant 0 : index
    %c0_86 = arith.constant 0 : index
    %360 = vector.load %arg9[%c3_84, %c0_85, %c0_86] : memref<16x8x128xf32, #tpu.memory_space<vmem>>, vector<1x8x128xf32>
    %361 = vector.shape_cast %360 : vector<1x8x128xf32> to vector<8x128xf32>
    %362 = vector.shape_cast %359 : vector<8x128xf32> to vector<1x8x128xf32>
    tpu.vector_store %arg9[%c3_84, %c0_85, %c0_86], %362 {strides = array<i32>} : memref<16x8x128xf32, #tpu.memory_space<vmem>>, vector<1x8x128xf32>,
    %cst_87 = arith.constant dense<0.000000e+00> : vector<8x512xf32>
    %363 = tpu.matmul %359, %3, %cst_87 {dimension_numbers = #tpu.dot_dimension_numbers<[1], [0], [0], [1], [0, 0, 1, 1], [], []>} : vector<8x128xf32>, vector<128x512xf32>, vector<8x512xf32> -> vector<8x512xf32>
    %364 = vector.broadcast %4 : vector<1x512xf32> to vector<8x512xf32>
    %365 = arith.addf %363, %364 : vector<8x512xf32>
    %366 = vector.extract_strided_slice %365 {offsets = [0, 0], sizes = [8, 128], strides = [1, 1]} : vector<8x512xf32> to vector<8x128xf32>
    %367 = arith.negf %366 : vector<8x128xf32>
    %368 = math.exp %367 : vector<8x128xf32>
    %cst_88 = arith.constant 1.000000e+00 : f32
    %369 = vector.broadcast %cst_88 : f32 to vector<8x128xf32>
    %370 = arith.addf %369, %368 : vector<8x128xf32>
    %371 = arith.divf %369, %370 : vector<8x128xf32>
    %372 = vector.extract_strided_slice %365 {offsets = [0, 128], sizes = [8, 128], strides = [1, 1]} : vector<8x512xf32> to vector<8x128xf32>
    %373 = arith.negf %372 : vector<8x128xf32>
    %374 = math.exp %373 : vector<8x128xf32>
    %cst_89 = arith.constant 1.000000e+00 : f32
    %375 = vector.broadcast %cst_89 : f32 to vector<8x128xf32>
    %376 = arith.addf %375, %374 : vector<8x128xf32>
    %377 = arith.divf %375, %376 : vector<8x128xf32>
    %378 = vector.extract_strided_slice %365 {offsets = [0, 256], sizes = [8, 128], strides = [1, 1]} : vector<8x512xf32> to vector<8x128xf32>
    %379 = math.tanh %378 : vector<8x128xf32>
    %380 = vector.extract_strided_slice %365 {offsets = [0, 384], sizes = [8, 128], strides = [1, 1]} : vector<8x512xf32> to vector<8x128xf32>
    %381 = arith.negf %380 : vector<8x128xf32>
    %382 = math.exp %381 : vector<8x128xf32>
    %cst_90 = arith.constant 1.000000e+00 : f32
    %383 = vector.broadcast %cst_90 : f32 to vector<8x128xf32>
    %384 = arith.addf %383, %382 : vector<8x128xf32>
    %385 = arith.divf %383, %384 : vector<8x128xf32>
    %386 = arith.mulf %377, %357 : vector<8x128xf32>
    %387 = arith.mulf %371, %379 : vector<8x128xf32>
    %388 = arith.addf %386, %387 : vector<8x128xf32>
    %389 = math.tanh %388 : vector<8x128xf32>
    %390 = arith.mulf %385, %389 : vector<8x128xf32>
    %c4_91 = arith.constant 4 : index
    %c0_92 = arith.constant 0 : index
    %c0_93 = arith.constant 0 : index
    %391 = vector.load %arg9[%c4_91, %c0_92, %c0_93] : memref<16x8x128xf32, #tpu.memory_space<vmem>>, vector<1x8x128xf32>
    %392 = vector.shape_cast %391 : vector<1x8x128xf32> to vector<8x128xf32>
    %393 = vector.shape_cast %390 : vector<8x128xf32> to vector<1x8x128xf32>
    tpu.vector_store %arg9[%c4_91, %c0_92, %c0_93], %393 {strides = array<i32>} : memref<16x8x128xf32, #tpu.memory_space<vmem>>, vector<1x8x128xf32>,
    %cst_94 = arith.constant dense<0.000000e+00> : vector<8x512xf32>
    %394 = tpu.matmul %390, %3, %cst_94 {dimension_numbers = #tpu.dot_dimension_numbers<[1], [0], [0], [1], [0, 0, 1, 1], [], []>} : vector<8x128xf32>, vector<128x512xf32>, vector<8x512xf32> -> vector<8x512xf32>
    %395 = vector.broadcast %4 : vector<1x512xf32> to vector<8x512xf32>
    %396 = arith.addf %394, %395 : vector<8x512xf32>
    %397 = vector.extract_strided_slice %396 {offsets = [0, 0], sizes = [8, 128], strides = [1, 1]} : vector<8x512xf32> to vector<8x128xf32>
    %398 = arith.negf %397 : vector<8x128xf32>
    %399 = math.exp %398 : vector<8x128xf32>
    %cst_95 = arith.constant 1.000000e+00 : f32
    %400 = vector.broadcast %cst_95 : f32 to vector<8x128xf32>
    %401 = arith.addf %400, %399 : vector<8x128xf32>
    %402 = arith.divf %400, %401 : vector<8x128xf32>
    %403 = vector.extract_strided_slice %396 {offsets = [0, 128], sizes = [8, 128], strides = [1, 1]} : vector<8x512xf32> to vector<8x128xf32>
    %404 = arith.negf %403 : vector<8x128xf32>
    %405 = math.exp %404 : vector<8x128xf32>
    %cst_96 = arith.constant 1.000000e+00 : f32
    %406 = vector.broadcast %cst_96 : f32 to vector<8x128xf32>
    %407 = arith.addf %406, %405 : vector<8x128xf32>
    %408 = arith.divf %406, %407 : vector<8x128xf32>
    %409 = vector.extract_strided_slice %396 {offsets = [0, 256], sizes = [8, 128], strides = [1, 1]} : vector<8x512xf32> to vector<8x128xf32>
    %410 = math.tanh %409 : vector<8x128xf32>
    %411 = vector.extract_strided_slice %396 {offsets = [0, 384], sizes = [8, 128], strides = [1, 1]} : vector<8x512xf32> to vector<8x128xf32>
    %412 = arith.negf %411 : vector<8x128xf32>
    %413 = math.exp %412 : vector<8x128xf32>
    %cst_97 = arith.constant 1.000000e+00 : f32
    %414 = vector.broadcast %cst_97 : f32 to vector<8x128xf32>
    %415 = arith.addf %414, %413 : vector<8x128xf32>
    %416 = arith.divf %414, %415 : vector<8x128xf32>
    %417 = arith.mulf %408, %388 : vector<8x128xf32>
    %418 = arith.mulf %402, %410 : vector<8x128xf32>
    %419 = arith.addf %417, %418 : vector<8x128xf32>
    %420 = math.tanh %419 : vector<8x128xf32>
    %421 = arith.mulf %416, %420 : vector<8x128xf32>
    %c5_98 = arith.constant 5 : index
    %c0_99 = arith.constant 0 : index
    %c0_100 = arith.constant 0 : index
    %422 = vector.load %arg9[%c5_98, %c0_99, %c0_100] : memref<16x8x128xf32, #tpu.memory_space<vmem>>, vector<1x8x128xf32>
    %423 = vector.shape_cast %422 : vector<1x8x128xf32> to vector<8x128xf32>
    %424 = vector.shape_cast %421 : vector<8x128xf32> to vector<1x8x128xf32>
    tpu.vector_store %arg9[%c5_98, %c0_99, %c0_100], %424 {strides = array<i32>} : memref<16x8x128xf32, #tpu.memory_space<vmem>>, vector<1x8x128xf32>,
    %cst_101 = arith.constant dense<0.000000e+00> : vector<8x512xf32>
    %425 = tpu.matmul %421, %3, %cst_101 {dimension_numbers = #tpu.dot_dimension_numbers<[1], [0], [0], [1], [0, 0, 1, 1], [], []>} : vector<8x128xf32>, vector<128x512xf32>, vector<8x512xf32> -> vector<8x512xf32>
    %426 = vector.broadcast %4 : vector<1x512xf32> to vector<8x512xf32>
    %427 = arith.addf %425, %426 : vector<8x512xf32>
    %428 = vector.extract_strided_slice %427 {offsets = [0, 0], sizes = [8, 128], strides = [1, 1]} : vector<8x512xf32> to vector<8x128xf32>
    %429 = arith.negf %428 : vector<8x128xf32>
    %430 = math.exp %429 : vector<8x128xf32>
    %cst_102 = arith.constant 1.000000e+00 : f32
    %431 = vector.broadcast %cst_102 : f32 to vector<8x128xf32>
    %432 = arith.addf %431, %430 : vector<8x128xf32>
    %433 = arith.divf %431, %432 : vector<8x128xf32>
    %434 = vector.extract_strided_slice %427 {offsets = [0, 128], sizes = [8, 128], strides = [1, 1]} : vector<8x512xf32> to vector<8x128xf32>
    %435 = arith.negf %434 : vector<8x128xf32>
    %436 = math.exp %435 : vector<8x128xf32>
    %cst_103 = arith.constant 1.000000e+00 : f32
    %437 = vector.broadcast %cst_103 : f32 to vector<8x128xf32>
    %438 = arith.addf %437, %436 : vector<8x128xf32>
    %439 = arith.divf %437, %438 : vector<8x128xf32>
    %440 = vector.extract_strided_slice %427 {offsets = [0, 256], sizes = [8, 128], strides = [1, 1]} : vector<8x512xf32> to vector<8x128xf32>
    %441 = math.tanh %440 : vector<8x128xf32>
    %442 = vector.extract_strided_slice %427 {offsets = [0, 384], sizes = [8, 128], strides = [1, 1]} : vector<8x512xf32> to vector<8x128xf32>
    %443 = arith.negf %442 : vector<8x128xf32>
    %444 = math.exp %443 : vector<8x128xf32>
    %cst_104 = arith.constant 1.000000e+00 : f32
    %445 = vector.broadcast %cst_104 : f32 to vector<8x128xf32>
    %446 = arith.addf %445, %444 : vector<8x128xf32>
    %447 = arith.divf %445, %446 : vector<8x128xf32>
    %448 = arith.mulf %439, %419 : vector<8x128xf32>
    %449 = arith.mulf %433, %441 : vector<8x128xf32>
    %450 = arith.addf %448, %449 : vector<8x128xf32>
    %451 = math.tanh %450 : vector<8x128xf32>
    %452 = arith.mulf %447, %451 : vector<8x128xf32>
    %c6_105 = arith.constant 6 : index
    %c0_106 = arith.constant 0 : index
    %c0_107 = arith.constant 0 : index
    %453 = vector.load %arg9[%c6_105, %c0_106, %c0_107] : memref<16x8x128xf32, #tpu.memory_space<vmem>>, vector<1x8x128xf32>
    %454 = vector.shape_cast %453 : vector<1x8x128xf32> to vector<8x128xf32>
    %455 = vector.shape_cast %452 : vector<8x128xf32> to vector<1x8x128xf32>
    tpu.vector_store %arg9[%c6_105, %c0_106, %c0_107], %455 {strides = array<i32>} : memref<16x8x128xf32, #tpu.memory_space<vmem>>, vector<1x8x128xf32>,
    %cst_108 = arith.constant dense<0.000000e+00> : vector<8x512xf32>
    %456 = tpu.matmul %452, %3, %cst_108 {dimension_numbers = #tpu.dot_dimension_numbers<[1], [0], [0], [1], [0, 0, 1, 1], [], []>} : vector<8x128xf32>, vector<128x512xf32>, vector<8x512xf32> -> vector<8x512xf32>
    %457 = vector.broadcast %4 : vector<1x512xf32> to vector<8x512xf32>
    %458 = arith.addf %456, %457 : vector<8x512xf32>
    %459 = vector.extract_strided_slice %458 {offsets = [0, 0], sizes = [8, 128], strides = [1, 1]} : vector<8x512xf32> to vector<8x128xf32>
    %460 = arith.negf %459 : vector<8x128xf32>
    %461 = math.exp %460 : vector<8x128xf32>
    %cst_109 = arith.constant 1.000000e+00 : f32
    %462 = vector.broadcast %cst_109 : f32 to vector<8x128xf32>
    %463 = arith.addf %462, %461 : vector<8x128xf32>
    %464 = arith.divf %462, %463 : vector<8x128xf32>
    %465 = vector.extract_strided_slice %458 {offsets = [0, 128], sizes = [8, 128], strides = [1, 1]} : vector<8x512xf32> to vector<8x128xf32>
    %466 = arith.negf %465 : vector<8x128xf32>
    %467 = math.exp %466 : vector<8x128xf32>
    %cst_110 = arith.constant 1.000000e+00 : f32
    %468 = vector.broadcast %cst_110 : f32 to vector<8x128xf32>
    %469 = arith.addf %468, %467 : vector<8x128xf32>
    %470 = arith.divf %468, %469 : vector<8x128xf32>
    %471 = vector.extract_strided_slice %458 {offsets = [0, 256], sizes = [8, 128], strides = [1, 1]} : vector<8x512xf32> to vector<8x128xf32>
    %472 = math.tanh %471 : vector<8x128xf32>
    %473 = vector.extract_strided_slice %458 {offsets = [0, 384], sizes = [8, 128], strides = [1, 1]} : vector<8x512xf32> to vector<8x128xf32>
    %474 = arith.negf %473 : vector<8x128xf32>
    %475 = math.exp %474 : vector<8x128xf32>
    %cst_111 = arith.constant 1.000000e+00 : f32
    %476 = vector.broadcast %cst_111 : f32 to vector<8x128xf32>
    %477 = arith.addf %476, %475 : vector<8x128xf32>
    %478 = arith.divf %476, %477 : vector<8x128xf32>
    %479 = arith.mulf %470, %450 : vector<8x128xf32>
    %480 = arith.mulf %464, %472 : vector<8x128xf32>
    %481 = arith.addf %479, %480 : vector<8x128xf32>
    %482 = math.tanh %481 : vector<8x128xf32>
    %483 = arith.mulf %478, %482 : vector<8x128xf32>
    %c7_112 = arith.constant 7 : index
    %c0_113 = arith.constant 0 : index
    %c0_114 = arith.constant 0 : index
    %484 = vector.load %arg9[%c7_112, %c0_113, %c0_114] : memref<16x8x128xf32, #tpu.memory_space<vmem>>, vector<1x8x128xf32>
    %485 = vector.shape_cast %484 : vector<1x8x128xf32> to vector<8x128xf32>
    %486 = vector.shape_cast %483 : vector<8x128xf32> to vector<1x8x128xf32>
    tpu.vector_store %arg9[%c7_112, %c0_113, %c0_114], %486 {strides = array<i32>} : memref<16x8x128xf32, #tpu.memory_space<vmem>>, vector<1x8x128xf32>,
    %cst_115 = arith.constant dense<0.000000e+00> : vector<8x512xf32>
    %487 = tpu.matmul %483, %3, %cst_115 {dimension_numbers = #tpu.dot_dimension_numbers<[1], [0], [0], [1], [0, 0, 1, 1], [], []>} : vector<8x128xf32>, vector<128x512xf32>, vector<8x512xf32> -> vector<8x512xf32>
    %488 = vector.broadcast %4 : vector<1x512xf32> to vector<8x512xf32>
    %489 = arith.addf %487, %488 : vector<8x512xf32>
    %490 = vector.extract_strided_slice %489 {offsets = [0, 0], sizes = [8, 128], strides = [1, 1]} : vector<8x512xf32> to vector<8x128xf32>
    %491 = arith.negf %490 : vector<8x128xf32>
    %492 = math.exp %491 : vector<8x128xf32>
    %cst_116 = arith.constant 1.000000e+00 : f32
    %493 = vector.broadcast %cst_116 : f32 to vector<8x128xf32>
    %494 = arith.addf %493, %492 : vector<8x128xf32>
    %495 = arith.divf %493, %494 : vector<8x128xf32>
    %496 = vector.extract_strided_slice %489 {offsets = [0, 128], sizes = [8, 128], strides = [1, 1]} : vector<8x512xf32> to vector<8x128xf32>
    %497 = arith.negf %496 : vector<8x128xf32>
    %498 = math.exp %497 : vector<8x128xf32>
    %cst_117 = arith.constant 1.000000e+00 : f32
    %499 = vector.broadcast %cst_117 : f32 to vector<8x128xf32>
    %500 = arith.addf %499, %498 : vector<8x128xf32>
    %501 = arith.divf %499, %500 : vector<8x128xf32>
    %502 = vector.extract_strided_slice %489 {offsets = [0, 256], sizes = [8, 128], strides = [1, 1]} : vector<8x512xf32> to vector<8x128xf32>
    %503 = math.tanh %502 : vector<8x128xf32>
    %504 = vector.extract_strided_slice %489 {offsets = [0, 384], sizes = [8, 128], strides = [1, 1]} : vector<8x512xf32> to vector<8x128xf32>
    %505 = arith.negf %504 : vector<8x128xf32>
    %506 = math.exp %505 : vector<8x128xf32>
    %cst_118 = arith.constant 1.000000e+00 : f32
    %507 = vector.broadcast %cst_118 : f32 to vector<8x128xf32>
    %508 = arith.addf %507, %506 : vector<8x128xf32>
    %509 = arith.divf %507, %508 : vector<8x128xf32>
    %510 = arith.mulf %501, %481 : vector<8x128xf32>
    %511 = arith.mulf %495, %503 : vector<8x128xf32>
    %512 = arith.addf %510, %511 : vector<8x128xf32>
    %513 = math.tanh %512 : vector<8x128xf32>
    %514 = arith.mulf %509, %513 : vector<8x128xf32>
    %c8 = arith.constant 8 : index
    %c0_119 = arith.constant 0 : index
    %c0_120 = arith.constant 0 : index
    %515 = vector.load %arg9[%c8, %c0_119, %c0_120] : memref<16x8x128xf32, #tpu.memory_space<vmem>>, vector<1x8x128xf32>
    %516 = vector.shape_cast %515 : vector<1x8x128xf32> to vector<8x128xf32>
    %517 = vector.shape_cast %514 : vector<8x128xf32> to vector<1x8x128xf32>
    tpu.vector_store %arg9[%c8, %c0_119, %c0_120], %517 {strides = array<i32>} : memref<16x8x128xf32, #tpu.memory_space<vmem>>, vector<1x8x128xf32>,
    %cst_121 = arith.constant dense<0.000000e+00> : vector<8x512xf32>
    %518 = tpu.matmul %514, %3, %cst_121 {dimension_numbers = #tpu.dot_dimension_numbers<[1], [0], [0], [1], [0, 0, 1, 1], [], []>} : vector<8x128xf32>, vector<128x512xf32>, vector<8x512xf32> -> vector<8x512xf32>
    %519 = vector.broadcast %4 : vector<1x512xf32> to vector<8x512xf32>
    %520 = arith.addf %518, %519 : vector<8x512xf32>
    %521 = vector.extract_strided_slice %520 {offsets = [0, 0], sizes = [8, 128], strides = [1, 1]} : vector<8x512xf32> to vector<8x128xf32>
    %522 = arith.negf %521 : vector<8x128xf32>
    %523 = math.exp %522 : vector<8x128xf32>
    %cst_122 = arith.constant 1.000000e+00 : f32
    %524 = vector.broadcast %cst_122 : f32 to vector<8x128xf32>
    %525 = arith.addf %524, %523 : vector<8x128xf32>
    %526 = arith.divf %524, %525 : vector<8x128xf32>
    %527 = vector.extract_strided_slice %520 {offsets = [0, 128], sizes = [8, 128], strides = [1, 1]} : vector<8x512xf32> to vector<8x128xf32>
    %528 = arith.negf %527 : vector<8x128xf32>
    %529 = math.exp %528 : vector<8x128xf32>
    %cst_123 = arith.constant 1.000000e+00 : f32
    %530 = vector.broadcast %cst_123 : f32 to vector<8x128xf32>
    %531 = arith.addf %530, %529 : vector<8x128xf32>
    %532 = arith.divf %530, %531 : vector<8x128xf32>
    %533 = vector.extract_strided_slice %520 {offsets = [0, 256], sizes = [8, 128], strides = [1, 1]} : vector<8x512xf32> to vector<8x128xf32>
    %534 = math.tanh %533 : vector<8x128xf32>
    %535 = vector.extract_strided_slice %520 {offsets = [0, 384], sizes = [8, 128], strides = [1, 1]} : vector<8x512xf32> to vector<8x128xf32>
    %536 = arith.negf %535 : vector<8x128xf32>
    %537 = math.exp %536 : vector<8x128xf32>
    %cst_124 = arith.constant 1.000000e+00 : f32
    %538 = vector.broadcast %cst_124 : f32 to vector<8x128xf32>
    %539 = arith.addf %538, %537 : vector<8x128xf32>
    %540 = arith.divf %538, %539 : vector<8x128xf32>
    %541 = arith.mulf %532, %512 : vector<8x128xf32>
    %542 = arith.mulf %526, %534 : vector<8x128xf32>
    %543 = arith.addf %541, %542 : vector<8x128xf32>
    %544 = math.tanh %543 : vector<8x128xf32>
    %545 = arith.mulf %540, %544 : vector<8x128xf32>
    %c9 = arith.constant 9 : index
    %c0_125 = arith.constant 0 : index
    %c0_126 = arith.constant 0 : index
    %546 = vector.load %arg9[%c9, %c0_125, %c0_126] : memref<16x8x128xf32, #tpu.memory_space<vmem>>, vector<1x8x128xf32>
    %547 = vector.shape_cast %546 : vector<1x8x128xf32> to vector<8x128xf32>
    %548 = vector.shape_cast %545 : vector<8x128xf32> to vector<1x8x128xf32>
    tpu.vector_store %arg9[%c9, %c0_125, %c0_126], %548 {strides = array<i32>} : memref<16x8x128xf32, #tpu.memory_space<vmem>>, vector<1x8x128xf32>,
    %cst_127 = arith.constant dense<0.000000e+00> : vector<8x512xf32>
    %549 = tpu.matmul %545, %3, %cst_127 {dimension_numbers = #tpu.dot_dimension_numbers<[1], [0], [0], [1], [0, 0, 1, 1], [], []>} : vector<8x128xf32>, vector<128x512xf32>, vector<8x512xf32> -> vector<8x512xf32>
    %550 = vector.broadcast %4 : vector<1x512xf32> to vector<8x512xf32>
    %551 = arith.addf %549, %550 : vector<8x512xf32>
    %552 = vector.extract_strided_slice %551 {offsets = [0, 0], sizes = [8, 128], strides = [1, 1]} : vector<8x512xf32> to vector<8x128xf32>
    %553 = arith.negf %552 : vector<8x128xf32>
    %554 = math.exp %553 : vector<8x128xf32>
    %cst_128 = arith.constant 1.000000e+00 : f32
    %555 = vector.broadcast %cst_128 : f32 to vector<8x128xf32>
    %556 = arith.addf %555, %554 : vector<8x128xf32>
    %557 = arith.divf %555, %556 : vector<8x128xf32>
    %558 = vector.extract_strided_slice %551 {offsets = [0, 128], sizes = [8, 128], strides = [1, 1]} : vector<8x512xf32> to vector<8x128xf32>
    %559 = arith.negf %558 : vector<8x128xf32>
    %560 = math.exp %559 : vector<8x128xf32>
    %cst_129 = arith.constant 1.000000e+00 : f32
    %561 = vector.broadcast %cst_129 : f32 to vector<8x128xf32>
    %562 = arith.addf %561, %560 : vector<8x128xf32>
    %563 = arith.divf %561, %562 : vector<8x128xf32>
    %564 = vector.extract_strided_slice %551 {offsets = [0, 256], sizes = [8, 128], strides = [1, 1]} : vector<8x512xf32> to vector<8x128xf32>
    %565 = math.tanh %564 : vector<8x128xf32>
    %566 = vector.extract_strided_slice %551 {offsets = [0, 384], sizes = [8, 128], strides = [1, 1]} : vector<8x512xf32> to vector<8x128xf32>
    %567 = arith.negf %566 : vector<8x128xf32>
    %568 = math.exp %567 : vector<8x128xf32>
    %cst_130 = arith.constant 1.000000e+00 : f32
    %569 = vector.broadcast %cst_130 : f32 to vector<8x128xf32>
    %570 = arith.addf %569, %568 : vector<8x128xf32>
    %571 = arith.divf %569, %570 : vector<8x128xf32>
    %572 = arith.mulf %563, %543 : vector<8x128xf32>
    %573 = arith.mulf %557, %565 : vector<8x128xf32>
    %574 = arith.addf %572, %573 : vector<8x128xf32>
    %575 = math.tanh %574 : vector<8x128xf32>
    %576 = arith.mulf %571, %575 : vector<8x128xf32>
    %c10 = arith.constant 10 : index
    %c0_131 = arith.constant 0 : index
    %c0_132 = arith.constant 0 : index
    %577 = vector.load %arg9[%c10, %c0_131, %c0_132] : memref<16x8x128xf32, #tpu.memory_space<vmem>>, vector<1x8x128xf32>
    %578 = vector.shape_cast %577 : vector<1x8x128xf32> to vector<8x128xf32>
    %579 = vector.shape_cast %576 : vector<8x128xf32> to vector<1x8x128xf32>
    tpu.vector_store %arg9[%c10, %c0_131, %c0_132], %579 {strides = array<i32>} : memref<16x8x128xf32, #tpu.memory_space<vmem>>, vector<1x8x128xf32>,
    %cst_133 = arith.constant dense<0.000000e+00> : vector<8x512xf32>
    %580 = tpu.matmul %576, %3, %cst_133 {dimension_numbers = #tpu.dot_dimension_numbers<[1], [0], [0], [1], [0, 0, 1, 1], [], []>} : vector<8x128xf32>, vector<128x512xf32>, vector<8x512xf32> -> vector<8x512xf32>
    %581 = vector.broadcast %4 : vector<1x512xf32> to vector<8x512xf32>
    %582 = arith.addf %580, %581 : vector<8x512xf32>
    %583 = vector.extract_strided_slice %582 {offsets = [0, 0], sizes = [8, 128], strides = [1, 1]} : vector<8x512xf32> to vector<8x128xf32>
    %584 = arith.negf %583 : vector<8x128xf32>
    %585 = math.exp %584 : vector<8x128xf32>
    %cst_134 = arith.constant 1.000000e+00 : f32
    %586 = vector.broadcast %cst_134 : f32 to vector<8x128xf32>
    %587 = arith.addf %586, %585 : vector<8x128xf32>
    %588 = arith.divf %586, %587 : vector<8x128xf32>
    %589 = vector.extract_strided_slice %582 {offsets = [0, 128], sizes = [8, 128], strides = [1, 1]} : vector<8x512xf32> to vector<8x128xf32>
    %590 = arith.negf %589 : vector<8x128xf32>
    %591 = math.exp %590 : vector<8x128xf32>
    %cst_135 = arith.constant 1.000000e+00 : f32
    %592 = vector.broadcast %cst_135 : f32 to vector<8x128xf32>
    %593 = arith.addf %592, %591 : vector<8x128xf32>
    %594 = arith.divf %592, %593 : vector<8x128xf32>
    %595 = vector.extract_strided_slice %582 {offsets = [0, 256], sizes = [8, 128], strides = [1, 1]} : vector<8x512xf32> to vector<8x128xf32>
    %596 = math.tanh %595 : vector<8x128xf32>
    %597 = vector.extract_strided_slice %582 {offsets = [0, 384], sizes = [8, 128], strides = [1, 1]} : vector<8x512xf32> to vector<8x128xf32>
    %598 = arith.negf %597 : vector<8x128xf32>
    %599 = math.exp %598 : vector<8x128xf32>
    %cst_136 = arith.constant 1.000000e+00 : f32
    %600 = vector.broadcast %cst_136 : f32 to vector<8x128xf32>
    %601 = arith.addf %600, %599 : vector<8x128xf32>
    %602 = arith.divf %600, %601 : vector<8x128xf32>
    %603 = arith.mulf %594, %574 : vector<8x128xf32>
    %604 = arith.mulf %588, %596 : vector<8x128xf32>
    %605 = arith.addf %603, %604 : vector<8x128xf32>
    %606 = math.tanh %605 : vector<8x128xf32>
    %607 = arith.mulf %602, %606 : vector<8x128xf32>
    %c11 = arith.constant 11 : index
    %c0_137 = arith.constant 0 : index
    %c0_138 = arith.constant 0 : index
    %608 = vector.load %arg9[%c11, %c0_137, %c0_138] : memref<16x8x128xf32, #tpu.memory_space<vmem>>, vector<1x8x128xf32>
    %609 = vector.shape_cast %608 : vector<1x8x128xf32> to vector<8x128xf32>
    %610 = vector.shape_cast %607 : vector<8x128xf32> to vector<1x8x128xf32>
    tpu.vector_store %arg9[%c11, %c0_137, %c0_138], %610 {strides = array<i32>} : memref<16x8x128xf32, #tpu.memory_space<vmem>>, vector<1x8x128xf32>,
    %cst_139 = arith.constant dense<0.000000e+00> : vector<8x512xf32>
    %611 = tpu.matmul %607, %3, %cst_139 {dimension_numbers = #tpu.dot_dimension_numbers<[1], [0], [0], [1], [0, 0, 1, 1], [], []>} : vector<8x128xf32>, vector<128x512xf32>, vector<8x512xf32> -> vector<8x512xf32>
    %612 = vector.broadcast %4 : vector<1x512xf32> to vector<8x512xf32>
    %613 = arith.addf %611, %612 : vector<8x512xf32>
    %614 = vector.extract_strided_slice %613 {offsets = [0, 0], sizes = [8, 128], strides = [1, 1]} : vector<8x512xf32> to vector<8x128xf32>
    %615 = arith.negf %614 : vector<8x128xf32>
    %616 = math.exp %615 : vector<8x128xf32>
    %cst_140 = arith.constant 1.000000e+00 : f32
    %617 = vector.broadcast %cst_140 : f32 to vector<8x128xf32>
    %618 = arith.addf %617, %616 : vector<8x128xf32>
    %619 = arith.divf %617, %618 : vector<8x128xf32>
    %620 = vector.extract_strided_slice %613 {offsets = [0, 128], sizes = [8, 128], strides = [1, 1]} : vector<8x512xf32> to vector<8x128xf32>
    %621 = arith.negf %620 : vector<8x128xf32>
    %622 = math.exp %621 : vector<8x128xf32>
    %cst_141 = arith.constant 1.000000e+00 : f32
    %623 = vector.broadcast %cst_141 : f32 to vector<8x128xf32>
    %624 = arith.addf %623, %622 : vector<8x128xf32>
    %625 = arith.divf %623, %624 : vector<8x128xf32>
    %626 = vector.extract_strided_slice %613 {offsets = [0, 256], sizes = [8, 128], strides = [1, 1]} : vector<8x512xf32> to vector<8x128xf32>
    %627 = math.tanh %626 : vector<8x128xf32>
    %628 = vector.extract_strided_slice %613 {offsets = [0, 384], sizes = [8, 128], strides = [1, 1]} : vector<8x512xf32> to vector<8x128xf32>
    %629 = arith.negf %628 : vector<8x128xf32>
    %630 = math.exp %629 : vector<8x128xf32>
    %cst_142 = arith.constant 1.000000e+00 : f32
    %631 = vector.broadcast %cst_142 : f32 to vector<8x128xf32>
    %632 = arith.addf %631, %630 : vector<8x128xf32>
    %633 = arith.divf %631, %632 : vector<8x128xf32>
    %634 = arith.mulf %625, %605 : vector<8x128xf32>
    %635 = arith.mulf %619, %627 : vector<8x128xf32>
    %636 = arith.addf %634, %635 : vector<8x128xf32>
    %637 = math.tanh %636 : vector<8x128xf32>
    %638 = arith.mulf %633, %637 : vector<8x128xf32>
    %c12 = arith.constant 12 : index
    %c0_143 = arith.constant 0 : index
    %c0_144 = arith.constant 0 : index
    %639 = vector.load %arg9[%c12, %c0_143, %c0_144] : memref<16x8x128xf32, #tpu.memory_space<vmem>>, vector<1x8x128xf32>
    %640 = vector.shape_cast %639 : vector<1x8x128xf32> to vector<8x128xf32>
    %641 = vector.shape_cast %638 : vector<8x128xf32> to vector<1x8x128xf32>
    tpu.vector_store %arg9[%c12, %c0_143, %c0_144], %641 {strides = array<i32>} : memref<16x8x128xf32, #tpu.memory_space<vmem>>, vector<1x8x128xf32>,
    %cst_145 = arith.constant dense<0.000000e+00> : vector<8x512xf32>
    %642 = tpu.matmul %638, %3, %cst_145 {dimension_numbers = #tpu.dot_dimension_numbers<[1], [0], [0], [1], [0, 0, 1, 1], [], []>} : vector<8x128xf32>, vector<128x512xf32>, vector<8x512xf32> -> vector<8x512xf32>
    %643 = vector.broadcast %4 : vector<1x512xf32> to vector<8x512xf32>
    %644 = arith.addf %642, %643 : vector<8x512xf32>
    %645 = vector.extract_strided_slice %644 {offsets = [0, 0], sizes = [8, 128], strides = [1, 1]} : vector<8x512xf32> to vector<8x128xf32>
    %646 = arith.negf %645 : vector<8x128xf32>
    %647 = math.exp %646 : vector<8x128xf32>
    %cst_146 = arith.constant 1.000000e+00 : f32
    %648 = vector.broadcast %cst_146 : f32 to vector<8x128xf32>
    %649 = arith.addf %648, %647 : vector<8x128xf32>
    %650 = arith.divf %648, %649 : vector<8x128xf32>
    %651 = vector.extract_strided_slice %644 {offsets = [0, 128], sizes = [8, 128], strides = [1, 1]} : vector<8x512xf32> to vector<8x128xf32>
    %652 = arith.negf %651 : vector<8x128xf32>
    %653 = math.exp %652 : vector<8x128xf32>
    %cst_147 = arith.constant 1.000000e+00 : f32
    %654 = vector.broadcast %cst_147 : f32 to vector<8x128xf32>
    %655 = arith.addf %654, %653 : vector<8x128xf32>
    %656 = arith.divf %654, %655 : vector<8x128xf32>
    %657 = vector.extract_strided_slice %644 {offsets = [0, 256], sizes = [8, 128], strides = [1, 1]} : vector<8x512xf32> to vector<8x128xf32>
    %658 = math.tanh %657 : vector<8x128xf32>
    %659 = vector.extract_strided_slice %644 {offsets = [0, 384], sizes = [8, 128], strides = [1, 1]} : vector<8x512xf32> to vector<8x128xf32>
    %660 = arith.negf %659 : vector<8x128xf32>
    %661 = math.exp %660 : vector<8x128xf32>
    %cst_148 = arith.constant 1.000000e+00 : f32
    %662 = vector.broadcast %cst_148 : f32 to vector<8x128xf32>
    %663 = arith.addf %662, %661 : vector<8x128xf32>
    %664 = arith.divf %662, %663 : vector<8x128xf32>
    %665 = arith.mulf %656, %636 : vector<8x128xf32>
    %666 = arith.mulf %650, %658 : vector<8x128xf32>
    %667 = arith.addf %665, %666 : vector<8x128xf32>
    %668 = math.tanh %667 : vector<8x128xf32>
    %669 = arith.mulf %664, %668 : vector<8x128xf32>
    %c13 = arith.constant 13 : index
    %c0_149 = arith.constant 0 : index
    %c0_150 = arith.constant 0 : index
    %670 = vector.load %arg9[%c13, %c0_149, %c0_150] : memref<16x8x128xf32, #tpu.memory_space<vmem>>, vector<1x8x128xf32>
    %671 = vector.shape_cast %670 : vector<1x8x128xf32> to vector<8x128xf32>
    %672 = vector.shape_cast %669 : vector<8x128xf32> to vector<1x8x128xf32>
    tpu.vector_store %arg9[%c13, %c0_149, %c0_150], %672 {strides = array<i32>} : memref<16x8x128xf32, #tpu.memory_space<vmem>>, vector<1x8x128xf32>,
    %cst_151 = arith.constant dense<0.000000e+00> : vector<8x512xf32>
    %673 = tpu.matmul %669, %3, %cst_151 {dimension_numbers = #tpu.dot_dimension_numbers<[1], [0], [0], [1], [0, 0, 1, 1], [], []>} : vector<8x128xf32>, vector<128x512xf32>, vector<8x512xf32> -> vector<8x512xf32>
    %674 = vector.broadcast %4 : vector<1x512xf32> to vector<8x512xf32>
    %675 = arith.addf %673, %674 : vector<8x512xf32>
    %676 = vector.extract_strided_slice %675 {offsets = [0, 0], sizes = [8, 128], strides = [1, 1]} : vector<8x512xf32> to vector<8x128xf32>
    %677 = arith.negf %676 : vector<8x128xf32>
    %678 = math.exp %677 : vector<8x128xf32>
    %cst_152 = arith.constant 1.000000e+00 : f32
    %679 = vector.broadcast %cst_152 : f32 to vector<8x128xf32>
    %680 = arith.addf %679, %678 : vector<8x128xf32>
    %681 = arith.divf %679, %680 : vector<8x128xf32>
    %682 = vector.extract_strided_slice %675 {offsets = [0, 128], sizes = [8, 128], strides = [1, 1]} : vector<8x512xf32> to vector<8x128xf32>
    %683 = arith.negf %682 : vector<8x128xf32>
    %684 = math.exp %683 : vector<8x128xf32>
    %cst_153 = arith.constant 1.000000e+00 : f32
    %685 = vector.broadcast %cst_153 : f32 to vector<8x128xf32>
    %686 = arith.addf %685, %684 : vector<8x128xf32>
    %687 = arith.divf %685, %686 : vector<8x128xf32>
    %688 = vector.extract_strided_slice %675 {offsets = [0, 256], sizes = [8, 128], strides = [1, 1]} : vector<8x512xf32> to vector<8x128xf32>
    %689 = math.tanh %688 : vector<8x128xf32>
    %690 = vector.extract_strided_slice %675 {offsets = [0, 384], sizes = [8, 128], strides = [1, 1]} : vector<8x512xf32> to vector<8x128xf32>
    %691 = arith.negf %690 : vector<8x128xf32>
    %692 = math.exp %691 : vector<8x128xf32>
    %cst_154 = arith.constant 1.000000e+00 : f32
    %693 = vector.broadcast %cst_154 : f32 to vector<8x128xf32>
    %694 = arith.addf %693, %692 : vector<8x128xf32>
    %695 = arith.divf %693, %694 : vector<8x128xf32>
    %696 = arith.mulf %687, %667 : vector<8x128xf32>
    %697 = arith.mulf %681, %689 : vector<8x128xf32>
    %698 = arith.addf %696, %697 : vector<8x128xf32>
    %699 = math.tanh %698 : vector<8x128xf32>
    %700 = arith.mulf %695, %699 : vector<8x128xf32>
    %c14 = arith.constant 14 : index
    %c0_155 = arith.constant 0 : index
    %c0_156 = arith.constant 0 : index
    %701 = vector.load %arg9[%c14, %c0_155, %c0_156] : memref<16x8x128xf32, #tpu.memory_space<vmem>>, vector<1x8x128xf32>
    %702 = vector.shape_cast %701 : vector<1x8x128xf32> to vector<8x128xf32>
    %703 = vector.shape_cast %700 : vector<8x128xf32> to vector<1x8x128xf32>
    tpu.vector_store %arg9[%c14, %c0_155, %c0_156], %703 {strides = array<i32>} : memref<16x8x128xf32, #tpu.memory_space<vmem>>, vector<1x8x128xf32>,
    %cst_157 = arith.constant dense<0.000000e+00> : vector<8x512xf32>
    %704 = tpu.matmul %700, %3, %cst_157 {dimension_numbers = #tpu.dot_dimension_numbers<[1], [0], [0], [1], [0, 0, 1, 1], [], []>} : vector<8x128xf32>, vector<128x512xf32>, vector<8x512xf32> -> vector<8x512xf32>
    %705 = vector.broadcast %4 : vector<1x512xf32> to vector<8x512xf32>
    %706 = arith.addf %704, %705 : vector<8x512xf32>
    %707 = vector.extract_strided_slice %706 {offsets = [0, 0], sizes = [8, 128], strides = [1, 1]} : vector<8x512xf32> to vector<8x128xf32>
    %708 = arith.negf %707 : vector<8x128xf32>
    %709 = math.exp %708 : vector<8x128xf32>
    %cst_158 = arith.constant 1.000000e+00 : f32
    %710 = vector.broadcast %cst_158 : f32 to vector<8x128xf32>
    %711 = arith.addf %710, %709 : vector<8x128xf32>
    %712 = arith.divf %710, %711 : vector<8x128xf32>
    %713 = vector.extract_strided_slice %706 {offsets = [0, 128], sizes = [8, 128], strides = [1, 1]} : vector<8x512xf32> to vector<8x128xf32>
    %714 = arith.negf %713 : vector<8x128xf32>
    %715 = math.exp %714 : vector<8x128xf32>
    %cst_159 = arith.constant 1.000000e+00 : f32
    %716 = vector.broadcast %cst_159 : f32 to vector<8x128xf32>
    %717 = arith.addf %716, %715 : vector<8x128xf32>
    %718 = arith.divf %716, %717 : vector<8x128xf32>
    %719 = vector.extract_strided_slice %706 {offsets = [0, 256], sizes = [8, 128], strides = [1, 1]} : vector<8x512xf32> to vector<8x128xf32>
    %720 = math.tanh %719 : vector<8x128xf32>
    %721 = vector.extract_strided_slice %706 {offsets = [0, 384], sizes = [8, 128], strides = [1, 1]} : vector<8x512xf32> to vector<8x128xf32>
    %722 = arith.negf %721 : vector<8x128xf32>
    %723 = math.exp %722 : vector<8x128xf32>
    %cst_160 = arith.constant 1.000000e+00 : f32
    %724 = vector.broadcast %cst_160 : f32 to vector<8x128xf32>
    %725 = arith.addf %724, %723 : vector<8x128xf32>
    %726 = arith.divf %724, %725 : vector<8x128xf32>
    %727 = arith.mulf %718, %698 : vector<8x128xf32>
    %728 = arith.mulf %712, %720 : vector<8x128xf32>
    %729 = arith.addf %727, %728 : vector<8x128xf32>
    %730 = math.tanh %729 : vector<8x128xf32>
    %731 = arith.mulf %726, %730 : vector<8x128xf32>
    %c15 = arith.constant 15 : index
    %c0_161 = arith.constant 0 : index
    %c0_162 = arith.constant 0 : index
    %732 = vector.load %arg9[%c15, %c0_161, %c0_162] : memref<16x8x128xf32, #tpu.memory_space<vmem>>, vector<1x8x128xf32>
    %733 = vector.shape_cast %732 : vector<1x8x128xf32> to vector<8x128xf32>
    %734 = vector.shape_cast %731 : vector<8x128xf32> to vector<1x8x128xf32>
    tpu.vector_store %arg9[%c15, %c0_161, %c0_162], %734 {strides = array<i32>} : memref<16x8x128xf32, #tpu.memory_space<vmem>>, vector<1x8x128xf32>,
    %c0_163 = arith.constant 0 : index
    %c0_164 = arith.constant 0 : index
    %c0_165 = arith.constant 0 : index
    %735 = vector.load %arg9[%c0_163, %c0_164, %c0_165] : memref<16x8x128xf32, #tpu.memory_space<vmem>>, vector<16x8x128xf32>
    %c0_166 = arith.constant 0 : index
    %c0_167 = arith.constant 0 : index
    %736 = vector.load %arg7[%c0_166, %c0_167] : memref<1x128xf32, #tpu.memory_space<vmem>>, vector<1x128xf32>
    %737 = vector.shape_cast %736 : vector<1x128xf32> to vector<1x1x128xf32>
    %738 = vector.broadcast %737 : vector<1x1x128xf32> to vector<16x8x128xf32>
    %739 = arith.mulf %735, %738 : vector<16x8x128xf32>
    %cst_168 = arith.constant dense<0.000000e+00> : vector<16x8xf32>
    %740 = vector.multi_reduction <add>, %739, %cst_168 [2] : vector<16x8x128xf32> to vector<16x8xf32>
    %741 = vector.shape_cast %740 : vector<16x8xf32> to vector<16x8x1xf32>
    %c0_169 = arith.constant 0 : index
    %c0_170 = arith.constant 0 : index
    %c0_171 = arith.constant 0 : index
    %742 = vector.load %arg8[%c0_169, %c0_170, %c0_171] : memref<16x8x1xf32, #tpu.memory_space<vmem>>, vector<16x8x1xf32>
    tpu.vector_store %arg8[%c0_169, %c0_170, %c0_171], %741 {strides = array<i32>} : memref<16x8x1xf32, #tpu.memory_space<vmem>>, vector<16x8x1xf32>,
    return
  }
  func.func @transform_0(%arg0: i32) -> (i32, i32, i32) {
    %c0_i32 = arith.constant 0 : i32
    %c0_i32_0 = arith.constant 0 : i32
    %c0_i32_1 = arith.constant 0 : i32
    return %c0_i32, %arg0, %c0_i32_0 : i32, i32, i32
  }
  func.func @transform_1(%arg0: i32) -> (i32, i32) {
    %c0_i32 = arith.constant 0 : i32
    %c0_i32_0 = arith.constant 0 : i32
    %c0_i32_1 = arith.constant 0 : i32
    return %c0_i32, %c0_i32_0 : i32, i32
  }
  func.func @transform_2(%arg0: i32) -> (i32, i32) {
    %c0_i32 = arith.constant 0 : i32
    %c0_i32_0 = arith.constant 0 : i32
    %c0_i32_1 = arith.constant 0 : i32
    return %c0_i32, %c0_i32_0 : i32, i32
  }
  func.func @transform_3(%arg0: i32) -> (i32, i32) {
    %c0_i32 = arith.constant 0 : i32
    %c0_i32_0 = arith.constant 0 : i32
    %c0_i32_1 = arith.constant 0 : i32
    return %c0_i32, %c0_i32_0 : i32, i32
  }
  func.func @transform_4(%arg0: i32) -> (i32, i32) {
    %c0_i32 = arith.constant 0 : i32
    %c0_i32_0 = arith.constant 0 : i32
    %c0_i32_1 = arith.constant 0 : i32
    return %c0_i32, %c0_i32_0 : i32, i32
  }
  func.func @transform_5(%arg0: i32) -> (i32, i32) {
    %c0_i32 = arith.constant 0 : i32
    %c0_i32_0 = arith.constant 0 : i32
    %c0_i32_1 = arith.constant 0 : i32
    return %c0_i32, %c0_i32_0 : i32, i32
  }
  func.func @transform_6(%arg0: i32) -> (i32, i32) {
    %c0_i32 = arith.constant 0 : i32
    %c0_i32_0 = arith.constant 0 : i32
    %c0_i32_1 = arith.constant 0 : i32
    return %c0_i32, %c0_i32_0 : i32, i32
  }
  func.func @transform_7(%arg0: i32) -> (i32, i32, i32) {
    %c0_i32 = arith.constant 0 : i32
    %c0_i32_0 = arith.constant 0 : i32
    %c0_i32_1 = arith.constant 0 : i32
    return %c0_i32, %arg0, %c0_i32_0 : i32, i32, i32
  }
}

</mosaic_0001>

<bundles_post_ra>
// kernel: seq2seq_forward.1
= control target key start
LH: loop header
LB: loop body
LE: loop exit
PB: predicated region body
PF: predicated region fallthrough
CT: control target
= control target key end

     0   :  { %v8860_v3 = vmov 0.0   ;;  %vm4419_vm0 = vcmask 7168   ;;  %s8850_s1 = inlined_call_operand.vmem [shape: f32[128,512], index: 1, kind: input, shape index: {}]   ;;  %s8851_s0 = inlined_call_operand.vmem [shape: f32[8,8,512], index: 0, kind: input, shape index: {}]   ;;  %s8852_s2 = inlined_call_operand.vmem [shape: f32[128,512], index: 2, kind: input, shape index: {}]   ;;  %s8853_s4 = inlined_call_operand.vmem [shape: f32[128,512], index: 4, kind: input, shape index: {}]   ;;  %s8854_s3 = inlined_call_operand.vmem [shape: f32[1,512], index: 3, kind: input, shape index: {}]   ;;  %s8855_s6 = inlined_call_operand.vmem [shape: f32[1,128], index: 6, kind: input, shape index: {}]   ;;  %s8856_s7 = inlined_call_operand.vmem [shape: f32[16,8,1], index: 7, kind: output, shape index: {}]   ;;  %s8857_s5 = inlined_call_operand.vmem [shape: f32[1,512], index: 5, kind: input, shape index: {}]  }
   0x1   :  { %v5164_v0 = vld [vmem:[%s8850_s1 + $0x1e8] sm:$0xff]  ;;  %v5169_v1 = vld [vmem:[%s8850_s1 + $0x1e0] sm:$0xff]  ;;  %288 = vmatprep.mubr.f32.mxu0 %v8860_v3  ;;  %359 = vmatprep.mubr.f32.mxu1 %v8860_v3  ;;  %v5211_v9 = vld [vmem:[%s8850_s1 + $0x1f8] sm:$0xff] }
   0x2   :  { %9070 = vst [vmem:[#allocation3_spill] sm:$0xff] %v5164_v0  ;;  %v5174_v2 = vld [vmem:[%s8850_s1 + $0x1c8] sm:$0xff]  ;;  %224 = vmatprep.subr.mxu0 %v5164_v0  ;;  %v5182_v4 = vld [vmem:[%s8850_s1 + $0x1c0] sm:$0xff]  ;;  %9071 = vst [vmem:[#allocation4_spill] sm:$0xff] %v5211_v9  ;;  %295 = vmatprep.subr.mxu1 %v5211_v9 }
   0x3   :  { %225 = vmatpush1.msra.mxu0 %v5169_v1  ;;  %v5188_v5 = vld [vmem:[%s8850_s1 + $0x1a8] sm:$0xff]  ;;  %v5194_v6 = vld [vmem:[%s8850_s1 + $0x1a0] sm:$0xff]  ;;  %v5223_v11 = vld [vmem:[%s8850_s1 + $0x1f0] sm:$0xff] }
   0x4   :  { %226 = vmatprep.subr.mxu0 %v5174_v2  ;;  %v5200_v7 = vld [vmem:[%s8850_s1 + $0x188] sm:$0xff]  ;;  %v5206_v8 = vld [vmem:[%s8850_s1 + $0x180] sm:$0xff]  ;;  %296 = vmatpush1.msra.mxu1 %v5223_v11  ;;  %v5235_v13 = vld [vmem:[%s8850_s1 + $0x1d8] sm:$0xff] }
   0x5   :  { %227 = vmatpush1.msra.mxu0 %v5182_v4  ;;  %v5217_v10 = vld [vmem:[%s8850_s1 + $0x168] sm:$0xff]  ;;  %v5229_v12 = vld [vmem:[%s8850_s1 + $0x160] sm:$0xff]  ;;  %v5240_v14 = vld [vmem:[%s8850_s1 + $0x1d0] sm:$0xff]  ;;  %297 = vmatprep.subr.mxu1 %v5235_v13 }
   0x6   :  { %228 = vmatprep.subr.mxu0 %v5188_v5  ;;  %v5246_v15 = vld [vmem:[%s8850_s1 + $0x148] sm:$0xff]  ;;  %v5252_v16 = vld [vmem:[%s8850_s1 + $0x1b8] sm:$0xff]  ;;  %v5258_v17 = vld [vmem:[%s8850_s1 + $0x140] sm:$0xff]  ;;  %298 = vmatpush1.msra.mxu1 %v5240_v14 }
   0x7   :  { %229 = vmatpush1.msra.mxu0 %v5194_v6  ;;  %v5264_v18 = vld [vmem:[%s8850_s1 + $0x1b0] sm:$0xff]  ;;  %v5269_v19 = vld [vmem:[%s8850_s1 + $0x198] sm:$0xff]  ;;  %v5275_v20 = vld [vmem:[%s8850_s1 + $0x128] sm:$0xff]  ;;  %299 = vmatprep.subr.mxu1 %v5252_v16 }
   0x8   :  { %230 = vmatprep.subr.mxu0 %v5200_v7  ;;  %v5281_v21 = vld [vmem:[%s8850_s1 + $0x190] sm:$0xff]  ;;  %v5287_v22 = vld [vmem:[%s8850_s1 + $0x120] sm:$0xff]  ;;  %300 = vmatpush1.msra.mxu1 %v5264_v18  ;;  %v5293_v23 = vld [vmem:[%s8850_s1 + $0x178] sm:$0xff] }
   0x9   :  { %231 = vmatpush1.msra.mxu0 %v5206_v8  ;;  %v5299_v24 = vld [vmem:[%s8850_s1 + $0x108] sm:$0xff]  ;;  %301 = vmatprep.subr.mxu1 %v5269_v19  ;;  %v5305_v25 = vld [vmem:[%s8850_s1 + $0x170] sm:$0xff]  ;;  %v5311_v26 = vld [vmem:[%s8850_s1 + $0x100] sm:$0xff] }
   0xa   :  { %232 = vmatprep.subr.mxu0 %v5217_v10  ;;  %302 = vmatpush1.msra.mxu1 %v5281_v21  ;;  %v5317_v27 = vld [vmem:[%s8850_s1 + $0x158] sm:$0xff]  ;;  %v5323_v28 = vld [vmem:[%s8850_s1 + $0xe8] sm:$0xff]  ;;  %v5329_v29 = vld [vmem:[%s8850_s1 + $0x150] sm:$0xff] }
   0xb   :  { %233 = vmatpush1.msra.mxu0 %v5229_v12  ;;  %303 = vmatprep.subr.mxu1 %v5293_v23  ;;  %v5335_v30 = vld [vmem:[%s8850_s1 + $0xe0] sm:$0xff]  ;;  %v5341_v31 = vld [vmem:[%s8850_s1 + $0x138] sm:$0xff]  ;;  %v5347_v32 = vld [vmem:[%s8850_s1 + $0xc8] sm:$0xff] }
   0xc   :  { %234 = vmatprep.subr.mxu0 %v5246_v15  ;;  %304 = vmatpush1.msra.mxu1 %v5305_v25  ;;  %v5353_v33 = vld [vmem:[%s8850_s1 + $0x130] sm:$0xff]  ;;  %v5359_v34 = vld [vmem:[%s8850_s1 + $0xc0] sm:$0xff]  ;;  %v5365_v35 = vld [vmem:[%s8850_s1 + $0x118] sm:$0xff] }
   0xd   :  { %235 = vmatpush1.msra.mxu0 %v5258_v17  ;;  %305 = vmatprep.subr.mxu1 %v5317_v27  ;;  %v5371_v36 = vld [vmem:[%s8850_s1 + $0xa8] sm:$0xff]  ;;  %v5377_v37 = vld [vmem:[%s8850_s1 + $0x110] sm:$0xff]  ;;  %v5383_v38 = vld [vmem:[%s8850_s1 + $0xa0] sm:$0xff] }
   0xe   :  { %236 = vmatprep.subr.mxu0 %v5275_v20  ;;  %306 = vmatpush1.msra.mxu1 %v5329_v29  ;;  %v5389_v39 = vld [vmem:[%s8850_s1 + $0xf8] sm:$0xff]  ;;  %v5395_v40 = vld [vmem:[%s8850_s1 + $0x88] sm:$0xff]  ;;  %v5401_v41 = vld [vmem:[%s8850_s1 + $0xf0] sm:$0xff] }
   0xf   :  { %237 = vmatpush1.msra.mxu0 %v5287_v22  ;;  %307 = vmatprep.subr.mxu1 %v5341_v31  ;;  %v5407_v42 = vld [vmem:[%s8850_s1 + $0x80] sm:$0xff]  ;;  %v5413_v43 = vld [vmem:[%s8850_s1 + $0xd8] sm:$0xff]  ;;  %v5419_v44 = vld [vmem:[%s8850_s1 + $0x68] sm:$0xff] }
  0x10   :  { %238 = vmatprep.subr.mxu0 %v5299_v24  ;;  %308 = vmatpush1.msra.mxu1 %v5353_v33  ;;  %9072 = vst [vmem:[#allocation5_spill] sm:$0xff] %v5419_v44  ;;  %v5425_v45 = vld [vmem:[%s8850_s1 + $0xd0] sm:$0xff]  ;;  %v5431_v46 = vld [vmem:[%s8850_s1 + $0x60] sm:$0xff]  ;;  %v5437_v47 = vld [vmem:[%s8850_s1 + $0xb8] sm:$0xff] }
  0x11   :  { %239 = vmatpush1.msra.mxu0 %v5311_v26  ;;  %309 = vmatprep.subr.mxu1 %v5365_v35  ;;  %9073 = vst [vmem:[#allocation6_spill] sm:$0xff] %v5431_v46  ;;  %v5443_v48 = vld [vmem:[%s8850_s1 + $0x48] sm:$0xff]  ;;  %v5449_v49 = vld [vmem:[%s8850_s1 + $0xb0] sm:$0xff]  ;;  %v5455_v50 = vld [vmem:[%s8850_s1 + $0x40] sm:$0xff] }
  0x12   :  { %240 = vmatprep.subr.mxu0 %v5323_v28  ;;  %310 = vmatpush1.msra.mxu1 %v5377_v37  ;;  %9074 = vst [vmem:[#allocation7_spill] sm:$0xff] %v5443_v48  ;;  %9075 = vst [vmem:[#allocation8_spill] sm:$0xff] %v5455_v50  ;;  %v5461_v51 = vld [vmem:[%s8850_s1 + $0x98] sm:$0xff]  ;;  %v5467_v52 = vld [vmem:[%s8850_s1 + $0x28] sm:$0xff] }
  0x13   :  { %241 = vmatpush1.msra.mxu0 %v5335_v30  ;;  %311 = vmatprep.subr.mxu1 %v5389_v39  ;;  %9076 = vst [vmem:[#allocation9_spill] sm:$0xff] %v5467_v52  ;;  %v5473_v53 = vld [vmem:[%s8850_s1 + $0x90] sm:$0xff]  ;;  %v5479_v54 = vld [vmem:[%s8850_s1 + $0x20] sm:$0xff]  ;;  %v5485_v55 = vld [vmem:[%s8850_s1 + $0x78] sm:$0xff] }
  0x14   :  { %242 = vmatprep.subr.mxu0 %v5347_v32  ;;  %312 = vmatpush1.msra.mxu1 %v5401_v41  ;;  %9077 = vst [vmem:[#allocation10_spill] sm:$0xff] %v5473_v53  ;;  %9078 = vst [vmem:[#allocation11_spill] sm:$0xff] %v5479_v54  ;;  %v5491_v56 = vld [vmem:[%s8850_s1 + $0x8] sm:$0xff]  ;;  %v5497_v57 = vld [vmem:[%s8850_s1 + $0x70] sm:$0xff] }
  0x15   :  { %243 = vmatpush1.msra.mxu0 %v5359_v34  ;;  %313 = vmatprep.subr.mxu1 %v5413_v43  ;;  %9079 = vst [vmem:[#allocation12_spill] sm:$0xff] %v5485_v55  ;;  %9080 = vst [vmem:[#allocation13_spill] sm:$0xff] %v5491_v56  ;;  %v5503_v58 = vld [vmem:[%s8850_s1] sm:$0xff]  ;;  %v5509_v59 = vld [vmem:[%s8850_s1 + $0x58] sm:$0xff] }
  0x16   :  { %244 = vmatprep.subr.mxu0 %v5371_v36  ;;  %314 = vmatpush1.msra.mxu1 %v5425_v45  ;;  %9081 = vst [vmem:[#allocation14_spill] sm:$0xff] %v5497_v57  ;;  %9082 = vst [vmem:[#allocation15_spill] sm:$0xff] %v5503_v58  ;;  %v5516_v60 = vld [vmem:[%s8850_s1 + $0x50] sm:$0xff]  ;;  %v5523_v61 = vld [vmem:[%s8850_s1 + $0x38] sm:$0xff] }
  0x17   :  { %245 = vmatpush1.msra.mxu0 %v5383_v38  ;;  %315 = vmatprep.subr.mxu1 %v5437_v47  ;;  %9083 = vst [vmem:[#allocation16_spill] sm:$0xff] %v5509_v59  ;;  %9084 = vst [vmem:[#allocation17_spill] sm:$0xff] %v5516_v60  ;;  %v5530_v62 = vld [vmem:[%s8850_s1 + $0x30] sm:$0xff]  ;;  %v5537_v63 = vld [vmem:[%s8850_s1 + $0x18] sm:$0xff] }
  0x18   :  { %246 = vmatprep.subr.mxu0 %v5395_v40  ;;  %316 = vmatpush1.msra.mxu1 %v5449_v49  ;;  %9085 = vst [vmem:[#allocation18_spill] sm:$0xff] %v5523_v61  ;;  %9086 = vst [vmem:[#allocation19_spill] sm:$0xff] %v5530_v62 }
  0x19   :  { %247 = vmatpush1.msra.mxu0 %v5407_v42  ;;  %317 = vmatprep.subr.mxu1 %v5461_v51  ;;  %9087 = vst [vmem:[#allocation20_spill] sm:$0xff] %v5537_v63 }
  0x1a   :  { %248 = vmatprep.subr.mxu0 %v5419_v44  ;;  %318 = vmatpush1.msra.mxu1 %v5473_v53 }
  0x1b   :  { %249 = vmatpush1.msra.mxu0 %v5431_v46  ;;  %319 = vmatprep.subr.mxu1 %v5485_v55 }
  0x1c   :  { %250 = vmatprep.subr.mxu0 %v5443_v48  ;;  %320 = vmatpush1.msra.mxu1 %v5497_v57 }
  0x1d   :  { %251 = vmatpush1.msra.mxu0 %v5455_v50  ;;  %321 = vmatprep.subr.mxu1 %v5509_v59 }
  0x1e   :  { %252 = vmatprep.subr.mxu0 %v5467_v52  ;;  %322 = vmatpush1.msra.mxu1 %v5516_v60 }
  0x1f   :  { %253 = vmatpush1.msra.mxu0 %v5479_v54  ;;  %323 = vmatprep.subr.mxu1 %v5523_v61 }
  0x20   :  { %254 = vmatprep.subr.mxu0 %v5491_v56  ;;  %324 = vmatpush1.msra.mxu1 %v5530_v62 }
  0x21   :  { %255 = vmatpush1.msra.mxu0 %v5503_v58  ;;  %v5543_v58 = vld [vmem:[%s8850_s1 + $0x10] sm:$0xff]  ;;  %325 = vmatprep.subr.mxu1 %v5537_v63 }
  0x22   :  { %289 = vmatmul.mubr.f32.vlgmr.msra.gmra.mxu0 %v8860_v3  ;;  %9088 = vst [vmem:[#allocation21_spill] sm:$0xff] %v5543_v58  ;;  %399 = vmatprep.subr.mxu0 %v5164_v0 }
  0x23   :  { %400 = vmatpush1.msra.mxu0 %v5169_v1  ;;  %326 = vmatpush1.msra.mxu1 %v5543_v58 }
  0x24   :  { %401 = vmatprep.subr.mxu0 %v5174_v2  ;;  %360 = vmatmul.mubr.f32.vlgmr.msra.gmra.mxu1 %v8860_v3  ;;  %v9089_v3 = vld [vmem:[#allocation15_spill] sm:$0xff] }
  0x25   :  { %402 = vmatpush1.msra.mxu0 %v5182_v4  ;;  %470 = vmatprep.subr.mxu1 %v5211_v9 }
  0x26   :  { %471 = vmatpush1.msra.mxu1 %v5223_v11  ;;  %403 = vmatprep.subr.mxu0 %v5188_v5 }
  0x27   :  { %472 = vmatprep.subr.mxu1 %v5235_v13  ;;  %404 = vmatpush1.msra.mxu0 %v5194_v6 }
  0x28   :  { %473 = vmatpush1.msra.mxu1 %v5240_v14  ;;  %405 = vmatprep.subr.mxu0 %v5200_v7 }
  0x29   :  { %474 = vmatprep.subr.mxu1 %v5252_v16  ;;  %406 = vmatpush1.msra.mxu0 %v5206_v8 }
  0x2a   :  { %475 = vmatpush1.msra.mxu1 %v5264_v18  ;;  %407 = vmatprep.subr.mxu0 %v5217_v10 }
  0x2b   :  { %476 = vmatprep.subr.mxu1 %v5269_v19  ;;  %408 = vmatpush1.msra.mxu0 %v5229_v12 }
  0x2c   :  { %477 = vmatpush1.msra.mxu1 %v5281_v21  ;;  %409 = vmatprep.subr.mxu0 %v5246_v15 }
  0x2d   :  { %478 = vmatprep.subr.mxu1 %v5293_v23  ;;  %410 = vmatpush1.msra.mxu0 %v5258_v17 }
  0x2e   :  { %479 = vmatpush1.msra.mxu1 %v5305_v25  ;;  %411 = vmatprep.subr.mxu0 %v5275_v20 }
  0x2f   :  { %480 = vmatprep.subr.mxu1 %v5317_v27  ;;  %412 = vmatpush1.msra.mxu0 %v5287_v22 }
  0x30   :  { %481 = vmatpush1.msra.mxu1 %v5329_v29  ;;  %413 = vmatprep.subr.mxu0 %v5299_v24 }
  0x31   :  { %482 = vmatprep.subr.mxu1 %v5341_v31  ;;  %414 = vmatpush1.msra.mxu0 %v5311_v26 }
  0x32   :  { %483 = vmatpush1.msra.mxu1 %v5353_v33  ;;  %415 = vmatprep.subr.mxu0 %v5323_v28 }
  0x33   :  { %484 = vmatprep.subr.mxu1 %v5365_v35  ;;  %416 = vmatpush1.msra.mxu0 %v5335_v30 }
  0x34   :  { %485 = vmatpush1.msra.mxu1 %v5377_v37  ;;  %417 = vmatprep.subr.mxu0 %v5347_v32 }
  0x35   :  { %486 = vmatprep.subr.mxu1 %v5389_v39  ;;  %418 = vmatpush1.msra.mxu0 %v5359_v34 }
  0x36   :  { %487 = vmatpush1.msra.mxu1 %v5401_v41  ;;  %419 = vmatprep.subr.mxu0 %v5371_v36 }
  0x37   :  { %488 = vmatprep.subr.mxu1 %v5413_v43  ;;  %420 = vmatpush1.msra.mxu0 %v5383_v38 }
  0x38   :  { %489 = vmatpush1.msra.mxu1 %v5425_v45  ;;  %421 = vmatprep.subr.mxu0 %v5395_v40 }
  0x39   :  { %490 = vmatprep.subr.mxu1 %v5437_v47  ;;  %422 = vmatpush1.msra.mxu0 %v5407_v42 }
  0x3a   :  { %491 = vmatpush1.msra.mxu1 %v5449_v49  ;;  %423 = vmatprep.subr.mxu0 %v5419_v44 }
  0x3b   :  { %492 = vmatprep.subr.mxu1 %v5461_v51  ;;  %424 = vmatpush1.msra.mxu0 %v5431_v46 }
  0x3c   :  { %493 = vmatpush1.msra.mxu1 %v5473_v53  ;;  %425 = vmatprep.subr.mxu0 %v5443_v48  ;;  %v9090_v48 = vmov 0.0  }
  0x3d   :  { %494 = vmatprep.subr.mxu1 %v5485_v55  ;;  %426 = vmatpush1.msra.mxu0 %v5455_v50 }
  0x3e   :  { %495 = vmatpush1.msra.mxu1 %v5497_v57  ;;  %427 = vmatprep.subr.mxu0 %v5467_v52 }
  0x3f   :  { %496 = vmatprep.subr.mxu1 %v5509_v59  ;;  %428 = vmatpush1.msra.mxu0 %v5479_v54 }
  0x40   :  { %497 = vmatpush1.msra.mxu1 %v5516_v60  ;;  %429 = vmatprep.subr.mxu0 %v5491_v56  ;;  %v220_v56 = vld [vmem:[%s8851_s0] sm:$0xff]  ;;  %v222_v60 = vld [vmem:[%s8851_s0 + $0x10] sm:$0xff] }
  0x41   :  { %498 = vmatprep.subr.mxu1 %v5523_v61  ;;  %430 = vmatpush1.msra.mxu0 %v9089_v3  ;;  %v221_v3 = vld [vmem:[%s8851_s0 + $0x8] sm:$0xff] }
  0x42   :  { %499 = vmatpush1.msra.mxu1 %v5530_v62  ;;  %463 = vmatprep.mubr.f32.mxu0 %v9090_v48 }
  0x43   :  { %500 = vmatprep.subr.mxu1 %v5537_v63  ;;  %534 = vmatprep.mubr.f32.mxu1 %v9090_v48 }
  0x44   :  { %501 = vmatpush1.msra.mxu1 %v5543_v58  ;;  %574 = vmatprep.subr.mxu0 %v5164_v0 }
  0x45   :  { %645 = vmatprep.subr.mxu1 %v5211_v9  ;;  %v223_v9 = vld [vmem:[%s8851_s0 + $0x18] sm:$0xff] }
  0xe2   :  { %v290_v54 = vpop.f32.mrf.mxu0 }
  0xe3   :  { %v366_v62 = vadd.f32 %v290_v54, %v220_v56 }
  0xe4   :  { %v292_v61 = vpop.f32.mrf.mxu0  ;;  %v361_v58 = vpop.f32.mrf.mxu1 }
  0xe5   :  { %v4440_v63 = vmul.f32 -1.442695, %v366_v62  ;;  %v367_v52 = vadd.f32 %v292_v61, %v221_v3  ;;  %v368_v59 = vadd.f32 %v361_v58, %v222_v60  ;;  %v9095_v58 = vld [vmem:[#allocation14_spill] sm:$0xff]  ;;  %v9097_v60 = vld [vmem:[#allocation16_spill] sm:$0xff] }
  0xe6   :  { %v363_v0 = vpop.f32.mrf.mxu1 }
  0xe7   :  { %4542 = vpow2.f32 %v4440_v63  ;;  %v4441_v48 = vmul.f32 -1.442695, %v367_v52  ;;  %v369_v50 = vadd.f32 %v363_v0, %v223_v9 }
  0xe9   :  { %4544 = vpow2.f32 %v4441_v48  ;;  %v4442_v57 = vmul.f32 -1.442695, %v369_v50 }
  0xea   :  { %4546 = vtanh.f32 %v368_v59  ;;  %v9096_v59 = vld [vmem:[#allocation7_spill] sm:$0xff] }
  0xeb   :  { %4548 = vpow2.f32 %v4442_v57  ;;  %v9094_v57 = vld [vmem:[#allocation6_spill] sm:$0xff] }
  0xf4   :  { %v4543_v54 = vpop.eup %4542 }
  0xf5   :  { %v373_v56 = vadd.f32 1.0, %v4543_v54  ;;  %v9098_v54 = vld [vmem:[#allocation8_spill] sm:$0xff] }
  0xf6   :  { %v4545_v3 = vpop.eup %4544 }
  0xf7   :  { %4550 = vrcp.f32 %v373_v56  ;;  %v379_v52 = vadd.f32 1.0, %v4545_v3  ;;  %v4547_v48 = vpop.eup %4546  ;;  %v9099_v56 = vld [vmem:[#allocation17_spill] sm:$0xff] }
  0xf8   :  { %v4549_v61 = vpop.eup %4548  ;;  %v9100_v3 = vld [vmem:[#allocation9_spill] sm:$0xff] }
  0xf9   :  { %4552 = vrcp.f32 %v379_v52  ;;  %v386_v46 = vadd.f32 1.0, %v4549_v61  ;;  %v9101_v52 = vld [vmem:[#allocation18_spill] sm:$0xff]  ;;  %v9103_v61 = vld [vmem:[#allocation19_spill] sm:$0xff] }
  0xfb   :  { %4554 = vrcp.f32 %v386_v46  ;;  %v9092_v46 = vld [vmem:[#allocation5_spill] sm:$0xff] }
 0x104   :  { %v4551_v62 = vpop.eup %4550 }
 0x105   :  { %v390_v44 = vmul.f32 %v4551_v62, %v4547_v48  ;;  %v9102_v48 = vld [vmem:[#allocation11_spill] sm:$0xff]  ;;  %v9104_v62 = vld [vmem:[#allocation13_spill] sm:$0xff] }
 0x106   :  { %v4553_v63 = vpop.eup %4552 }
 0x107   :  { %v389_v55 = vmul.f32 0.0, %v4553_v63  ;;  %v9105_v63 = vld [vmem:[#allocation20_spill] sm:$0xff] }
 0x108   :  { %v4555_v0 = vpop.eup %4554 }
 0x109   :  { %v5629_v53 = vadd.f32 %v390_v44, %v389_v55  ;;  %v9091_v44 = vld [vmem:[#allocation10_spill] sm:$0xff]  ;;  %v9093_v55 = vld [vmem:[#allocation12_spill] sm:$0xff] }
 0x10b   :  { %4556 = vtanh.f32 %v5629_v53 }
 0x118   :  { %v4557_v9 = vpop.eup %4556 }
 0x119   :  { %v393_v50 = vmul.f32 %v4557_v9, %v4555_v0  ;;  %v9106_v0 = vld [vmem:[#allocation15_spill] sm:$0xff]  ;;  %v9107_v9 = vmov 0.0  }
 0x11b   :  { %464 = vmatmul.mubr.f32.vlgmr.msra.gmra.mxu0 %v393_v50  ;;  %535 = vmatmul.mubr.f32.vlgmr.msra.gmra.mxu1 %v393_v50  ;;  %v9108_v50 = vld [vmem:[#allocation21_spill] sm:$0xff] }
 0x11c   :  { %575 = vmatpush1.msra.mxu0 %v5169_v1  ;;  %646 = vmatpush1.msra.mxu1 %v5223_v11 }
 0x11d   :  { %576 = vmatprep.subr.mxu0 %v5174_v2  ;;  %647 = vmatprep.subr.mxu1 %v5235_v13 }
 0x11e   :  { %577 = vmatpush1.msra.mxu0 %v5182_v4  ;;  %648 = vmatpush1.msra.mxu1 %v5240_v14 }
 0x11f   :  { %578 = vmatprep.subr.mxu0 %v5188_v5  ;;  %649 = vmatprep.subr.mxu1 %v5252_v16 }
 0x120   :  { %579 = vmatpush1.msra.mxu0 %v5194_v6  ;;  %650 = vmatpush1.msra.mxu1 %v5264_v18 }
 0x121   :  { %580 = vmatprep.subr.mxu0 %v5200_v7  ;;  %651 = vmatprep.subr.mxu1 %v5269_v19 }
 0x122   :  { %581 = vmatpush1.msra.mxu0 %v5206_v8  ;;  %652 = vmatpush1.msra.mxu1 %v5281_v21 }
 0x123   :  { %582 = vmatprep.subr.mxu0 %v5217_v10  ;;  %653 = vmatprep.subr.mxu1 %v5293_v23 }
 0x124   :  { %583 = vmatpush1.msra.mxu0 %v5229_v12  ;;  %654 = vmatpush1.msra.mxu1 %v5305_v25 }
 0x125   :  { %584 = vmatprep.subr.mxu0 %v5246_v15  ;;  %655 = vmatprep.subr.mxu1 %v5317_v27 }
 0x126   :  { %585 = vmatpush1.msra.mxu0 %v5258_v17  ;;  %656 = vmatpush1.msra.mxu1 %v5329_v29 }
 0x127   :  { %586 = vmatprep.subr.mxu0 %v5275_v20  ;;  %657 = vmatprep.subr.mxu1 %v5341_v31 }
 0x128   :  { %587 = vmatpush1.msra.mxu0 %v5287_v22  ;;  %658 = vmatpush1.msra.mxu1 %v5353_v33 }
 0x129   :  { %588 = vmatprep.subr.mxu0 %v5299_v24  ;;  %659 = vmatprep.subr.mxu1 %v5365_v35 }
 0x12a   :  { %589 = vmatpush1.msra.mxu0 %v5311_v26  ;;  %660 = vmatpush1.msra.mxu1 %v5377_v37 }
 0x12b   :  { %590 = vmatprep.subr.mxu0 %v5323_v28  ;;  %661 = vmatprep.subr.mxu1 %v5389_v39 }
 0x12c   :  { %591 = vmatpush1.msra.mxu0 %v5335_v30  ;;  %662 = vmatpush1.msra.mxu1 %v5401_v41 }
 0x12d   :  { %592 = vmatprep.subr.mxu0 %v5347_v32  ;;  %663 = vmatprep.subr.mxu1 %v5413_v43 }
 0x12e   :  { %593 = vmatpush1.msra.mxu0 %v5359_v34  ;;  %664 = vmatpush1.msra.mxu1 %v5425_v45 }
 0x12f   :  { %594 = vmatprep.subr.mxu0 %v5371_v36  ;;  %665 = vmatprep.subr.mxu1 %v5437_v47 }
 0x130   :  { %595 = vmatpush1.msra.mxu0 %v5383_v38  ;;  %666 = vmatpush1.msra.mxu1 %v5449_v49 }
 0x131   :  { %596 = vmatprep.subr.mxu0 %v5395_v40  ;;  %667 = vmatprep.subr.mxu1 %v5461_v51 }
 0x132   :  { %597 = vmatpush1.msra.mxu0 %v5407_v42  ;;  %668 = vmatpush1.msra.mxu1 %v9091_v44 }
 0x133   :  { %598 = vmatprep.subr.mxu0 %v9092_v46  ;;  %669 = vmatprep.subr.mxu1 %v9093_v55 }
 0x134   :  { %599 = vmatpush1.msra.mxu0 %v9094_v57  ;;  %670 = vmatpush1.msra.mxu1 %v9095_v58 }
 0x135   :  { %600 = vmatprep.subr.mxu0 %v9096_v59  ;;  %671 = vmatprep.subr.mxu1 %v9097_v60  ;;  %v4445_v59 = vld [vmem:[%s8851_s0 + $0x30] sm:$0xff] }
 0x136   :  { %601 = vmatpush1.msra.mxu0 %v9098_v54  ;;  %672 = vmatpush1.msra.mxu1 %v9099_v56  ;;  %v9109_v56 = vld [vmem:[#allocation3_spill] sm:$0xff] }
 0x137   :  { %602 = vmatprep.subr.mxu0 %v9100_v3  ;;  %673 = vmatprep.subr.mxu1 %v9101_v52  ;;  %v9110_v3 = vld [vmem:[#allocation4_spill] sm:$0xff] }
 0x138   :  { %603 = vmatpush1.msra.mxu0 %v9102_v48  ;;  %674 = vmatpush1.msra.mxu1 %v9103_v61  ;;  %v4443_v61 = vld [vmem:[%s8851_s0 + $0x20] sm:$0xff] }
 0x139   :  { %604 = vmatprep.subr.mxu0 %v9104_v62  ;;  %675 = vmatprep.subr.mxu1 %v9105_v63  ;;  %v4444_v63 = vld [vmem:[%s8851_s0 + $0x28] sm:$0xff] }
 0x13a   :  { %605 = vmatpush1.msra.mxu0 %v9106_v0  ;;  %638 = vmatprep.mubr.f32.mxu0 %v9107_v9 }
 0x13b   :  { %676 = vmatpush1.msra.mxu1 %v9108_v50  ;;  %709 = vmatprep.mubr.f32.mxu1 %v9107_v9 }
 0x13c   :  { %749 = vmatprep.subr.mxu0 %v9109_v56  ;;  %820 = vmatprep.subr.mxu1 %v9110_v3  ;;  %v4446_v3 = vld [vmem:[%s8851_s0 + $0x38] sm:$0xff] }
 0x1db   :  { %v465_v48 = vpop.f32.mrf.mxu0  ;;  %v536_v50 = vpop.f32.mrf.mxu1 }
 0x1dc   :  { %v541_v0 = vadd.f32 %v4443_v61, %v465_v48  ;;  %v543_v48 = vadd.f32 %v4445_v59, %v536_v50  ;;  %v9114_v50 = vld [vmem:[#allocation14_spill] sm:$0xff] }
 0x1dd   :  { %v467_v62 = vpop.f32.mrf.mxu0  ;;  %v538_v56 = vpop.f32.mrf.mxu1 }
 0x1de   :  { %v4447_v52 = vmul.f32 -1.442695, %v541_v0  ;;  %v542_v54 = vadd.f32 %v4444_v63, %v467_v62  ;;  %v544_v60 = vadd.f32 %v4446_v3, %v538_v56 }
 0x1e0   :  { %4558 = vpow2.f32 %v4447_v52  ;;  %v4448_v9 = vmul.f32 -1.442695, %v542_v54  ;;  %v4449_v58 = vmul.f32 -1.442695, %v544_v60  ;;  %v9113_v60 = vld [vmem:[#allocation6_spill] sm:$0xff] }
 0x1e2   :  { %4560 = vpow2.f32 %v4448_v9 }
 0x1e3   :  { %4562 = vpow2.f32 %v4449_v58 }
 0x1ed   :  { %v4559_v57 = vpop.eup %4558 }
 0x1ee   :  { %v548_v61 = vadd.f32 1.0, %v4559_v57 }
 0x1ef   :  { %v4561_v0 = vpop.eup %4560 }
 0x1f0   :  { %4564 = vrcp.f32 %v548_v61  ;;  %v554_v52 = vadd.f32 1.0, %v4561_v0  ;;  %v4563_v54 = vpop.eup %4562  ;;  %v9116_v61 = vld [vmem:[#allocation16_spill] sm:$0xff] }
 0x1f1   :  { %4566 = vtanh.f32 %v543_v48  ;;  %v561_v55 = vadd.f32 1.0, %v4563_v54  ;;  %v9115_v48 = vld [vmem:[#allocation7_spill] sm:$0xff]  ;;  %v9117_v0 = vld [vmem:[#allocation8_spill] sm:$0xff]  ;;  %v9119_v54 = vld [vmem:[#allocation9_spill] sm:$0xff] }
 0x1f2   :  { %4568 = vrcp.f32 %v554_v52  ;;  %v9118_v52 = vld [vmem:[#allocation17_spill] sm:$0xff] }
 0x1f3   :  { %4570 = vrcp.f32 %v561_v55  ;;  %v9112_v55 = vld [vmem:[#allocation12_spill] sm:$0xff] }
 0x1fd   :  { %v4565_v62 = vpop.eup %4564 }
 0x1fe   :  { %v4567_v63 = vpop.eup %4566 }
 0x1ff   :  { %v4569_v9 = vpop.eup %4568  ;;  %v565_v56 = vmul.f32 %v4567_v63, %v4565_v62  ;;  %v9120_v62 = vld [vmem:[#allocation18_spill] sm:$0xff]  ;;  %v9121_v63 = vld [vmem:[#allocation11_spill] sm:$0xff] }
 0x200   :  { %v564_v3 = vmul.f32 %v4569_v9, %v5629_v53  ;;  %v4571_v57 = vpop.eup %4570  ;;  %v9111_v53 = vld [vmem:[#allocation5_spill] sm:$0xff]  ;;  %v9122_v9 = vld [vmem:[#allocation19_spill] sm:$0xff] }
 0x202   :  { %v5711_v46 = vadd.f32 %v565_v56, %v564_v3  ;;  %v9123_v56 = vld [vmem:[#allocation13_spill] sm:$0xff]  ;;  %v9124_v3 = vld [vmem:[#allocation20_spill] sm:$0xff] }
 0x204   :  { %4572 = vtanh.f32 %v5711_v46 }
 0x211   :  { %v4573_v59 = vpop.eup %4572 }
 0x212   :  { %v568_v58 = vmul.f32 %v4573_v59, %v4571_v57  ;;  %v9125_v57 = vld [vmem:[#allocation15_spill] sm:$0xff]  ;;  %v9126_v59 = vmov 0.0  }
 0x214   :  { %639 = vmatmul.mubr.f32.vlgmr.msra.gmra.mxu0 %v568_v58  ;;  %710 = vmatmul.mubr.f32.vlgmr.msra.gmra.mxu1 %v568_v58  ;;  %v9127_v58 = vld [vmem:[#allocation21_spill] sm:$0xff] }
 0x215   :  { %750 = vmatpush1.msra.mxu0 %v5169_v1  ;;  %821 = vmatpush1.msra.mxu1 %v5223_v11 }
 0x216   :  { %751 = vmatprep.subr.mxu0 %v5174_v2  ;;  %822 = vmatprep.subr.mxu1 %v5235_v13 }
 0x217   :  { %752 = vmatpush1.msra.mxu0 %v5182_v4  ;;  %823 = vmatpush1.msra.mxu1 %v5240_v14 }
 0x218   :  { %753 = vmatprep.subr.mxu0 %v5188_v5  ;;  %824 = vmatprep.subr.mxu1 %v5252_v16 }
 0x219   :  { %754 = vmatpush1.msra.mxu0 %v5194_v6  ;;  %825 = vmatpush1.msra.mxu1 %v5264_v18 }
 0x21a   :  { %755 = vmatprep.subr.mxu0 %v5200_v7  ;;  %826 = vmatprep.subr.mxu1 %v5269_v19 }
 0x21b   :  { %756 = vmatpush1.msra.mxu0 %v5206_v8  ;;  %827 = vmatpush1.msra.mxu1 %v5281_v21 }
 0x21c   :  { %757 = vmatprep.subr.mxu0 %v5217_v10  ;;  %828 = vmatprep.subr.mxu1 %v5293_v23 }
 0x21d   :  { %758 = vmatpush1.msra.mxu0 %v5229_v12  ;;  %829 = vmatpush1.msra.mxu1 %v5305_v25 }
 0x21e   :  { %759 = vmatprep.subr.mxu0 %v5246_v15  ;;  %830 = vmatprep.subr.mxu1 %v5317_v27 }
 0x21f   :  { %760 = vmatpush1.msra.mxu0 %v5258_v17  ;;  %831 = vmatpush1.msra.mxu1 %v5329_v29 }
 0x220   :  { %761 = vmatprep.subr.mxu0 %v5275_v20  ;;  %832 = vmatprep.subr.mxu1 %v5341_v31 }
 0x221   :  { %762 = vmatpush1.msra.mxu0 %v5287_v22  ;;  %833 = vmatpush1.msra.mxu1 %v5353_v33 }
 0x222   :  { %763 = vmatprep.subr.mxu0 %v5299_v24  ;;  %834 = vmatprep.subr.mxu1 %v5365_v35 }
 0x223   :  { %764 = vmatpush1.msra.mxu0 %v5311_v26  ;;  %835 = vmatpush1.msra.mxu1 %v5377_v37 }
 0x224   :  { %765 = vmatprep.subr.mxu0 %v5323_v28  ;;  %836 = vmatprep.subr.mxu1 %v5389_v39 }
 0x225   :  { %766 = vmatpush1.msra.mxu0 %v5335_v30  ;;  %837 = vmatpush1.msra.mxu1 %v5401_v41 }
 0x226   :  { %767 = vmatprep.subr.mxu0 %v5347_v32  ;;  %838 = vmatprep.subr.mxu1 %v5413_v43 }
 0x227   :  { %768 = vmatpush1.msra.mxu0 %v5359_v34  ;;  %839 = vmatpush1.msra.mxu1 %v5425_v45 }
 0x228   :  { %769 = vmatprep.subr.mxu0 %v5371_v36  ;;  %840 = vmatprep.subr.mxu1 %v5437_v47 }
 0x229   :  { %770 = vmatpush1.msra.mxu0 %v5383_v38  ;;  %841 = vmatpush1.msra.mxu1 %v5449_v49 }
 0x22a   :  { %771 = vmatprep.subr.mxu0 %v5395_v40  ;;  %842 = vmatprep.subr.mxu1 %v5461_v51 }
 0x22b   :  { %772 = vmatpush1.msra.mxu0 %v5407_v42  ;;  %843 = vmatpush1.msra.mxu1 %v9091_v44 }
 0x22c   :  { %773 = vmatprep.subr.mxu0 %v9111_v53  ;;  %844 = vmatprep.subr.mxu1 %v9112_v55 }
 0x22d   :  { %774 = vmatpush1.msra.mxu0 %v9113_v60  ;;  %845 = vmatpush1.msra.mxu1 %v9114_v50 }
 0x22e   :  { %775 = vmatprep.subr.mxu0 %v9115_v48  ;;  %846 = vmatprep.subr.mxu1 %v9116_v61  ;;  %v4452_v48 = vld [vmem:[%s8851_s0 + $0x50] sm:$0xff] }
 0x22f   :  { %776 = vmatpush1.msra.mxu0 %v9117_v0  ;;  %847 = vmatpush1.msra.mxu1 %v9118_v52  ;;  %v9128_v52 = vld [vmem:[#allocation3_spill] sm:$0xff] }
 0x230   :  { %777 = vmatprep.subr.mxu0 %v9119_v54  ;;  %848 = vmatprep.subr.mxu1 %v9120_v62  ;;  %v9129_v54 = vld [vmem:[#allocation4_spill] sm:$0xff] }
 0x231   :  { %778 = vmatpush1.msra.mxu0 %v9121_v63  ;;  %849 = vmatpush1.msra.mxu1 %v9122_v9  ;;  %v4450_v9 = vld [vmem:[%s8851_s0 + $0x40] sm:$0xff] }
 0x232   :  { %779 = vmatprep.subr.mxu0 %v9123_v56  ;;  %850 = vmatprep.subr.mxu1 %v9124_v3  ;;  %v4451_v3 = vld [vmem:[%s8851_s0 + $0x48] sm:$0xff] }
 0x233   :  { %780 = vmatpush1.msra.mxu0 %v9125_v57  ;;  %813 = vmatprep.mubr.f32.mxu0 %v9126_v59 }
 0x234   :  { %851 = vmatpush1.msra.mxu1 %v9127_v58  ;;  %884 = vmatprep.mubr.f32.mxu1 %v9126_v59 }
 0x235   :  { %924 = vmatprep.subr.mxu0 %v9128_v52  ;;  %995 = vmatprep.subr.mxu1 %v9129_v54  ;;  %v4453_v52 = vld [vmem:[%s8851_s0 + $0x58] sm:$0xff] }
 0x2d4   :  { %v640_v63 = vpop.f32.mrf.mxu0  ;;  %v711_v58 = vpop.f32.mrf.mxu1 }
 0x2d5   :  { %v716_v57 = vadd.f32 %v4450_v9, %v640_v63  ;;  %v718_v63 = vadd.f32 %v4452_v48, %v711_v58 }
 0x2d6   :  { %v642_v56 = vpop.f32.mrf.mxu0  ;;  %v713_v54 = vpop.f32.mrf.mxu1 }
 0x2d7   :  { %v4454_v62 = vmul.f32 -1.442695, %v716_v57  ;;  %v717_v0 = vadd.f32 %v4451_v3, %v642_v56  ;;  %v719_v61 = vadd.f32 %v4453_v52, %v713_v54 }
 0x2d9   :  { %4574 = vpow2.f32 %v4454_v62  ;;  %v4455_v59 = vmul.f32 -1.442695, %v717_v0  ;;  %v4456_v50 = vmul.f32 -1.442695, %v719_v61 }
 0x2db   :  { %4576 = vpow2.f32 %v4455_v59 }
 0x2dc   :  { %4578 = vpow2.f32 %v4456_v50 }
 0x2e6   :  { %v4575_v60 = vpop.eup %4574 }
 0x2e7   :  { %v723_v9 = vadd.f32 1.0, %v4575_v60 }
 0x2e8   :  { %v4577_v57 = vpop.eup %4576 }
 0x2e9   :  { %4580 = vrcp.f32 %v723_v9  ;;  %v729_v62 = vadd.f32 1.0, %v4577_v57  ;;  %v4579_v0 = vpop.eup %4578 }
 0x2ea   :  { %4582 = vtanh.f32 %v718_v63  ;;  %v736_v55 = vadd.f32 1.0, %v4579_v0  ;;  %v5886_v0 = vld [vmem:[%s8850_s1 + $0x1e0] sm:$0xff] }
 0x2eb   :  { %4584 = vrcp.f32 %v729_v62 }
 0x2ec   :  { %4586 = vrcp.f32 %v736_v55 }
 0x2f6   :  { %v4581_v56 = vpop.eup %4580 }
 0x2f7   :  { %v4583_v3 = vpop.eup %4582 }
 0x2f8   :  { %v4585_v59 = vpop.eup %4584  ;;  %v740_v54 = vmul.f32 %v4583_v3, %v4581_v56  ;;  %v5898_v56 = vld [vmem:[%s8850_s1 + $0x1c8] sm:$0xff]  ;;  %v5904_v3 = vld [vmem:[%s8850_s1 + $0x1d8] sm:$0xff] }
 0x2f9   :  { %v739_v52 = vmul.f32 %v4585_v59, %v5711_v46  ;;  %v4587_v60 = vpop.eup %4586  ;;  %v5910_v59 = vld [vmem:[%s8850_s1 + $0x1c0] sm:$0xff] }
 0x2fb   :  { %v5793_v53 = vadd.f32 %v740_v54, %v739_v52  ;;  %v5916_v54 = vld [vmem:[%s8850_s1 + $0x1d0] sm:$0xff]  ;;  %v5922_v52 = vld [vmem:[%s8850_s1 + $0x1a8] sm:$0xff] }
 0x2fd   :  { %4588 = vtanh.f32 %v5793_v53 }
 0x30a   :  { %v4589_v48 = vpop.eup %4588 }
 0x30b   :  { %v743_v50 = vmul.f32 %v4589_v48, %v4587_v60  ;;  %v5928_v60 = vld [vmem:[%s8850_s1 + $0x1b8] sm:$0xff]  ;;  %v5934_v48 = vld [vmem:[%s8850_s1 + $0x1a0] sm:$0xff] }
 0x30d   :  { %814 = vmatmul.mubr.f32.vlgmr.msra.gmra.mxu0 %v743_v50  ;;  %885 = vmatmul.mubr.f32.vlgmr.msra.gmra.mxu1 %v743_v50  ;;  %v5940_v50 = vld [vmem:[%s8850_s1 + $0x1b0] sm:$0xff] }
 0x30e   :  { %925 = vmatpush1.msra.mxu0 %v5169_v1  ;;  %996 = vmatpush1.msra.mxu1 %v5223_v11  ;;  %v9130_v1 = vld [vmem:[#allocation5_spill] sm:$0xff] }
 0x30f   :  { %926 = vmatprep.subr.mxu0 %v5174_v2  ;;  %997 = vmatprep.subr.mxu1 %v5235_v13  ;;  %v9131_v2 = vld [vmem:[#allocation12_spill] sm:$0xff]  ;;  %v9138_v11 = vld [vmem:[#allocation9_spill] sm:$0xff]  ;;  %v9140_v13 = vld [vmem:[#allocation11_spill] sm:$0xff] }
 0x310   :  { %927 = vmatpush1.msra.mxu0 %v5182_v4  ;;  %998 = vmatpush1.msra.mxu1 %v5240_v14  ;;  %v9132_v4 = vld [vmem:[#allocation6_spill] sm:$0xff]  ;;  %v9141_v14 = vld [vmem:[#allocation19_spill] sm:$0xff] }
 0x311   :  { %928 = vmatprep.subr.mxu0 %v5188_v5  ;;  %999 = vmatprep.subr.mxu1 %v5252_v16  ;;  %v9133_v5 = vld [vmem:[#allocation14_spill] sm:$0xff]  ;;  %v9143_v16 = vld [vmem:[#allocation20_spill] sm:$0xff] }
 0x312   :  { %929 = vmatpush1.msra.mxu0 %v5194_v6  ;;  %1000 = vmatpush1.msra.mxu1 %v5264_v18  ;;  %v9134_v6 = vld [vmem:[#allocation7_spill] sm:$0xff]  ;;  %v9145_v18 = vmov 0.0  }
 0x313   :  { %930 = vmatprep.subr.mxu0 %v5200_v7  ;;  %1001 = vmatprep.subr.mxu1 %v5269_v19  ;;  %v9135_v7 = vld [vmem:[#allocation16_spill] sm:$0xff]  ;;  %v9146_v19 = vld [vmem:[#allocation21_spill] sm:$0xff] }
 0x314   :  { %931 = vmatpush1.msra.mxu0 %v5206_v8  ;;  %1002 = vmatpush1.msra.mxu1 %v5281_v21  ;;  %v9136_v8 = vld [vmem:[#allocation8_spill] sm:$0xff] }
 0x315   :  { %932 = vmatprep.subr.mxu0 %v5217_v10  ;;  %1003 = vmatprep.subr.mxu1 %v5293_v23  ;;  %v9137_v10 = vld [vmem:[#allocation17_spill] sm:$0xff]  ;;  %v9148_v21 = vld [vmem:[#allocation4_spill] sm:$0xff] }
 0x316   :  { %933 = vmatpush1.msra.mxu0 %v5229_v12  ;;  %1004 = vmatpush1.msra.mxu1 %v5305_v25  ;;  %v9139_v12 = vld [vmem:[#allocation18_spill] sm:$0xff] }
 0x317   :  { %934 = vmatprep.subr.mxu0 %v5246_v15  ;;  %1005 = vmatprep.subr.mxu1 %v5317_v27  ;;  %v9142_v15 = vld [vmem:[#allocation13_spill] sm:$0xff] }
 0x318   :  { %935 = vmatpush1.msra.mxu0 %v5258_v17  ;;  %1006 = vmatpush1.msra.mxu1 %v5329_v29  ;;  %v9144_v17 = vld [vmem:[#allocation15_spill] sm:$0xff] }
 0x319   :  { %936 = vmatprep.subr.mxu0 %v5275_v20  ;;  %1007 = vmatprep.subr.mxu1 %v5341_v31  ;;  %v5863_v20 = vld [vmem:[%s8850_s1 + $0x1e8] sm:$0xff]  ;;  %v4460_v31 = vld [vmem:[%s8851_s0 + $0x78] sm:$0xff] }
 0x31a   :  { %937 = vmatpush1.msra.mxu0 %v5287_v22  ;;  %1008 = vmatpush1.msra.mxu1 %v5353_v33  ;;  %9147 = vst [vmem:[#allocation10_spill] sm:$0xff] %v5863_v20  ;;  %v4457_v22 = vld [vmem:[%s8851_s0 + $0x60] sm:$0xff] }
 0x31b   :  { %938 = vmatprep.subr.mxu0 %v5299_v24  ;;  %1009 = vmatprep.subr.mxu1 %v5365_v35  ;;  %v4458_v24 = vld [vmem:[%s8851_s0 + $0x68] sm:$0xff] }
 0x31c   :  { %939 = vmatpush1.msra.mxu0 %v5311_v26  ;;  %1010 = vmatpush1.msra.mxu1 %v5377_v37 }
 0x31d   :  { %940 = vmatprep.subr.mxu0 %v5323_v28  ;;  %1011 = vmatprep.subr.mxu1 %v5389_v39 }
 0x31e   :  { %941 = vmatpush1.msra.mxu0 %v5335_v30  ;;  %1012 = vmatpush1.msra.mxu1 %v5401_v41 }
 0x31f   :  { %942 = vmatprep.subr.mxu0 %v5347_v32  ;;  %1013 = vmatprep.subr.mxu1 %v5413_v43 }
 0x320   :  { %943 = vmatpush1.msra.mxu0 %v5359_v34  ;;  %1014 = vmatpush1.msra.mxu1 %v5425_v45  ;;  %v4459_v34 = vld [vmem:[%s8851_s0 + $0x70] sm:$0xff] }
 0x321   :  { %944 = vmatprep.subr.mxu0 %v5371_v36  ;;  %1015 = vmatprep.subr.mxu1 %v5437_v47 }
 0x322   :  { %945 = vmatpush1.msra.mxu0 %v5383_v38  ;;  %1016 = vmatpush1.msra.mxu1 %v5449_v49 }
 0x323   :  { %946 = vmatprep.subr.mxu0 %v5395_v40  ;;  %1017 = vmatprep.subr.mxu1 %v5461_v51 }
 0x324   :  { %947 = vmatpush1.msra.mxu0 %v5407_v42  ;;  %1018 = vmatpush1.msra.mxu1 %v9091_v44 }
 0x325   :  { %948 = vmatprep.subr.mxu0 %v9130_v1  ;;  %1019 = vmatprep.subr.mxu1 %v9131_v2  ;;  %v5946_v1 = vld [vmem:[%s8850_s1 + $0x188] sm:$0xff] }
 0x326   :  { %949 = vmatpush1.msra.mxu0 %v9132_v4  ;;  %1020 = vmatpush1.msra.mxu1 %v9133_v5  ;;  %v5952_v4 = vld [vmem:[%s8850_s1 + $0x198] sm:$0xff] }
 0x327   :  { %950 = vmatprep.subr.mxu0 %v9134_v6  ;;  %1021 = vmatprep.subr.mxu1 %v9135_v7  ;;  %v5958_v6 = vld [vmem:[%s8850_s1 + $0x180] sm:$0xff] }
 0x328   :  { %951 = vmatpush1.msra.mxu0 %v9136_v8  ;;  %1022 = vmatpush1.msra.mxu1 %v9137_v10  ;;  %v5964_v8 = vld [vmem:[%s8850_s1 + $0x190] sm:$0xff] }
 0x329   :  { %952 = vmatprep.subr.mxu0 %v9138_v11  ;;  %1023 = vmatprep.subr.mxu1 %v9139_v12  ;;  %v5970_v11 = vld [vmem:[%s8850_s1 + $0x168] sm:$0xff] }
 0x32a   :  { %953 = vmatpush1.msra.mxu0 %v9140_v13  ;;  %1024 = vmatpush1.msra.mxu1 %v9141_v14  ;;  %v5976_v13 = vld [vmem:[%s8850_s1 + $0x178] sm:$0xff] }
 0x32b   :  { %954 = vmatprep.subr.mxu0 %v9142_v15  ;;  %1025 = vmatprep.subr.mxu1 %v9143_v16 }
 0x32c   :  { %955 = vmatpush1.msra.mxu0 %v9144_v17  ;;  %988 = vmatprep.mubr.f32.mxu0 %v9145_v18 }
 0x32d   :  { %1026 = vmatpush1.msra.mxu1 %v9146_v19  ;;  %1059 = vmatprep.mubr.f32.mxu1 %v9145_v18 }
 0x32e   :  { %1099 = vmatprep.subr.mxu0 %v5863_v20  ;;  %1170 = vmatprep.subr.mxu1 %v9148_v21  ;;  %v5982_v21 = vld [vmem:[%s8850_s1 + $0x160] sm:$0xff] }
 0x3cd   :  { %v815_v23 = vpop.f32.mrf.mxu0  ;;  %v886_v29 = vpop.f32.mrf.mxu1 }
 0x3ce   :  { %v891_v25 = vadd.f32 %v4457_v22, %v815_v23  ;;  %v893_v37 = vadd.f32 %v4459_v34, %v886_v29  ;;  %v5988_v22 = vld [vmem:[%s8850_s1 + $0x170] sm:$0xff]  ;;  %v5994_v23 = vld [vmem:[%s8850_s1 + $0x148] sm:$0xff]  ;;  %v6030_v29 = vld [vmem:[%s8850_s1 + $0x120] sm:$0xff] }
 0x3cf   :  { %v817_v26 = vpop.f32.mrf.mxu0  ;;  %v888_v32 = vpop.f32.mrf.mxu1  ;;  %v6060_v34 = vld [vmem:[%s8850_s1 + $0x110] sm:$0xff] }
 0x3d0   :  { %v4461_v27 = vmul.f32 -1.442695, %v891_v25  ;;  %v892_v28 = vadd.f32 %v4458_v24, %v817_v26  ;;  %v894_v33 = vadd.f32 %v4460_v31, %v888_v32  ;;  %v6000_v24 = vld [vmem:[%s8850_s1 + $0x158] sm:$0xff]  ;;  %v6006_v25 = vld [vmem:[%s8850_s1 + $0x140] sm:$0xff]  ;;  %v6012_v26 = vld [vmem:[%s8850_s1 + $0x150] sm:$0xff] }
 0x3d1   :  { %v6042_v31 = vld [vmem:[%s8850_s1 + $0x108] sm:$0xff]  ;;  %v6048_v32 = vld [vmem:[%s8850_s1 + $0x118] sm:$0xff] }
 0x3d2   :  { %4590 = vpow2.f32 %v4461_v27  ;;  %v4462_v30 = vmul.f32 -1.442695, %v892_v28  ;;  %v4463_v35 = vmul.f32 -1.442695, %v894_v33  ;;  %v6018_v27 = vld [vmem:[%s8850_s1 + $0x128] sm:$0xff]  ;;  %v6024_v28 = vld [vmem:[%s8850_s1 + $0x138] sm:$0xff] }
 0x3d3   :  { %v6054_v33 = vld [vmem:[%s8850_s1 + $0x100] sm:$0xff] }
 0x3d4   :  { %4592 = vpow2.f32 %v4462_v30  ;;  %v6036_v30 = vld [vmem:[%s8850_s1 + $0x130] sm:$0xff] }
 0x3d5   :  { %4594 = vpow2.f32 %v4463_v35  ;;  %v6066_v35 = vld [vmem:[%s8850_s1 + $0xe8] sm:$0xff] }
 0x3df   :  { %v4591_v36 = vpop.eup %4590 }
 0x3e0   :  { %v898_v38 = vadd.f32 1.0, %v4591_v36  ;;  %v6072_v36 = vld [vmem:[%s8850_s1 + $0xf8] sm:$0xff] }
 0x3e1   :  { %v4593_v39 = vpop.eup %4592 }
 0x3e2   :  { %4596 = vrcp.f32 %v898_v38  ;;  %v904_v40 = vadd.f32 1.0, %v4593_v39  ;;  %v4595_v41 = vpop.eup %4594  ;;  %v6084_v38 = vld [vmem:[%s8850_s1 + $0xf0] sm:$0xff]  ;;  %v6090_v39 = vld [vmem:[%s8850_s1 + $0xc8] sm:$0xff] }
 0x3e3   :  { %4598 = vtanh.f32 %v893_v37  ;;  %v911_v55 = vadd.f32 1.0, %v4595_v41  ;;  %v6078_v37 = vld [vmem:[%s8850_s1 + $0xe0] sm:$0xff] }
 0x3e4   :  { %4600 = vrcp.f32 %v904_v40  ;;  %v6096_v40 = vld [vmem:[%s8850_s1 + $0xd8] sm:$0xff]  ;;  %v6102_v41 = vld [vmem:[%s8850_s1 + $0xc0] sm:$0xff] }
 0x3e5   :  { %4602 = vrcp.f32 %v911_v55 }
 0x3ef   :  { %v4597_v42 = vpop.eup %4596 }
 0x3f0   :  { %v4599_v43 = vpop.eup %4598 }
 0x3f1   :  { %v4601_v46 = vpop.eup %4600  ;;  %v915_v61 = vmul.f32 %v4599_v43, %v4597_v42  ;;  %v6109_v42 = vld [vmem:[%s8850_s1 + $0xa8] sm:$0xff]  ;;  %v6116_v43 = vld [vmem:[%s8850_s1 + $0xa0] sm:$0xff] }
 0x3f2   :  { %v914_v58 = vmul.f32 %v4601_v46, %v5793_v53  ;;  %v4603_v9 = vpop.eup %4602  ;;  %v5892_v53 = vld [vmem:[%s8850_s1 + $0x1f0] sm:$0xff] }
 0x3f4   :  { %v5880_v63 = vadd.f32 %v915_v61, %v914_v58  ;;  %v4467_v58 = vld [vmem:[%s8851_s0 + $0x98] sm:$0xff] }
 0x3f6   :  { %4604 = vtanh.f32 %v5880_v63 }
 0x403   :  { %v4605_v57 = vpop.eup %4604 }
 0x404   :  { %v918_v62 = vmul.f32 %v4605_v57, %v4603_v9 }
 0x406   :  { %989 = vmatmul.mubr.f32.vlgmr.msra.gmra.mxu0 %v918_v62  ;;  %1060 = vmatmul.mubr.f32.vlgmr.msra.gmra.mxu1 %v918_v62  ;;  %v4466_v62 = vld [vmem:[%s8851_s0 + $0x90] sm:$0xff] }
 0x407   :  { %1100 = vmatpush1.msra.mxu0 %v5886_v0  ;;  %1171 = vmatpush1.msra.mxu1 %v5892_v53 }
 0x408   :  { %1101 = vmatprep.subr.mxu0 %v5898_v56  ;;  %1172 = vmatprep.subr.mxu1 %v5904_v3 }
 0x409   :  { %1102 = vmatpush1.msra.mxu0 %v5910_v59  ;;  %1173 = vmatpush1.msra.mxu1 %v5916_v54 }
 0x40a   :  { %1103 = vmatprep.subr.mxu0 %v5922_v52  ;;  %1174 = vmatprep.subr.mxu1 %v5928_v60 }
 0x40b   :  { %1104 = vmatpush1.msra.mxu0 %v5934_v48  ;;  %1175 = vmatpush1.msra.mxu1 %v5940_v50 }
 0x40c   :  { %1105 = vmatprep.subr.mxu0 %v5946_v1  ;;  %1176 = vmatprep.subr.mxu1 %v5952_v4 }
 0x40d   :  { %1106 = vmatpush1.msra.mxu0 %v5958_v6  ;;  %1177 = vmatpush1.msra.mxu1 %v5964_v8 }
 0x40e   :  { %1107 = vmatprep.subr.mxu0 %v5970_v11  ;;  %1178 = vmatprep.subr.mxu1 %v5976_v13 }
 0x40f   :  { %1108 = vmatpush1.msra.mxu0 %v5982_v21  ;;  %1179 = vmatpush1.msra.mxu1 %v5988_v22 }
 0x410   :  { %1109 = vmatprep.subr.mxu0 %v5994_v23  ;;  %1180 = vmatprep.subr.mxu1 %v6000_v24 }
 0x411   :  { %1110 = vmatpush1.msra.mxu0 %v6006_v25  ;;  %1181 = vmatpush1.msra.mxu1 %v6012_v26 }
 0x412   :  { %1111 = vmatprep.subr.mxu0 %v6018_v27  ;;  %1182 = vmatprep.subr.mxu1 %v6024_v28 }
 0x413   :  { %1112 = vmatpush1.msra.mxu0 %v6030_v29  ;;  %1183 = vmatpush1.msra.mxu1 %v6036_v30 }
 0x414   :  { %1113 = vmatprep.subr.mxu0 %v6042_v31  ;;  %1184 = vmatprep.subr.mxu1 %v6048_v32 }
 0x415   :  { %1114 = vmatpush1.msra.mxu0 %v6054_v33  ;;  %1185 = vmatpush1.msra.mxu1 %v6060_v34 }
 0x416   :  { %1115 = vmatprep.subr.mxu0 %v6066_v35  ;;  %1186 = vmatprep.subr.mxu1 %v6072_v36 }
 0x417   :  { %1116 = vmatpush1.msra.mxu0 %v6078_v37  ;;  %1187 = vmatpush1.msra.mxu1 %v6084_v38 }
 0x418   :  { %1117 = vmatprep.subr.mxu0 %v6090_v39  ;;  %1188 = vmatprep.subr.mxu1 %v6096_v40 }
 0x419   :  { %1118 = vmatpush1.msra.mxu0 %v6102_v41  ;;  %1189 = vmatpush1.msra.mxu1 %v5425_v45  ;;  %v6123_v45 = vld [vmem:[%s8850_s1 + $0x88] sm:$0xff] }
 0x41a   :  { %1119 = vmatprep.subr.mxu0 %v6109_v42  ;;  %1190 = vmatprep.subr.mxu1 %v5437_v47  ;;  %v6130_v47 = vld [vmem:[%s8850_s1 + $0x80] sm:$0xff] }
 0x41b   :  { %1120 = vmatpush1.msra.mxu0 %v6116_v43  ;;  %1191 = vmatpush1.msra.mxu1 %v5449_v49  ;;  %v6137_v49 = vld [vmem:[%s8850_s1 + $0x68] sm:$0xff] }
 0x41c   :  { %1121 = vmatprep.subr.mxu0 %v6123_v45  ;;  %1192 = vmatprep.subr.mxu1 %v5461_v51  ;;  %9149 = vst [vmem:[#allocation3_spill] sm:$0xff] %v6137_v49  ;;  %v6144_v51 = vld [vmem:[%s8850_s1 + $0x60] sm:$0xff] }
 0x41d   :  { %1122 = vmatpush1.msra.mxu0 %v6130_v47  ;;  %1193 = vmatpush1.msra.mxu1 %v9091_v44  ;;  %9150 = vst [vmem:[#allocation5_spill] sm:$0xff] %v6144_v51  ;;  %v6151_v44 = vld [vmem:[%s8850_s1 + $0x48] sm:$0xff] }
 0x41e   :  { %1123 = vmatprep.subr.mxu0 %v6137_v49  ;;  %1194 = vmatprep.subr.mxu1 %v9131_v2  ;;  %9151 = vst [vmem:[#allocation12_spill] sm:$0xff] %v6151_v44  ;;  %v6158_v2 = vld [vmem:[%s8850_s1 + $0x40] sm:$0xff] }
 0x41f   :  { %1124 = vmatpush1.msra.mxu0 %v6144_v51  ;;  %1195 = vmatpush1.msra.mxu1 %v9133_v5  ;;  %9152 = vst [vmem:[#allocation6_spill] sm:$0xff] %v6158_v2  ;;  %v6165_v5 = vld [vmem:[%s8850_s1 + $0x28] sm:$0xff] }
 0x420   :  { %1125 = vmatprep.subr.mxu0 %v6151_v44  ;;  %1196 = vmatprep.subr.mxu1 %v9135_v7  ;;  %9153 = vst [vmem:[#allocation14_spill] sm:$0xff] %v6165_v5  ;;  %v6172_v7 = vld [vmem:[%s8850_s1 + $0x20] sm:$0xff] }
 0x421   :  { %1126 = vmatpush1.msra.mxu0 %v6158_v2  ;;  %1197 = vmatpush1.msra.mxu1 %v9137_v10  ;;  %9154 = vst [vmem:[#allocation7_spill] sm:$0xff] %v6172_v7  ;;  %v6186_v10 = vld [vmem:[%s8850_s1 + $0x1f8] sm:$0xff] }
 0x422   :  { %1127 = vmatprep.subr.mxu0 %v6165_v5  ;;  %1198 = vmatprep.subr.mxu1 %v9139_v12  ;;  %9155 = vst [vmem:[#allocation16_spill] sm:$0xff] %v6186_v10  ;;  %v4464_v12 = vld [vmem:[%s8851_s0 + $0x80] sm:$0xff] }
 0x423   :  { %1128 = vmatpush1.msra.mxu0 %v6172_v7  ;;  %1199 = vmatpush1.msra.mxu1 %v9141_v14 }
 0x424   :  { %1129 = vmatprep.subr.mxu0 %v9142_v15  ;;  %1200 = vmatprep.subr.mxu1 %v9143_v16  ;;  %v4465_v15 = vld [vmem:[%s8851_s0 + $0x88] sm:$0xff] }
 0x425   :  { %1130 = vmatpush1.msra.mxu0 %v9144_v17  ;;  %1163 = vmatprep.mubr.f32.mxu0 %v9145_v18 }
 0x426   :  { %1201 = vmatpush1.msra.mxu1 %v9146_v19  ;;  %1234 = vmatprep.mubr.f32.mxu1 %v9145_v18 }
 0x427   :  { %1274 = vmatprep.subr.mxu0 %v5863_v20  ;;  %1345 = vmatprep.subr.mxu1 %v6186_v10 }
 0x4c6   :  { %v990_v14 = vpop.f32.mrf.mxu0  ;;  %v1061_v55 = vpop.f32.mrf.mxu1 }
 0x4c7   :  { %v1066_v16 = vadd.f32 %v4464_v12, %v990_v14  ;;  %v1068_v12 = vadd.f32 %v4466_v62, %v1061_v55  ;;  %v6266_v62 = vld [vmem:[%s8850_s1 + $0x98] sm:$0xff] }
 0x4c8   :  { %v992_v17 = vpop.f32.mrf.mxu0  ;;  %v1063_v9 = vpop.f32.mrf.mxu1 }
 0x4c9   :  { %v4468_v19 = vmul.f32 -1.442695, %v1066_v16  ;;  %v1067_v46 = vadd.f32 %v4465_v15, %v992_v17  ;;  %v1069_v57 = vadd.f32 %v4467_v58, %v1063_v9 }
 0x4cb   :  { %4606 = vpow2.f32 %v4468_v19  ;;  %v4469_v61 = vmul.f32 -1.442695, %v1067_v46  ;;  %v4470_v10 = vmul.f32 -1.442695, %v1069_v57  ;;  %v6259_v57 = vld [vmem:[%s8850_s1 + $0xb0] sm:$0xff] }
 0x4cd   :  { %4608 = vpow2.f32 %v4469_v61 }
 0x4ce   :  { %4610 = vpow2.f32 %v4470_v10 }
 0x4d8   :  { %v4607_v20 = vpop.eup %4606 }
 0x4d9   :  { %v1073_v14 = vadd.f32 1.0, %v4607_v20 }
 0x4da   :  { %v4609_v16 = vpop.eup %4608 }
 0x4db   :  { %4612 = vrcp.f32 %v1073_v14  ;;  %v1079_v15 = vadd.f32 1.0, %v4609_v16  ;;  %v4611_v17 = vpop.eup %4610  ;;  %v6280_v14 = vld [vmem:[%s8850_s1 + $0x78] sm:$0xff]  ;;  %v6287_v16 = vld [vmem:[%s8850_s1 + $0x70] sm:$0xff] }
 0x4dc   :  { %4614 = vtanh.f32 %v1068_v12  ;;  %v1086_v18 = vadd.f32 1.0, %v4611_v17  ;;  %v6273_v12 = vld [vmem:[%s8850_s1 + $0x90] sm:$0xff]  ;;  %9156 = vst [vmem:[#allocation8_spill] sm:$0xff] %v6280_v14  ;;  %9157 = vst [vmem:[#allocation17_spill] sm:$0xff] %v6287_v16 }
 0x4dd   :  { %4616 = vrcp.f32 %v1079_v15  ;;  %v6294_v15 = vld [vmem:[%s8850_s1 + $0x58] sm:$0xff]  ;;  %v6301_v17 = vld [vmem:[%s8850_s1 + $0x50] sm:$0xff] }
 0x4de   :  { %4618 = vrcp.f32 %v1086_v18  ;;  %v6245_v18 = vld [vmem:[%s8850_s1 + $0xd0] sm:$0xff]  ;;  %9158 = vst [vmem:[#allocation9_spill] sm:$0xff] %v6294_v15  ;;  %9159 = vst [vmem:[#allocation18_spill] sm:$0xff] %v6301_v17 }
 0x4e8   :  { %v4613_v19 = vpop.eup %4612 }
 0x4e9   :  { %v4615_v46 = vpop.eup %4614 }
 0x4ea   :  { %v4617_v61 = vpop.eup %4616  ;;  %v1090_v58 = vmul.f32 %v4615_v46, %v4613_v19  ;;  %v6308_v19 = vld [vmem:[%s8850_s1 + $0x38] sm:$0xff]  ;;  %v9161_v46 = vld [vmem:[#allocation7_spill] sm:$0xff] }
 0x4eb   :  { %v1089_v9 = vmul.f32 %v4617_v61, %v5880_v63  ;;  %v4619_v20 = vpop.eup %4618  ;;  %v6252_v63 = vld [vmem:[%s8850_s1 + $0xb8] sm:$0xff]  ;;  %9160 = vst [vmem:[#allocation11_spill] sm:$0xff] %v6308_v19  ;;  %v6315_v61 = vld [vmem:[%s8850_s1 + $0x30] sm:$0xff] }
 0x4ec   :  { %9162 = vst [vmem:[#allocation19_spill] sm:$0xff] %v6315_v61 }
 0x4ed   :  { %v6202_v7 = vadd.f32 %v1090_v58, %v1089_v9  ;;  %v6321_v58 = vld [vmem:[%s8850_s1 + $0x8] sm:$0xff]  ;;  %v6327_v9 = vld [vmem:[%s8850_s1 + $0x18] sm:$0xff] }
 0x4ee   :  { %9163 = vst [vmem:[#allocation13_spill] sm:$0xff] %v6321_v58  ;;  %9164 = vst [vmem:[#allocation20_spill] sm:$0xff] %v6327_v9 }
 0x4ef   :  { %4620 = vtanh.f32 %v6202_v7 }
 0x4fc   :  { %v4621_v55 = vpop.eup %4620 }
 0x4fd   :  { %v1093_v10 = vmul.f32 %v4621_v55, %v4619_v20  ;;  %v6333_v20 = vld [vmem:[%s8850_s1] sm:$0xff]  ;;  %v9166_v55 = vmov 0.0  }
 0x4fe   :  { %9165 = vst [vmem:[#allocation15_spill] sm:$0xff] %v6333_v20 }
 0x4ff   :  { %1164 = vmatmul.mubr.f32.vlgmr.msra.gmra.mxu0 %v1093_v10  ;;  %1235 = vmatmul.mubr.f32.vlgmr.msra.gmra.mxu1 %v1093_v10  ;;  %v6340_v10 = vld [vmem:[%s8850_s1 + $0x10] sm:$0xff] }
 0x500   :  { %1275 = vmatpush1.msra.mxu0 %v5886_v0  ;;  %1346 = vmatpush1.msra.mxu1 %v5892_v53  ;;  %9167 = vst [vmem:[#allocation21_spill] sm:$0xff] %v6340_v10 }
 0x501   :  { %1276 = vmatprep.subr.mxu0 %v5898_v56  ;;  %1347 = vmatprep.subr.mxu1 %v5904_v3 }
 0x502   :  { %1277 = vmatpush1.msra.mxu0 %v5910_v59  ;;  %1348 = vmatpush1.msra.mxu1 %v5916_v54 }
 0x503   :  { %1278 = vmatprep.subr.mxu0 %v5922_v52  ;;  %1349 = vmatprep.subr.mxu1 %v5928_v60 }
 0x504   :  { %1279 = vmatpush1.msra.mxu0 %v5934_v48  ;;  %1350 = vmatpush1.msra.mxu1 %v5940_v50 }
 0x505   :  { %1280 = vmatprep.subr.mxu0 %v5946_v1  ;;  %1351 = vmatprep.subr.mxu1 %v5952_v4 }
 0x506   :  { %1281 = vmatpush1.msra.mxu0 %v5958_v6  ;;  %1352 = vmatpush1.msra.mxu1 %v5964_v8 }
 0x507   :  { %1282 = vmatprep.subr.mxu0 %v5970_v11  ;;  %1353 = vmatprep.subr.mxu1 %v5976_v13 }
 0x508   :  { %1283 = vmatpush1.msra.mxu0 %v5982_v21  ;;  %1354 = vmatpush1.msra.mxu1 %v5988_v22 }
 0x509   :  { %1284 = vmatprep.subr.mxu0 %v5994_v23  ;;  %1355 = vmatprep.subr.mxu1 %v6000_v24 }
 0x50a   :  { %1285 = vmatpush1.msra.mxu0 %v6006_v25  ;;  %1356 = vmatpush1.msra.mxu1 %v6012_v26 }
 0x50b   :  { %1286 = vmatprep.subr.mxu0 %v6018_v27  ;;  %1357 = vmatprep.subr.mxu1 %v6024_v28 }
 0x50c   :  { %1287 = vmatpush1.msra.mxu0 %v6030_v29  ;;  %1358 = vmatpush1.msra.mxu1 %v6036_v30 }
 0x50d   :  { %1288 = vmatprep.subr.mxu0 %v6042_v31  ;;  %1359 = vmatprep.subr.mxu1 %v6048_v32 }
 0x50e   :  { %1289 = vmatpush1.msra.mxu0 %v6054_v33  ;;  %1360 = vmatpush1.msra.mxu1 %v6060_v34 }
 0x50f   :  { %1290 = vmatprep.subr.mxu0 %v6066_v35  ;;  %1361 = vmatprep.subr.mxu1 %v6072_v36 }
 0x510   :  { %1291 = vmatpush1.msra.mxu0 %v6078_v37  ;;  %1362 = vmatpush1.msra.mxu1 %v6084_v38 }
 0x511   :  { %1292 = vmatprep.subr.mxu0 %v6090_v39  ;;  %1363 = vmatprep.subr.mxu1 %v6096_v40 }
 0x512   :  { %1293 = vmatpush1.msra.mxu0 %v6102_v41  ;;  %1364 = vmatpush1.msra.mxu1 %v6245_v18 }
 0x513   :  { %1294 = vmatprep.subr.mxu0 %v6109_v42  ;;  %1365 = vmatprep.subr.mxu1 %v6252_v63 }
 0x514   :  { %1295 = vmatpush1.msra.mxu0 %v6116_v43  ;;  %1366 = vmatpush1.msra.mxu1 %v6259_v57 }
 0x515   :  { %1296 = vmatprep.subr.mxu0 %v6123_v45  ;;  %1367 = vmatprep.subr.mxu1 %v6266_v62 }
 0x516   :  { %1297 = vmatpush1.msra.mxu0 %v6130_v47  ;;  %1368 = vmatpush1.msra.mxu1 %v6273_v12 }
 0x517   :  { %1298 = vmatprep.subr.mxu0 %v6137_v49  ;;  %1369 = vmatprep.subr.mxu1 %v6280_v14 }
 0x518   :  { %1299 = vmatpush1.msra.mxu0 %v6144_v51  ;;  %1370 = vmatpush1.msra.mxu1 %v6287_v16 }
 0x519   :  { %1300 = vmatprep.subr.mxu0 %v6151_v44  ;;  %1371 = vmatprep.subr.mxu1 %v6294_v15  ;;  %v4473_v44 = vld [vmem:[%s8851_s0 + $0xb0] sm:$0xff] }
 0x51a   :  { %1301 = vmatpush1.msra.mxu0 %v6158_v2  ;;  %1372 = vmatpush1.msra.mxu1 %v6301_v17 }
 0x51b   :  { %1302 = vmatprep.subr.mxu0 %v6165_v5  ;;  %1373 = vmatprep.subr.mxu1 %v6308_v19 }
 0x51c   :  { %1303 = vmatpush1.msra.mxu0 %v9161_v46  ;;  %1374 = vmatpush1.msra.mxu1 %v6315_v61  ;;  %v4471_v61 = vld [vmem:[%s8851_s0 + $0xa0] sm:$0xff]  ;;  %v4472_v46 = vld [vmem:[%s8851_s0 + $0xa8] sm:$0xff] }
 0x51d   :  { %1304 = vmatprep.subr.mxu0 %v6321_v58  ;;  %1375 = vmatprep.subr.mxu1 %v6327_v9  ;;  %v9168_v58 = vld [vmem:[#allocation10_spill] sm:$0xff]  ;;  %v9169_v9 = vld [vmem:[#allocation16_spill] sm:$0xff] }
 0x51e   :  { %1305 = vmatpush1.msra.mxu0 %v6333_v20  ;;  %1338 = vmatprep.mubr.f32.mxu0 %v9166_v55 }
 0x51f   :  { %1376 = vmatpush1.msra.mxu1 %v6340_v10  ;;  %1409 = vmatprep.mubr.f32.mxu1 %v9166_v55 }
 0x520   :  { %1449 = vmatprep.subr.mxu0 %v9168_v58  ;;  %1520 = vmatprep.subr.mxu1 %v9169_v9  ;;  %v4474_v58 = vld [vmem:[%s8851_s0 + $0xb8] sm:$0xff] }
 0x5bf   :  { %v1165_v20 = vpop.f32.mrf.mxu0  ;;  %v1236_v10 = vpop.f32.mrf.mxu1 }
 0x5c0   :  { %v1241_v19 = vadd.f32 %v4471_v61, %v1165_v20  ;;  %v1243_v61 = vadd.f32 %v4473_v44, %v1236_v10  ;;  %v152_v10 = vld [vmem:[%s8852_s2 + $0x1f0] sm:$0xff] }
 0x5c1   :  { %v1167_v5 = vpop.f32.mrf.mxu0  ;;  %v1238_v9 = vpop.f32.mrf.mxu1 }
 0x5c2   :  { %v4475_v17 = vmul.f32 -1.442695, %v1241_v19  ;;  %v1242_v2 = vadd.f32 %v4472_v46, %v1167_v5  ;;  %v1244_v15 = vadd.f32 %v4474_v58, %v1238_v9 }
 0x5c4   :  { %4622 = vpow2.f32 %v4475_v17  ;;  %v4476_v55 = vmul.f32 -1.442695, %v1242_v2  ;;  %v4477_v16 = vmul.f32 -1.442695, %v1244_v15  ;;  %v150_v15 = vld [vmem:[%s8852_s2 + $0x1e0] sm:$0xff] }
 0x5c6   :  { %4624 = vpow2.f32 %v4476_v55 }
 0x5c7   :  { %4626 = vpow2.f32 %v4477_v16 }
 0x5d1   :  { %v4623_v51 = vpop.eup %4622 }
 0x5d2   :  { %v1248_v20 = vadd.f32 1.0, %v4623_v51 }
 0x5d3   :  { %v4625_v19 = vpop.eup %4624 }
 0x5d4   :  { %4628 = vrcp.f32 %v1248_v20  ;;  %v1254_v5 = vadd.f32 1.0, %v4625_v19  ;;  %v4627_v2 = vpop.eup %4626  ;;  %v149_v20 = vld [vmem:[%s8852_s2 + $0x1d8] sm:$0xff]  ;;  %v146_v19 = vld [vmem:[%s8852_s2 + $0x1c0] sm:$0xff] }
 0x5d5   :  { %4630 = vtanh.f32 %v1243_v61  ;;  %v1261_v14 = vadd.f32 1.0, %v4627_v2  ;;  %v147_v61 = vld [vmem:[%s8852_s2 + $0x1c8] sm:$0xff] }
 0x5d6   :  { %4632 = vrcp.f32 %v1254_v5  ;;  %v148_v5 = vld [vmem:[%s8852_s2 + $0x1d0] sm:$0xff]  ;;  %v143_v2 = vld [vmem:[%s8852_s2 + $0x1a8] sm:$0xff] }
 0x5d7   :  { %4634 = vrcp.f32 %v1261_v14  ;;  %v151_v14 = vld [vmem:[%s8852_s2 + $0x1e8] sm:$0xff] }
 0x5e1   :  { %v4629_v17 = vpop.eup %4628 }
 0x5e2   :  { %v4631_v46 = vpop.eup %4630 }
 0x5e3   :  { %v4633_v55 = vpop.eup %4632  ;;  %v1265_v58 = vmul.f32 %v4631_v46, %v4629_v17  ;;  %v145_v17 = vld [vmem:[%s8852_s2 + $0x1b8] sm:$0xff]  ;;  %v142_v46 = vld [vmem:[%s8852_s2 + $0x1a0] sm:$0xff] }
 0x5e4   :  { %v1264_v9 = vmul.f32 %v4633_v55, %v6202_v7  ;;  %v4635_v51 = vpop.eup %4634  ;;  %v144_v55 = vld [vmem:[%s8852_s2 + $0x1b0] sm:$0xff] }
 0x5e6   :  { %v6359_v49 = vadd.f32 %v1265_v58, %v1264_v9  ;;  %v139_v58 = vld [vmem:[%s8852_s2 + $0x188] sm:$0xff]  ;;  %v141_v9 = vld [vmem:[%s8852_s2 + $0x198] sm:$0xff] }
 0x5e8   :  { %4636 = vtanh.f32 %v6359_v49 }
 0x5f5   :  { %v4637_v44 = vpop.eup %4636 }
 0x5f6   :  { %v1268_v16 = vmul.f32 %v4637_v44, %v4635_v51  ;;  %v138_v51 = vld [vmem:[%s8852_s2 + $0x180] sm:$0xff]  ;;  %v140_v44 = vld [vmem:[%s8852_s2 + $0x190] sm:$0xff] }
 0x5f8   :  { %1339 = vmatmul.mubr.f32.vlgmr.msra.gmra.mxu0 %v1268_v16  ;;  %1410 = vmatmul.mubr.f32.vlgmr.msra.gmra.mxu1 %v1268_v16  ;;  %v135_v16 = vld [vmem:[%s8852_s2 + $0x168] sm:$0xff] }
 0x5f9   :  { %1450 = vmatpush1.msra.mxu0 %v5886_v0  ;;  %1521 = vmatpush1.msra.mxu1 %v5892_v53  ;;  %v9170_v0 = vld [vmem:[#allocation3_spill] sm:$0xff]  ;;  %v9171_v53 = vld [vmem:[#allocation8_spill] sm:$0xff] }
 0x5fa   :  { %1451 = vmatprep.subr.mxu0 %v5898_v56  ;;  %1522 = vmatprep.subr.mxu1 %v5904_v3  ;;  %v9172_v56 = vld [vmem:[#allocation5_spill] sm:$0xff] }
 0x5fb   :  { %1452 = vmatpush1.msra.mxu0 %v5910_v59  ;;  %1523 = vmatpush1.msra.mxu1 %v5916_v54  ;;  %v9173_v3 = vld [vmem:[#allocation17_spill] sm:$0xff]  ;;  %v9174_v59 = vld [vmem:[#allocation12_spill] sm:$0xff] }
 0x5fc   :  { %1453 = vmatprep.subr.mxu0 %v5922_v52  ;;  %1524 = vmatprep.subr.mxu1 %v5928_v60  ;;  %v9175_v54 = vld [vmem:[#allocation9_spill] sm:$0xff]  ;;  %v9176_v52 = vld [vmem:[#allocation6_spill] sm:$0xff] }
 0x5fd   :  { %1454 = vmatpush1.msra.mxu0 %v5934_v48  ;;  %1525 = vmatpush1.msra.mxu1 %v5940_v50  ;;  %v9177_v60 = vld [vmem:[#allocation18_spill] sm:$0xff]  ;;  %v9179_v50 = vld [vmem:[#allocation11_spill] sm:$0xff] }
 0x5fe   :  { %1455 = vmatprep.subr.mxu0 %v5946_v1  ;;  %1526 = vmatprep.subr.mxu1 %v5952_v4  ;;  %v9178_v48 = vld [vmem:[#allocation14_spill] sm:$0xff]  ;;  %v9180_v1 = vld [vmem:[#allocation7_spill] sm:$0xff] }
 0x5ff   :  { %1456 = vmatpush1.msra.mxu0 %v5958_v6  ;;  %1527 = vmatpush1.msra.mxu1 %v5964_v8  ;;  %v9181_v4 = vld [vmem:[#allocation19_spill] sm:$0xff]  ;;  %v9182_v6 = vld [vmem:[#allocation13_spill] sm:$0xff]  ;;  %v9183_v8 = vld [vmem:[#allocation20_spill] sm:$0xff] }
 0x600   :  { %1457 = vmatprep.subr.mxu0 %v5970_v11  ;;  %1528 = vmatprep.subr.mxu1 %v5976_v13  ;;  %v9184_v11 = vld [vmem:[#allocation15_spill] sm:$0xff]  ;;  %v9185_v13 = vmov 0.0  }
 0x601   :  { %1458 = vmatpush1.msra.mxu0 %v5982_v21  ;;  %1529 = vmatpush1.msra.mxu1 %v5988_v22  ;;  %v9186_v21 = vld [vmem:[#allocation21_spill] sm:$0xff]  ;;  %v4478_v22 = vld [vmem:[%s8851_s0 + $0xc0] sm:$0xff] }
 0x602   :  { %1459 = vmatprep.subr.mxu0 %v5994_v23  ;;  %1530 = vmatprep.subr.mxu1 %v6000_v24  ;;  %v4479_v24 = vld [vmem:[%s8851_s0 + $0xc8] sm:$0xff] }
 0x603   :  { %1460 = vmatpush1.msra.mxu0 %v6006_v25  ;;  %1531 = vmatpush1.msra.mxu1 %v6012_v26 }
 0x604   :  { %1461 = vmatprep.subr.mxu0 %v6018_v27  ;;  %1532 = vmatprep.subr.mxu1 %v6024_v28 }
 0x605   :  { %1462 = vmatpush1.msra.mxu0 %v6030_v29  ;;  %1533 = vmatpush1.msra.mxu1 %v6036_v30 }
 0x606   :  { %1463 = vmatprep.subr.mxu0 %v6042_v31  ;;  %1534 = vmatprep.subr.mxu1 %v6048_v32  ;;  %v4481_v31 = vld [vmem:[%s8851_s0 + $0xd8] sm:$0xff] }
 0x607   :  { %1464 = vmatpush1.msra.mxu0 %v6054_v33  ;;  %1535 = vmatpush1.msra.mxu1 %v6060_v34  ;;  %v4480_v34 = vld [vmem:[%s8851_s0 + $0xd0] sm:$0xff] }
 0x608   :  { %1465 = vmatprep.subr.mxu0 %v6066_v35  ;;  %1536 = vmatprep.subr.mxu1 %v6072_v36 }
 0x609   :  { %1466 = vmatpush1.msra.mxu0 %v6078_v37  ;;  %1537 = vmatpush1.msra.mxu1 %v6084_v38 }
 0x60a   :  { %1467 = vmatprep.subr.mxu0 %v6090_v39  ;;  %1538 = vmatprep.subr.mxu1 %v6096_v40 }
 0x60b   :  { %1468 = vmatpush1.msra.mxu0 %v6102_v41  ;;  %1539 = vmatpush1.msra.mxu1 %v6245_v18 }
 0x60c   :  { %1469 = vmatprep.subr.mxu0 %v6109_v42  ;;  %1540 = vmatprep.subr.mxu1 %v6252_v63 }
 0x60d   :  { %1470 = vmatpush1.msra.mxu0 %v6116_v43  ;;  %1541 = vmatpush1.msra.mxu1 %v6259_v57 }
 0x60e   :  { %1471 = vmatprep.subr.mxu0 %v6123_v45  ;;  %1542 = vmatprep.subr.mxu1 %v6266_v62 }
 0x60f   :  { %1472 = vmatpush1.msra.mxu0 %v6130_v47  ;;  %1543 = vmatpush1.msra.mxu1 %v6273_v12 }
 0x610   :  { %1473 = vmatprep.subr.mxu0 %v9170_v0  ;;  %1544 = vmatprep.subr.mxu1 %v9171_v53  ;;  %v137_v0 = vld [vmem:[%s8852_s2 + $0x178] sm:$0xff]  ;;  %v134_v53 = vld [vmem:[%s8852_s2 + $0x160] sm:$0xff] }
 0x611   :  { %1474 = vmatpush1.msra.mxu0 %v9172_v56  ;;  %1545 = vmatpush1.msra.mxu1 %v9173_v3  ;;  %v136_v56 = vld [vmem:[%s8852_s2 + $0x170] sm:$0xff]  ;;  %v131_v3 = vld [vmem:[%s8852_s2 + $0x148] sm:$0xff] }
 0x612   :  { %1475 = vmatprep.subr.mxu0 %v9174_v59  ;;  %1546 = vmatprep.subr.mxu1 %v9175_v54  ;;  %v133_v59 = vld [vmem:[%s8852_s2 + $0x158] sm:$0xff]  ;;  %v130_v54 = vld [vmem:[%s8852_s2 + $0x140] sm:$0xff] }
 0x613   :  { %1476 = vmatpush1.msra.mxu0 %v9176_v52  ;;  %1547 = vmatpush1.msra.mxu1 %v9177_v60  ;;  %v132_v52 = vld [vmem:[%s8852_s2 + $0x150] sm:$0xff]  ;;  %v127_v60 = vld [vmem:[%s8852_s2 + $0x128] sm:$0xff] }
 0x614   :  { %1477 = vmatprep.subr.mxu0 %v9178_v48  ;;  %1548 = vmatprep.subr.mxu1 %v9179_v50  ;;  %v129_v48 = vld [vmem:[%s8852_s2 + $0x138] sm:$0xff]  ;;  %v126_v50 = vld [vmem:[%s8852_s2 + $0x120] sm:$0xff] }
 0x615   :  { %1478 = vmatpush1.msra.mxu0 %v9180_v1  ;;  %1549 = vmatpush1.msra.mxu1 %v9181_v4  ;;  %v128_v1 = vld [vmem:[%s8852_s2 + $0x130] sm:$0xff]  ;;  %v123_v4 = vld [vmem:[%s8852_s2 + $0x108] sm:$0xff] }
 0x616   :  { %1479 = vmatprep.subr.mxu0 %v9182_v6  ;;  %1550 = vmatprep.subr.mxu1 %v9183_v8  ;;  %v125_v6 = vld [vmem:[%s8852_s2 + $0x118] sm:$0xff]  ;;  %v122_v8 = vld [vmem:[%s8852_s2 + $0x100] sm:$0xff] }
 0x617   :  { %1480 = vmatpush1.msra.mxu0 %v9184_v11  ;;  %1513 = vmatprep.mubr.f32.mxu0 %v9185_v13  ;;  %v124_v11 = vld [vmem:[%s8852_s2 + $0x110] sm:$0xff] }
 0x618   :  { %1551 = vmatpush1.msra.mxu1 %v9186_v21  ;;  %1584 = vmatprep.mubr.f32.mxu1 %v9185_v13  ;;  %v119_v21 = vld [vmem:[%s8852_s2 + $0xe8] sm:$0xff] }
 0x619   :  { %1640 = vmatprep.subr.mxu0 %v151_v14  ;;  %v90_v14 = vld [vmem:[%s8852_s2] sm:$0xff] }
 0x6b8   :  { %v1340_v23 = vpop.f32.mrf.mxu0  ;;  %v1411_v29 = vpop.f32.mrf.mxu1 }
 0x6b9   :  { %v1416_v25 = vadd.f32 %v4478_v22, %v1340_v23  ;;  %v1418_v37 = vadd.f32 %v4480_v34, %v1411_v29  ;;  %v121_v22 = vld [vmem:[%s8852_s2 + $0xf8] sm:$0xff]  ;;  %v118_v23 = vld [vmem:[%s8852_s2 + $0xe0] sm:$0xff]  ;;  %v111_v29 = vld [vmem:[%s8852_s2 + $0xa8] sm:$0xff] }
 0x6ba   :  { %v1342_v26 = vpop.f32.mrf.mxu0  ;;  %v1413_v32 = vpop.f32.mrf.mxu1  ;;  %v109_v34 = vld [vmem:[%s8852_s2 + $0x98] sm:$0xff] }
 0x6bb   :  { %v4482_v27 = vmul.f32 -1.442695, %v1416_v25  ;;  %v1417_v28 = vadd.f32 %v4479_v24, %v1342_v26  ;;  %v1419_v33 = vadd.f32 %v4481_v31, %v1413_v32  ;;  %v120_v24 = vld [vmem:[%s8852_s2 + $0xf0] sm:$0xff]  ;;  %v115_v25 = vld [vmem:[%s8852_s2 + $0xc8] sm:$0xff]  ;;  %v117_v26 = vld [vmem:[%s8852_s2 + $0xd8] sm:$0xff] }
 0x6bc   :  { %v110_v31 = vld [vmem:[%s8852_s2 + $0xa0] sm:$0xff]  ;;  %v112_v32 = vld [vmem:[%s8852_s2 + $0xb0] sm:$0xff] }
 0x6bd   :  { %4638 = vpow2.f32 %v4482_v27  ;;  %v4483_v30 = vmul.f32 -1.442695, %v1417_v28  ;;  %v4484_v35 = vmul.f32 -1.442695, %v1419_v33  ;;  %v114_v27 = vld [vmem:[%s8852_s2 + $0xc0] sm:$0xff]  ;;  %v116_v28 = vld [vmem:[%s8852_s2 + $0xd0] sm:$0xff] }
 0x6be   :  { %v107_v33 = vld [vmem:[%s8852_s2 + $0x88] sm:$0xff] }
 0x6bf   :  { %4640 = vpow2.f32 %v4483_v30  ;;  %v113_v30 = vld [vmem:[%s8852_s2 + $0xb8] sm:$0xff] }
 0x6c0   :  { %4642 = vpow2.f32 %v4484_v35  ;;  %v106_v35 = vld [vmem:[%s8852_s2 + $0x80] sm:$0xff] }
 0x6ca   :  { %v4639_v36 = vpop.eup %4638 }
 0x6cb   :  { %v1423_v38 = vadd.f32 1.0, %v4639_v36  ;;  %v108_v36 = vld [vmem:[%s8852_s2 + $0x90] sm:$0xff] }
 0x6cc   :  { %v4641_v39 = vpop.eup %4640 }
 0x6cd   :  { %4644 = vrcp.f32 %v1423_v38  ;;  %v1429_v40 = vadd.f32 1.0, %v4641_v39  ;;  %v4643_v41 = vpop.eup %4642  ;;  %v105_v38 = vld [vmem:[%s8852_s2 + $0x78] sm:$0xff]  ;;  %v102_v39 = vld [vmem:[%s8852_s2 + $0x60] sm:$0xff] }
 0x6ce   :  { %4646 = vtanh.f32 %v1418_v37  ;;  %v1436_v47 = vadd.f32 1.0, %v4643_v41  ;;  %v103_v37 = vld [vmem:[%s8852_s2 + $0x68] sm:$0xff] }
 0x6cf   :  { %4648 = vrcp.f32 %v1429_v40  ;;  %v104_v40 = vld [vmem:[%s8852_s2 + $0x70] sm:$0xff]  ;;  %v99_v41 = vld [vmem:[%s8852_s2 + $0x48] sm:$0xff] }
 0x6d0   :  { %4650 = vrcp.f32 %v1436_v47  ;;  %v95_v47 = vld [vmem:[%s8852_s2 + $0x28] sm:$0xff] }
 0x6da   :  { %v4645_v42 = vpop.eup %4644 }
 0x6db   :  { %v4647_v43 = vpop.eup %4646 }
 0x6dc   :  { %v4649_v45 = vpop.eup %4648  ;;  %v1440_v7 = vmul.f32 %v4647_v43, %v4645_v42  ;;  %v101_v42 = vld [vmem:[%s8852_s2 + $0x58] sm:$0xff]  ;;  %v98_v43 = vld [vmem:[%s8852_s2 + $0x40] sm:$0xff] }
 0x6dd   :  { %v1439_v18 = vmul.f32 %v4649_v45, %v6359_v49  ;;  %v4651_v57 = vpop.eup %4650  ;;  %v153_v49 = vld [vmem:[%s8852_s2 + $0x1f8] sm:$0xff]  ;;  %v100_v45 = vld [vmem:[%s8852_s2 + $0x50] sm:$0xff] }
 0x6de   :  { %1711 = vmatprep.subr.mxu1 %v153_v49  ;;  %v92_v49 = vld [vmem:[%s8852_s2 + $0x10] sm:$0xff] }
 0x6df   :  { %v6439_v63 = vadd.f32 %v1440_v7, %v1439_v18  ;;  %v97_v7 = vld [vmem:[%s8852_s2 + $0x38] sm:$0xff]  ;;  %v94_v18 = vld [vmem:[%s8852_s2 + $0x20] sm:$0xff] }
 0x6e1   :  { %4652 = vtanh.f32 %v6439_v63 }
 0x6ee   :  { %v4653_v62 = vpop.eup %4652 }
 0x6ef   :  { %v1443_v12 = vmul.f32 %v4653_v62, %v4651_v57  ;;  %v96_v57 = vld [vmem:[%s8852_s2 + $0x30] sm:$0xff]  ;;  %v91_v62 = vld [vmem:[%s8852_s2 + $0x8] sm:$0xff] }
 0x6f1   :  { %1514 = vmatmul.mubr.f32.vlgmr.msra.gmra.mxu0 %v1443_v12  ;;  %1585 = vmatmul.mubr.f32.vlgmr.msra.gmra.mxu1 %v1443_v12  ;;  %v93_v12 = vld [vmem:[%s8852_s2 + $0x18] sm:$0xff] }
 0x6f2   :  { %1704 = vmatprep.mubr.f32.mxu0 %v9185_v13  ;;  %1775 = vmatprep.mubr.f32.mxu1 %v9185_v13 }
 0x6f3   :  { %1641 = vmatpush1.msra.mxu0 %v150_v15  ;;  %1712 = vmatpush1.msra.mxu1 %v152_v10  ;;  %v4485_v15 = vld [vmem:[%s8851_s0 + $0xe0] sm:$0xff] }
 0x6f4   :  { %1642 = vmatprep.subr.mxu0 %v147_v61  ;;  %1713 = vmatprep.subr.mxu1 %v149_v20  ;;  %v4486_v61 = vld [vmem:[%s8851_s0 + $0xe8] sm:$0xff] }
 0x6f5   :  { %1643 = vmatpush1.msra.mxu0 %v146_v19  ;;  %1714 = vmatpush1.msra.mxu1 %v148_v5 }
 0x6f6   :  { %1644 = vmatprep.subr.mxu0 %v143_v2  ;;  %1715 = vmatprep.subr.mxu1 %v145_v17 }
 0x6f7   :  { %1645 = vmatpush1.msra.mxu0 %v142_v46  ;;  %1716 = vmatpush1.msra.mxu1 %v144_v55  ;;  %v4488_v55 = vld [vmem:[%s8851_s0 + $0xf8] sm:$0xff] }
 0x6f8   :  { %1646 = vmatprep.subr.mxu0 %v139_v58  ;;  %1717 = vmatprep.subr.mxu1 %v141_v9 }
 0x6f9   :  { %1647 = vmatpush1.msra.mxu0 %v138_v51  ;;  %1718 = vmatpush1.msra.mxu1 %v140_v44  ;;  %v4487_v51 = vld [vmem:[%s8851_s0 + $0xf0] sm:$0xff] }
 0x6fa   :  { %1648 = vmatprep.subr.mxu0 %v135_v16  ;;  %1719 = vmatprep.subr.mxu1 %v137_v0 }
 0x6fb   :  { %1649 = vmatpush1.msra.mxu0 %v134_v53  ;;  %1720 = vmatpush1.msra.mxu1 %v136_v56 }
 0x6fc   :  { %1650 = vmatprep.subr.mxu0 %v131_v3  ;;  %1721 = vmatprep.subr.mxu1 %v133_v59 }
 0x6fd   :  { %1651 = vmatpush1.msra.mxu0 %v130_v54  ;;  %1722 = vmatpush1.msra.mxu1 %v132_v52 }
 0x6fe   :  { %1652 = vmatprep.subr.mxu0 %v127_v60  ;;  %1723 = vmatprep.subr.mxu1 %v129_v48 }
 0x6ff   :  { %1653 = vmatpush1.msra.mxu0 %v126_v50  ;;  %1724 = vmatpush1.msra.mxu1 %v128_v1 }
 0x700   :  { %1654 = vmatprep.subr.mxu0 %v123_v4  ;;  %1725 = vmatprep.subr.mxu1 %v125_v6 }
 0x701   :  { %1655 = vmatpush1.msra.mxu0 %v122_v8  ;;  %1726 = vmatpush1.msra.mxu1 %v124_v11 }
 0x702   :  { %1656 = vmatprep.subr.mxu0 %v119_v21  ;;  %1727 = vmatprep.subr.mxu1 %v121_v22  ;;  %v6657_v21 = vld [vmem:[%s8853_s4 + $0x1e8] sm:$0xff]  ;;  %v6669_v22 = vld [vmem:[%s8853_s4 + $0x1e0] sm:$0xff] }
 0x703   :  { %1657 = vmatpush1.msra.mxu0 %v118_v23  ;;  %1728 = vmatpush1.msra.mxu1 %v120_v24  ;;  %9187 = vst [vmem:[#allocation4_spill] sm:$0xff] %v6657_v21  ;;  %v6674_v23 = vld [vmem:[%s8853_s4 + $0x1f0] sm:$0xff]  ;;  %v6681_v24 = vld [vmem:[%s8853_s4 + $0x1c8] sm:$0xff] }
 0x704   :  { %1658 = vmatprep.subr.mxu0 %v115_v25  ;;  %1729 = vmatprep.subr.mxu1 %v117_v26  ;;  %v6686_v25 = vld [vmem:[%s8853_s4 + $0x1d8] sm:$0xff]  ;;  %v6693_v26 = vld [vmem:[%s8853_s4 + $0x1c0] sm:$0xff] }
 0x705   :  { %1659 = vmatpush1.msra.mxu0 %v114_v27  ;;  %1730 = vmatpush1.msra.mxu1 %v116_v28  ;;  %v6698_v27 = vld [vmem:[%s8853_s4 + $0x1d0] sm:$0xff]  ;;  %v6705_v28 = vld [vmem:[%s8853_s4 + $0x1a8] sm:$0xff] }
 0x706   :  { %1660 = vmatprep.subr.mxu0 %v111_v29  ;;  %1731 = vmatprep.subr.mxu1 %v113_v30  ;;  %v6710_v29 = vld [vmem:[%s8853_s4 + $0x1b8] sm:$0xff]  ;;  %v6717_v30 = vld [vmem:[%s8853_s4 + $0x1a0] sm:$0xff] }
 0x707   :  { %1661 = vmatpush1.msra.mxu0 %v110_v31  ;;  %1732 = vmatpush1.msra.mxu1 %v112_v32  ;;  %v6722_v31 = vld [vmem:[%s8853_s4 + $0x1b0] sm:$0xff]  ;;  %v6729_v32 = vld [vmem:[%s8853_s4 + $0x188] sm:$0xff] }
 0x708   :  { %1662 = vmatprep.subr.mxu0 %v107_v33  ;;  %1733 = vmatprep.subr.mxu1 %v109_v34  ;;  %v6734_v33 = vld [vmem:[%s8853_s4 + $0x198] sm:$0xff]  ;;  %v6741_v34 = vld [vmem:[%s8853_s4 + $0x180] sm:$0xff] }
 0x709   :  { %1663 = vmatpush1.msra.mxu0 %v106_v35  ;;  %1734 = vmatpush1.msra.mxu1 %v108_v36  ;;  %v6746_v35 = vld [vmem:[%s8853_s4 + $0x190] sm:$0xff]  ;;  %v6753_v36 = vld [vmem:[%s8853_s4 + $0x168] sm:$0xff] }
 0x70a   :  { %1664 = vmatprep.subr.mxu0 %v103_v37  ;;  %1735 = vmatprep.subr.mxu1 %v105_v38  ;;  %v6758_v37 = vld [vmem:[%s8853_s4 + $0x178] sm:$0xff]  ;;  %v6765_v38 = vld [vmem:[%s8853_s4 + $0x160] sm:$0xff] }
 0x70b   :  { %1665 = vmatpush1.msra.mxu0 %v102_v39  ;;  %1736 = vmatpush1.msra.mxu1 %v104_v40  ;;  %v6770_v39 = vld [vmem:[%s8853_s4 + $0x170] sm:$0xff]  ;;  %v6777_v40 = vld [vmem:[%s8853_s4 + $0x148] sm:$0xff] }
 0x70c   :  { %1666 = vmatprep.subr.mxu0 %v99_v41  ;;  %1737 = vmatprep.subr.mxu1 %v101_v42  ;;  %v6782_v41 = vld [vmem:[%s8853_s4 + $0x158] sm:$0xff]  ;;  %v6789_v42 = vld [vmem:[%s8853_s4 + $0x140] sm:$0xff] }
 0x70d   :  { %1667 = vmatpush1.msra.mxu0 %v98_v43  ;;  %1738 = vmatpush1.msra.mxu1 %v100_v45  ;;  %v6794_v43 = vld [vmem:[%s8853_s4 + $0x150] sm:$0xff]  ;;  %v6801_v45 = vld [vmem:[%s8853_s4 + $0x128] sm:$0xff] }
 0x70e   :  { %1668 = vmatprep.subr.mxu0 %v95_v47  ;;  %1739 = vmatprep.subr.mxu1 %v97_v7  ;;  %v6806_v47 = vld [vmem:[%s8853_s4 + $0x138] sm:$0xff]  ;;  %v6813_v7 = vld [vmem:[%s8853_s4 + $0x120] sm:$0xff] }
 0x70f   :  { %1669 = vmatpush1.msra.mxu0 %v94_v18  ;;  %1740 = vmatpush1.msra.mxu1 %v96_v57  ;;  %v6818_v18 = vld [vmem:[%s8853_s4 + $0x130] sm:$0xff]  ;;  %v6825_v57 = vld [vmem:[%s8853_s4 + $0x108] sm:$0xff] }
 0x710   :  { %1670 = vmatprep.subr.mxu0 %v91_v62  ;;  %1741 = vmatprep.subr.mxu1 %v93_v12  ;;  %v6830_v62 = vld [vmem:[%s8853_s4 + $0x118] sm:$0xff]  ;;  %v6835_v12 = vld [vmem:[%s8853_s4 + $0x100] sm:$0xff] }
 0x711   :  { %1671 = vmatpush1.msra.mxu0 %v90_v14  ;;  %1742 = vmatpush1.msra.mxu1 %v92_v49  ;;  %v6842_v14 = vld [vmem:[%s8853_s4 + $0x110] sm:$0xff]  ;;  %v6847_v49 = vld [vmem:[%s8853_s4 + $0xe8] sm:$0xff] }
 0x712   :  { %1828 = vmatprep.subr.mxu0 %v6657_v21 }
 0x7b1   :  { %v1515_v10 = vpop.f32.mrf.mxu0  ;;  %v1586_v17 = vpop.f32.mrf.mxu1 }
 0x7b2   :  { %v1591_v20 = vadd.f32 %v4485_v15, %v1515_v10  ;;  %v1593_v0 = vadd.f32 %v4487_v51, %v1586_v17  ;;  %v6852_v15 = vld [vmem:[%s8853_s4 + $0xf8] sm:$0xff]  ;;  %v6859_v10 = vld [vmem:[%s8853_s4 + $0xe0] sm:$0xff]  ;;  %v6893_v17 = vld [vmem:[%s8853_s4 + $0xa8] sm:$0xff] }
 0x7b3   :  { %v1517_v19 = vpop.f32.mrf.mxu0  ;;  %v1588_v58 = vpop.f32.mrf.mxu1  ;;  %v6922_v51 = vld [vmem:[%s8853_s4 + $0x98] sm:$0xff] }
 0x7b4   :  { %v4489_v5 = vmul.f32 -1.442695, %v1591_v20  ;;  %v1592_v2 = vadd.f32 %v4486_v61, %v1517_v19  ;;  %v1594_v9 = vadd.f32 %v4488_v55, %v1588_v58  ;;  %v6864_v61 = vld [vmem:[%s8853_s4 + $0xf0] sm:$0xff]  ;;  %v6869_v20 = vld [vmem:[%s8853_s4 + $0xc8] sm:$0xff]  ;;  %v6876_v19 = vld [vmem:[%s8853_s4 + $0xd8] sm:$0xff]  ;;  %9189 = vst [vmem:[#allocation16_spill] sm:$0xff] %v6922_v51 }
 0x7b5   :  { %v6905_v55 = vld [vmem:[%s8853_s4 + $0xa0] sm:$0xff]  ;;  %v6910_v58 = vld [vmem:[%s8853_s4 + $0xb0] sm:$0xff] }
 0x7b6   :  { %4654 = vpow2.f32 %v4489_v5  ;;  %v4490_v46 = vmul.f32 -1.442695, %v1592_v2  ;;  %v4491_v44 = vmul.f32 -1.442695, %v1594_v9  ;;  %v6881_v5 = vld [vmem:[%s8853_s4 + $0xc0] sm:$0xff]  ;;  %v6886_v2 = vld [vmem:[%s8853_s4 + $0xd0] sm:$0xff] }
 0x7b7   :  { %v6917_v9 = vld [vmem:[%s8853_s4 + $0x88] sm:$0xff] }
 0x7b8   :  { %4656 = vpow2.f32 %v4490_v46  ;;  %v6898_v46 = vld [vmem:[%s8853_s4 + $0xb8] sm:$0xff] }
 0x7b9   :  { %4658 = vpow2.f32 %v4491_v44  ;;  %v6929_v44 = vld [vmem:[%s8853_s4 + $0x80] sm:$0xff] }
 0x7ba   :  { %9190 = vst [vmem:[#allocation3_spill] sm:$0xff] %v6929_v44 }
 0x7c3   :  { %v4655_v16 = vpop.eup %4654 }
 0x7c4   :  { %v1598_v53 = vadd.f32 1.0, %v4655_v16  ;;  %v6934_v16 = vld [vmem:[%s8853_s4 + $0x90] sm:$0xff] }
 0x7c5   :  { %v4657_v56 = vpop.eup %4656  ;;  %9191 = vst [vmem:[#allocation8_spill] sm:$0xff] %v6934_v16 }
 0x7c6   :  { %4660 = vrcp.f32 %v1598_v53  ;;  %v1604_v3 = vadd.f32 1.0, %v4657_v56  ;;  %v4659_v59 = vpop.eup %4658  ;;  %v6946_v53 = vld [vmem:[%s8853_s4 + $0x78] sm:$0xff]  ;;  %v6953_v56 = vld [vmem:[%s8853_s4 + $0x60] sm:$0xff] }
 0x7c7   :  { %4662 = vtanh.f32 %v1593_v0  ;;  %v1611_v48 = vadd.f32 1.0, %v4659_v59  ;;  %v6941_v0 = vld [vmem:[%s8853_s4 + $0x68] sm:$0xff]  ;;  %9193 = vst [vmem:[#allocation17_spill] sm:$0xff] %v6946_v53  ;;  %9194 = vst [vmem:[#allocation12_spill] sm:$0xff] %v6953_v56 }
 0x7c8   :  { %4664 = vrcp.f32 %v1604_v3  ;;  %9192 = vst [vmem:[#allocation5_spill] sm:$0xff] %v6941_v0  ;;  %v6958_v3 = vld [vmem:[%s8853_s4 + $0x70] sm:$0xff]  ;;  %v6965_v59 = vld [vmem:[%s8853_s4 + $0x48] sm:$0xff] }
 0x7c9   :  { %4666 = vrcp.f32 %v1611_v48  ;;  %9195 = vst [vmem:[#allocation9_spill] sm:$0xff] %v6958_v3  ;;  %9196 = vst [vmem:[#allocation6_spill] sm:$0xff] %v6965_v59  ;;  %v6989_v48 = vld [vmem:[%s8853_s4 + $0x28] sm:$0xff] }
 0x7ca   :  { %9200 = vst [vmem:[#allocation7_spill] sm:$0xff] %v6989_v48 }
 0x7d3   :  { %v4661_v54 = vpop.eup %4660 }
 0x7d4   :  { %v4663_v52 = vpop.eup %4662 }
 0x7d5   :  { %v4665_v60 = vpop.eup %4664  ;;  %v1615_v50 = vmul.f32 %v4663_v52, %v4661_v54  ;;  %v6970_v54 = vld [vmem:[%s8853_s4 + $0x58] sm:$0xff]  ;;  %v6977_v52 = vld [vmem:[%s8853_s4 + $0x40] sm:$0xff] }
 0x7d6   :  { %v1614_v1 = vmul.f32 %v4665_v60, %v6439_v63  ;;  %v4667_v6 = vpop.eup %4666  ;;  %v6662_v63 = vld [vmem:[%s8853_s4 + $0x1f8] sm:$0xff]  ;;  %9197 = vst [vmem:[#allocation18_spill] sm:$0xff] %v6970_v54  ;;  %9198 = vst [vmem:[#allocation14_spill] sm:$0xff] %v6977_v52  ;;  %v6982_v60 = vld [vmem:[%s8853_s4 + $0x50] sm:$0xff] }
 0x7d7   :  { %9188 = vst [vmem:[#allocation10_spill] sm:$0xff] %v6662_v63  ;;  %1899 = vmatprep.subr.mxu1 %v6662_v63  ;;  %9199 = vst [vmem:[#allocation11_spill] sm:$0xff] %v6982_v60 }
 0x7d8   :  { %v6649_v4 = vadd.f32 %v1615_v50, %v1614_v1  ;;  %v6994_v50 = vld [vmem:[%s8853_s4 + $0x38] sm:$0xff]  ;;  %v7001_v1 = vld [vmem:[%s8853_s4 + $0x20] sm:$0xff] }
 0x7d9   :  { %9201 = vst [vmem:[#allocation19_spill] sm:$0xff] %v6994_v50  ;;  %9202 = vst [vmem:[#allocation13_spill] sm:$0xff] %v7001_v1 }
 0x7da   :  { %4668 = vtanh.f32 %v6649_v4 }
 0x7e7   :  { %v4669_v8 = vpop.eup %4668 }
 0x7e8   :  { %v1618_v11 = vmul.f32 %v4669_v8, %v4667_v6  ;;  %v7006_v6 = vld [vmem:[%s8853_s4 + $0x30] sm:$0xff]  ;;  %v7013_v8 = vld [vmem:[%s8853_s4 + $0x8] sm:$0xff] }
 0x7e9   :  { %9203 = vst [vmem:[#allocation20_spill] sm:$0xff] %v7006_v6  ;;  %9204 = vst [vmem:[#allocation15_spill] sm:$0xff] %v7013_v8 }
 0x7ea   :  { %1705 = vmatmul.mubr.f32.vlgmr.msra.gmra.mxu0 %v1618_v11  ;;  %1776 = vmatmul.mubr.f32.vlgmr.msra.gmra.mxu1 %v1618_v11  ;;  %v7018_v11 = vld [vmem:[%s8853_s4 + $0x18] sm:$0xff] }
 0x7eb   :  { %1892 = vmatprep.mubr.f32.mxu0 %v9185_v13  ;;  %1963 = vmatprep.mubr.f32.mxu1 %v9185_v13  ;;  %9205 = vst [vmem:[#allocation21_spill] sm:$0xff] %v7018_v11  ;;  %v7025_v13 = vld [vmem:[%s8853_s4] sm:$0xff] }
 0x7ec   :  { %1829 = vmatpush1.msra.mxu0 %v6669_v22  ;;  %1900 = vmatpush1.msra.mxu1 %v6674_v23  ;;  %9206 = vst [vmem:[#allocation22_spill] sm:$0xff] %v7025_v13 }
 0x7ed   :  { %1830 = vmatprep.subr.mxu0 %v6681_v24  ;;  %1901 = vmatprep.subr.mxu1 %v6686_v25 }
 0x7ee   :  { %1831 = vmatpush1.msra.mxu0 %v6693_v26  ;;  %1902 = vmatpush1.msra.mxu1 %v6698_v27 }
 0x7ef   :  { %1832 = vmatprep.subr.mxu0 %v6705_v28  ;;  %1903 = vmatprep.subr.mxu1 %v6710_v29 }
 0x7f0   :  { %1833 = vmatpush1.msra.mxu0 %v6717_v30  ;;  %1904 = vmatpush1.msra.mxu1 %v6722_v31 }
 0x7f1   :  { %1834 = vmatprep.subr.mxu0 %v6729_v32  ;;  %1905 = vmatprep.subr.mxu1 %v6734_v33 }
 0x7f2   :  { %1835 = vmatpush1.msra.mxu0 %v6741_v34  ;;  %1906 = vmatpush1.msra.mxu1 %v6746_v35 }
 0x7f3   :  { %1836 = vmatprep.subr.mxu0 %v6753_v36  ;;  %1907 = vmatprep.subr.mxu1 %v6758_v37 }
 0x7f4   :  { %1837 = vmatpush1.msra.mxu0 %v6765_v38  ;;  %1908 = vmatpush1.msra.mxu1 %v6770_v39 }
 0x7f5   :  { %1838 = vmatprep.subr.mxu0 %v6777_v40  ;;  %1909 = vmatprep.subr.mxu1 %v6782_v41 }
 0x7f6   :  { %1839 = vmatpush1.msra.mxu0 %v6789_v42  ;;  %1910 = vmatpush1.msra.mxu1 %v6794_v43 }
 0x7f7   :  { %1840 = vmatprep.subr.mxu0 %v6801_v45  ;;  %1911 = vmatprep.subr.mxu1 %v6806_v47 }
 0x7f8   :  { %1841 = vmatpush1.msra.mxu0 %v6813_v7  ;;  %1912 = vmatpush1.msra.mxu1 %v6818_v18 }
 0x7f9   :  { %1842 = vmatprep.subr.mxu0 %v6825_v57  ;;  %1913 = vmatprep.subr.mxu1 %v6830_v62 }
 0x7fa   :  { %1843 = vmatpush1.msra.mxu0 %v6835_v12  ;;  %1914 = vmatpush1.msra.mxu1 %v6842_v14 }
 0x7fb   :  { %1844 = vmatprep.subr.mxu0 %v6847_v49  ;;  %1915 = vmatprep.subr.mxu1 %v6852_v15 }
 0x7fc   :  { %1845 = vmatpush1.msra.mxu0 %v6859_v10  ;;  %1916 = vmatpush1.msra.mxu1 %v6864_v61 }
 0x7fd   :  { %1846 = vmatprep.subr.mxu0 %v6869_v20  ;;  %1917 = vmatprep.subr.mxu1 %v6876_v19 }
 0x7fe   :  { %1847 = vmatpush1.msra.mxu0 %v6881_v5  ;;  %1918 = vmatpush1.msra.mxu1 %v6886_v2 }
 0x7ff   :  { %1848 = vmatprep.subr.mxu0 %v6893_v17  ;;  %1919 = vmatprep.subr.mxu1 %v6898_v46 }
 0x800   :  { %1849 = vmatpush1.msra.mxu0 %v6905_v55  ;;  %1920 = vmatpush1.msra.mxu1 %v6910_v58 }
 0x801   :  { %1850 = vmatprep.subr.mxu0 %v6917_v9  ;;  %1921 = vmatprep.subr.mxu1 %v6922_v51 }
 0x802   :  { %1851 = vmatpush1.msra.mxu0 %v6929_v44  ;;  %1922 = vmatpush1.msra.mxu1 %v6934_v16 }
 0x803   :  { %1852 = vmatprep.subr.mxu0 %v6941_v0  ;;  %1923 = vmatprep.subr.mxu1 %v6946_v53 }
 0x804   :  { %1853 = vmatpush1.msra.mxu0 %v6953_v56  ;;  %1924 = vmatpush1.msra.mxu1 %v6958_v3 }
 0x805   :  { %1854 = vmatprep.subr.mxu0 %v6965_v59  ;;  %1925 = vmatprep.subr.mxu1 %v6970_v54 }
 0x806   :  { %1855 = vmatpush1.msra.mxu0 %v6977_v52  ;;  %1926 = vmatpush1.msra.mxu1 %v6982_v60  ;;  %v7030_v60 = vld [vmem:[%s8853_s4 + $0x10] sm:$0xff] }
 0x807   :  { %1856 = vmatprep.subr.mxu0 %v6989_v48  ;;  %1927 = vmatprep.subr.mxu1 %v6994_v50  ;;  %9207 = vst [vmem:[#allocation23_spill] sm:$0xff] %v7030_v60  ;;  %v1620_v50 = vlaneseq }
 0x808   :  { %1857 = vmatpush1.msra.mxu0 %v7001_v1  ;;  %1928 = vmatpush1.msra.mxu1 %v7006_v6  ;;  %v154_v6 = vld [vmem:[%s8854_s3] sm:$0xf] }
 0x809   :  { %1858 = vmatprep.subr.mxu0 %v7013_v8  ;;  %1929 = vmatprep.subr.mxu1 %v7018_v11  ;;  %v7040_v48 = vshrl.u32 %v1620_v50, 7 }
 0x80a   :  { %1859 = vmatpush1.msra.mxu0 %v7025_v13  ;;  %1930 = vmatpush1.msra.mxu1 %v7030_v60 }
 0x80b   :  { %1996 = vmatprep.subr.mxu0 %v6657_v21  ;;  %2067 = vmatprep.subr.mxu1 %v6662_v63  ;;  %v8957_v52 = vsub.s32 0, %v7040_v48  ;;  %v8960_v8 = vsub.s32 1, %v7040_v48  ;;  %v8961_v54 = vsub.s32 3, %v7040_v48 }
 0x80d   :  { %v1623_v13 = vrot.slane %v154_v6, %v8957_v52  ;;  %v1627_v60 = vrot.slane %v154_v6, %v8960_v8  ;;  %v1635_v56 = vrot.slane %v154_v6, %v8961_v54  ;;  %v8968_v52 = vsub.s32 2, %v7040_v48 }
 0x80f   :  { %v1631_v8 = vrot.slane %v154_v6, %v8968_v52  ;;  %v7064_v6 = vld [vmem:[%s8855_s6] ss:$0 sm:$0xff]  ;;  %v9225_v52 = vld [vmem:[#allocation22_spill] sm:$0xff] }
 0x8aa   :  { %v1706_v21 = vpop.f32.mrf.mxu0  ;;  %v1777_v59 = vpop.f32.mrf.mxu1 }
 0x8ab   :  { %v1707_v11 = vadd.f32 %v1706_v21, %v1623_v13 }
 0x8ac   :  { %v1708_v63 = vpop.f32.mrf.mxu0  ;;  %v1779_v53 = vpop.f32.mrf.mxu1 }
 0x8ad   :  { %v4492_v1 = vmul.f32 -1.442695, %v1707_v11  ;;  %v1709_v50 = vadd.f32 %v1708_v63, %v1627_v60  ;;  %v1780_v0 = vadd.f32 %v1779_v53, %v1635_v56  ;;  %v1778_v11 = vadd.f32 %v1777_v59, %v1631_v8 }
 0x8af   :  { %4670 = vpow2.f32 %v4492_v1  ;;  %v4493_v3 = vmul.f32 -1.442695, %v1709_v50  ;;  %v4494_v13 = vmul.f32 -1.442695, %v1780_v0 }
 0x8b1   :  { %4672 = vpow2.f32 %v4493_v3 }
 0x8b2   :  { %4674 = vpow2.f32 %v4494_v13 }
 0x8bc   :  { %v4671_v21 = vpop.eup %4670 }
 0x8bd   :  { %v1785_v63 = vadd.f32 1.0, %v4671_v21  ;;  %v9213_v21 = vld [vmem:[#allocation12_spill] sm:$0xff] }
 0x8be   :  { %v4673_v60 = vpop.eup %4672 }
 0x8bf   :  { %4676 = vrcp.f32 %v1785_v63  ;;  %v1791_v1 = vadd.f32 1.0, %v4673_v60  ;;  %v4675_v3 = vpop.eup %4674  ;;  %v9215_v63 = vld [vmem:[#allocation6_spill] sm:$0xff] }
 0x8c0   :  { %4678 = vtanh.f32 %v1778_v11  ;;  %v1798_v44 = vadd.f32 1.0, %v4675_v3  ;;  %v9214_v11 = vld [vmem:[#allocation9_spill] sm:$0xff]  ;;  %v9216_v60 = vld [vmem:[#allocation18_spill] sm:$0xff]  ;;  %v9218_v3 = vld [vmem:[#allocation11_spill] sm:$0xff] }
 0x8c1   :  { %4680 = vrcp.f32 %v1791_v1  ;;  %v9217_v1 = vld [vmem:[#allocation14_spill] sm:$0xff] }
 0x8c2   :  { %4682 = vrcp.f32 %v1798_v44  ;;  %v9210_v44 = vld [vmem:[#allocation8_spill] sm:$0xff] }
 0x8cc   :  { %v4677_v50 = vpop.eup %4676 }
 0x8cd   :  { %v4679_v54 = vpop.eup %4678 }
 0x8ce   :  { %v4681_v16 = vpop.eup %4680  ;;  %v1802_v51 = vmul.f32 %v4679_v54, %v4677_v50  ;;  %v9212_v54 = vld [vmem:[#allocation17_spill] sm:$0xff]  ;;  %v9219_v50 = vld [vmem:[#allocation7_spill] sm:$0xff] }
 0x8cf   :  { %v1801_v53 = vmul.f32 %v4681_v16, %v6649_v4  ;;  %v4683_v0 = vpop.eup %4682  ;;  %v9208_v4 = vld [vmem:[#allocation16_spill] sm:$0xff]  ;;  %v9211_v16 = vld [vmem:[#allocation5_spill] sm:$0xff] }
 0x8d1   :  { %v7058_v56 = vadd.f32 %v1802_v51, %v1801_v53  ;;  %v9209_v51 = vld [vmem:[#allocation3_spill] sm:$0xff] }
 0x8d2   :  { %v9220_v53 = vld [vmem:[#allocation19_spill] sm:$0xff] }
 0x8d3   :  { %4684 = vtanh.f32 %v7058_v56 }
 0x8e0   :  { %v4685_v59 = vpop.eup %4684 }
 0x8e1   :  { %v1805_v8 = vmul.f32 %v4685_v59, %v4683_v0  ;;  %v9221_v0 = vld [vmem:[#allocation13_spill] sm:$0xff]  ;;  %v9222_v59 = vld [vmem:[#allocation20_spill] sm:$0xff] }
 0x8e3   :  { %1893 = vmatmul.mubr.f32.vlgmr.msra.gmra.mxu0 %v1805_v8  ;;  %1964 = vmatmul.mubr.f32.vlgmr.msra.gmra.mxu1 %v1805_v8  ;;  %v4371_v13 = vmul.f32 %v7064_v6, %v1805_v8  ;;  %v9223_v8 = vld [vmem:[#allocation15_spill] sm:$0xff] }
 0x8e4   :  { %1997 = vmatpush1.msra.mxu0 %v6669_v22  ;;  %2068 = vmatpush1.msra.mxu1 %v6674_v23 }
 0x8e5   :  { %4387 = vadd.xlane.f32.xlu0 %v4371_v13  ;;  %1998 = vmatprep.subr.mxu0 %v6681_v24  ;;  %v9224_v13 = vld [vmem:[#allocation21_spill] sm:$0xff] }
 0x8e6   :  { %2069 = vmatprep.subr.mxu1 %v6686_v25  ;;  %1999 = vmatpush1.msra.mxu0 %v6693_v26 }
 0x8e7   :  { %2070 = vmatpush1.msra.mxu1 %v6698_v27  ;;  %2000 = vmatprep.subr.mxu0 %v6705_v28 }
 0x8e8   :  { %2071 = vmatprep.subr.mxu1 %v6710_v29  ;;  %2001 = vmatpush1.msra.mxu0 %v6717_v30 }
 0x8e9   :  { %2072 = vmatpush1.msra.mxu1 %v6722_v31  ;;  %2002 = vmatprep.subr.mxu0 %v6729_v32 }
 0x8ea   :  { %2073 = vmatprep.subr.mxu1 %v6734_v33  ;;  %2003 = vmatpush1.msra.mxu0 %v6741_v34 }
 0x8eb   :  { %2074 = vmatpush1.msra.mxu1 %v6746_v35  ;;  %2004 = vmatprep.subr.mxu0 %v6753_v36 }
 0x8ec   :  { %2075 = vmatprep.subr.mxu1 %v6758_v37  ;;  %2005 = vmatpush1.msra.mxu0 %v6765_v38 }
 0x8ed   :  { %2076 = vmatpush1.msra.mxu1 %v6770_v39  ;;  %2006 = vmatprep.subr.mxu0 %v6777_v40 }
 0x8ee   :  { %2077 = vmatprep.subr.mxu1 %v6782_v41  ;;  %2007 = vmatpush1.msra.mxu0 %v6789_v42 }
 0x8ef   :  { %2078 = vmatpush1.msra.mxu1 %v6794_v43  ;;  %2008 = vmatprep.subr.mxu0 %v6801_v45 }
 0x8f0   :  { %2079 = vmatprep.subr.mxu1 %v6806_v47  ;;  %2009 = vmatpush1.msra.mxu0 %v6813_v7 }
 0x8f1   :  { %2080 = vmatpush1.msra.mxu1 %v6818_v18  ;;  %2010 = vmatprep.subr.mxu0 %v6825_v57 }
 0x8f2   :  { %2081 = vmatprep.subr.mxu1 %v6830_v62  ;;  %2011 = vmatpush1.msra.mxu0 %v6835_v12 }
 0x8f3   :  { %2082 = vmatpush1.msra.mxu1 %v6842_v14  ;;  %2012 = vmatprep.subr.mxu0 %v6847_v49 }
 0x8f4   :  { %2083 = vmatprep.subr.mxu1 %v6852_v15  ;;  %2013 = vmatpush1.msra.mxu0 %v6859_v10 }
 0x8f5   :  { %2084 = vmatpush1.msra.mxu1 %v6864_v61  ;;  %2014 = vmatprep.subr.mxu0 %v6869_v20 }
 0x8f6   :  { %2085 = vmatprep.subr.mxu1 %v6876_v19  ;;  %2015 = vmatpush1.msra.mxu0 %v6881_v5 }
 0x8f7   :  { %2086 = vmatpush1.msra.mxu1 %v6886_v2  ;;  %2016 = vmatprep.subr.mxu0 %v6893_v17 }
 0x8f8   :  { %2087 = vmatprep.subr.mxu1 %v6898_v46  ;;  %2017 = vmatpush1.msra.mxu0 %v6905_v55 }
 0x8f9   :  { %2088 = vmatpush1.msra.mxu1 %v6910_v58  ;;  %2018 = vmatprep.subr.mxu0 %v6917_v9 }
 0x8fa   :  { %2089 = vmatprep.subr.mxu1 %v9208_v4  ;;  %2019 = vmatpush1.msra.mxu0 %v9209_v51 }
 0x8fb   :  { %2090 = vmatpush1.msra.mxu1 %v9210_v44  ;;  %2020 = vmatprep.subr.mxu0 %v9211_v16 }
 0x8fc   :  { %2091 = vmatprep.subr.mxu1 %v9212_v54  ;;  %2021 = vmatpush1.msra.mxu0 %v9213_v21  ;;  %v9234_v21 = vsub.s32 3, %v7040_v48 }
 0x8fd   :  { %2092 = vmatpush1.msra.mxu1 %v9214_v11  ;;  %2022 = vmatprep.subr.mxu0 %v9215_v63  ;;  %v9226_v63 = vmov 0.0  }
 0x8fe   :  { %2093 = vmatprep.subr.mxu1 %v9216_v60  ;;  %2023 = vmatpush1.msra.mxu0 %v9217_v1  ;;  %v9227_v60 = vld [vmem:[#allocation23_spill] sm:$0xff] }
 0x8ff   :  { %2094 = vmatpush1.msra.mxu1 %v9218_v3  ;;  %2024 = vmatprep.subr.mxu0 %v9219_v50  ;;  %v9228_v3 = vld [vmem:[#allocation4_spill] sm:$0xff]  ;;  %v9229_v50 = vld [vmem:[#allocation10_spill] sm:$0xff] }
 0x900   :  { %2095 = vmatprep.subr.mxu1 %v9220_v53  ;;  %2025 = vmatpush1.msra.mxu0 %v9221_v0 }
 0x901   :  { %2096 = vmatpush1.msra.mxu1 %v9222_v59  ;;  %2026 = vmatprep.subr.mxu0 %v9223_v8 }
 0x902   :  { %2097 = vmatprep.subr.mxu1 %v9224_v13  ;;  %2027 = vmatpush1.msra.mxu0 %v9225_v52  ;;  %v219_v52 = vld [vmem:[%s8857_s5] sm:$0xf]  ;;  %v9230_v13 = vsub.s32 0, %v7040_v48 }
 0x903   :  { %2060 = vmatprep.mubr.f32.mxu0 %v9226_v63  ;;  %2098 = vmatpush1.msra.mxu1 %v9227_v60  ;;  %v7152_v54 = vrot.slane %v219_v52, %v9234_v21 }
 0x904   :  { %2131 = vmatprep.mubr.f32.mxu1 %v9226_v63  ;;  %2164 = vmatprep.subr.mxu0 %v9228_v3  ;;  %v7142_v60 = vrot.slane %v219_v52, %v9230_v13  ;;  %v9232_v63 = vsub.s32 1, %v7040_v48 }
 0x905   :  { %2235 = vmatprep.subr.mxu1 %v9229_v50  ;;  %9235 = vst [vmem:[#allocation25_spill] sm:$0xff] %v7152_v54 }
 0x906   :  { %9231 = vst [vmem:[#allocation16_spill] sm:$0xff] %v7142_v60  ;;  %v7146_v3 = vrot.slane %v219_v52, %v9232_v63  ;;  %v9236_v63 = vsub.s32 2, %v7040_v48 }
 0x908   :  { %9233 = vst [vmem:[#allocation24_spill] sm:$0xff] %v7146_v3  ;;  %v7157_v44 = vrot.slane %v219_v52, %v9236_v63 }
 0x96e   :  { %v4388_v0 = vpop.xlane.xlu0 %4387 }
 0x96f   :  { %4420 = vst.msk [vmem:[%s8856_s7] sm:$0xff] %vm4419_vm0, %v4388_v0 }
 0x9a3   :  { %v1894_v50 = vpop.f32.mrf.mxu0  ;;  %v1965_v0 = vpop.f32.mrf.mxu1 }
 0x9a4   :  { %v1895_v8 = vadd.f32 %v1894_v50, %v7142_v60 }
 0x9a5   :  { %v1896_v59 = vpop.f32.mrf.mxu0  ;;  %v1967_v13 = vpop.f32.mrf.mxu1 }
 0x9a6   :  { %v4495_v53 = vmul.f32 -1.442695, %v1895_v8  ;;  %v1897_v1 = vadd.f32 %v1896_v59, %v7146_v3  ;;  %v1968_v16 = vadd.f32 %v1967_v13, %v7152_v54  ;;  %v1966_v8 = vadd.f32 %v1965_v0, %v7157_v44 }
 0x9a8   :  { %4686 = vpow2.f32 %v4495_v53  ;;  %v4496_v11 = vmul.f32 -1.442695, %v1897_v1  ;;  %v4497_v50 = vmul.f32 -1.442695, %v1968_v16 }
 0x9aa   :  { %4688 = vpow2.f32 %v4496_v11 }
 0x9ab   :  { %4690 = vpow2.f32 %v4497_v50  ;;  %v9241_v50 = vld [vmem:[#allocation12_spill] sm:$0xff] }
 0x9b5   :  { %v4687_v60 = vpop.eup %4686 }
 0x9b6   :  { %v1973_v59 = vadd.f32 1.0, %v4687_v60 }
 0x9b7   :  { %v4689_v53 = vpop.eup %4688 }
 0x9b8   :  { %4692 = vrcp.f32 %v1973_v59  ;;  %v1979_v11 = vadd.f32 1.0, %v4689_v53  ;;  %v4691_v21 = vpop.eup %4690  ;;  %v9243_v59 = vld [vmem:[#allocation6_spill] sm:$0xff] }
 0x9b9   :  { %4694 = vtanh.f32 %v1966_v8  ;;  %v1986_v13 = vadd.f32 1.0, %v4691_v21  ;;  %v9242_v8 = vld [vmem:[#allocation9_spill] sm:$0xff]  ;;  %v9244_v53 = vld [vmem:[#allocation18_spill] sm:$0xff]  ;;  %v9246_v21 = vld [vmem:[#allocation11_spill] sm:$0xff] }
 0x9ba   :  { %4696 = vrcp.f32 %v1979_v11  ;;  %v9245_v11 = vld [vmem:[#allocation14_spill] sm:$0xff] }
 0x9bb   :  { %4698 = vrcp.f32 %v1986_v13  ;;  %v9248_v13 = vld [vmem:[#allocation19_spill] sm:$0xff] }
 0x9c5   :  { %v4693_v1 = vpop.eup %4692 }
 0x9c6   :  { %v4695_v3 = vpop.eup %4694 }
 0x9c7   :  { %v4697_v51 = vpop.eup %4696  ;;  %v1990_v54 = vmul.f32 %v4695_v3, %v4693_v1  ;;  %v9240_v3 = vld [vmem:[#allocation17_spill] sm:$0xff]  ;;  %v9247_v1 = vld [vmem:[#allocation7_spill] sm:$0xff] }
 0x9c8   :  { %v1989_v52 = vmul.f32 %v4697_v51, %v7058_v56  ;;  %v4699_v16 = vpop.eup %4698  ;;  %v9237_v56 = vld [vmem:[#allocation3_spill] sm:$0xff]  ;;  %v9238_v51 = vld [vmem:[#allocation8_spill] sm:$0xff] }
 0x9ca   :  { %v7161_v48 = vadd.f32 %v1990_v54, %v1989_v52  ;;  %v9239_v54 = vld [vmem:[#allocation5_spill] sm:$0xff] }
 0x9cb   :  { %v9249_v52 = vld [vmem:[#allocation13_spill] sm:$0xff] }
 0x9cc   :  { %4700 = vtanh.f32 %v7161_v48 }
 0x9d9   :  { %v4701_v60 = vpop.eup %4700 }
 0x9da   :  { %v1993_v0 = vmul.f32 %v4701_v60, %v4699_v16  ;;  %v9250_v16 = vld [vmem:[#allocation20_spill] sm:$0xff]  ;;  %v9251_v60 = vld [vmem:[#allocation15_spill] sm:$0xff] }
 0x9dc   :  { %2061 = vmatmul.mubr.f32.vlgmr.msra.gmra.mxu0 %v1993_v0  ;;  %2132 = vmatmul.mubr.f32.vlgmr.msra.gmra.mxu1 %v1993_v0  ;;  %v4372_v63 = vmul.f32 %v7064_v6, %v1993_v0  ;;  %v9252_v0 = vld [vmem:[#allocation21_spill] sm:$0xff] }
 0x9dd   :  { %2165 = vmatpush1.msra.mxu0 %v6669_v22  ;;  %2236 = vmatpush1.msra.mxu1 %v6674_v23 }
 0x9de   :  { %4389 = vadd.xlane.f32.xlu0 %v4372_v63  ;;  %2166 = vmatprep.subr.mxu0 %v6681_v24  ;;  %v9253_v63 = vld [vmem:[#allocation22_spill] sm:$0xff] }
 0x9df   :  { %2237 = vmatprep.subr.mxu1 %v6686_v25  ;;  %2167 = vmatpush1.msra.mxu0 %v6693_v26 }
 0x9e0   :  { %2238 = vmatpush1.msra.mxu1 %v6698_v27  ;;  %2168 = vmatprep.subr.mxu0 %v6705_v28 }
 0x9e1   :  { %2239 = vmatprep.subr.mxu1 %v6710_v29  ;;  %2169 = vmatpush1.msra.mxu0 %v6717_v30 }
 0x9e2   :  { %2240 = vmatpush1.msra.mxu1 %v6722_v31  ;;  %2170 = vmatprep.subr.mxu0 %v6729_v32 }
 0x9e3   :  { %2241 = vmatprep.subr.mxu1 %v6734_v33  ;;  %2171 = vmatpush1.msra.mxu0 %v6741_v34 }
 0x9e4   :  { %2242 = vmatpush1.msra.mxu1 %v6746_v35  ;;  %2172 = vmatprep.subr.mxu0 %v6753_v36 }
 0x9e5   :  { %2243 = vmatprep.subr.mxu1 %v6758_v37  ;;  %2173 = vmatpush1.msra.mxu0 %v6765_v38 }
 0x9e6   :  { %2244 = vmatpush1.msra.mxu1 %v6770_v39  ;;  %2174 = vmatprep.subr.mxu0 %v6777_v40 }
 0x9e7   :  { %2245 = vmatprep.subr.mxu1 %v6782_v41  ;;  %2175 = vmatpush1.msra.mxu0 %v6789_v42 }
 0x9e8   :  { %2246 = vmatpush1.msra.mxu1 %v6794_v43  ;;  %2176 = vmatprep.subr.mxu0 %v6801_v45 }
 0x9e9   :  { %2247 = vmatprep.subr.mxu1 %v6806_v47  ;;  %2177 = vmatpush1.msra.mxu0 %v6813_v7 }
 0x9ea   :  { %2248 = vmatpush1.msra.mxu1 %v6818_v18  ;;  %2178 = vmatprep.subr.mxu0 %v6825_v57 }
 0x9eb   :  { %2249 = vmatprep.subr.mxu1 %v6830_v62  ;;  %2179 = vmatpush1.msra.mxu0 %v6835_v12 }
 0x9ec   :  { %2250 = vmatpush1.msra.mxu1 %v6842_v14  ;;  %2180 = vmatprep.subr.mxu0 %v6847_v49 }
 0x9ed   :  { %2251 = vmatprep.subr.mxu1 %v6852_v15  ;;  %2181 = vmatpush1.msra.mxu0 %v6859_v10 }
 0x9ee   :  { %2252 = vmatpush1.msra.mxu1 %v6864_v61  ;;  %2182 = vmatprep.subr.mxu0 %v6869_v20 }
 0x9ef   :  { %2253 = vmatprep.subr.mxu1 %v6876_v19  ;;  %2183 = vmatpush1.msra.mxu0 %v6881_v5 }
 0x9f0   :  { %2254 = vmatpush1.msra.mxu1 %v6886_v2  ;;  %2184 = vmatprep.subr.mxu0 %v6893_v17 }
 0x9f1   :  { %2255 = vmatprep.subr.mxu1 %v6898_v46  ;;  %2185 = vmatpush1.msra.mxu0 %v6905_v55 }
 0x9f2   :  { %2256 = vmatpush1.msra.mxu1 %v6910_v58  ;;  %2186 = vmatprep.subr.mxu0 %v6917_v9 }
 0x9f3   :  { %2257 = vmatprep.subr.mxu1 %v9208_v4  ;;  %2187 = vmatpush1.msra.mxu0 %v9237_v56 }
 0x9f4   :  { %2258 = vmatpush1.msra.mxu1 %v9238_v51  ;;  %2188 = vmatprep.subr.mxu0 %v9239_v54 }
 0x9f5   :  { %2259 = vmatprep.subr.mxu1 %v9240_v3  ;;  %2189 = vmatpush1.msra.mxu0 %v9241_v50  ;;  %v9260_v50 = vld [vmem:[#allocation25_spill] sm:$0xff] }
 0x9f6   :  { %2260 = vmatpush1.msra.mxu1 %v9242_v8  ;;  %2190 = vmatprep.subr.mxu0 %v9243_v59  ;;  %v9254_v59 = vmov 0.0  }
 0x9f7   :  { %2261 = vmatprep.subr.mxu1 %v9244_v53  ;;  %2191 = vmatpush1.msra.mxu0 %v9245_v11  ;;  %v9255_v53 = vld [vmem:[#allocation23_spill] sm:$0xff]  ;;  %v9259_v11 = vld [vmem:[#allocation24_spill] sm:$0xff] }
 0x9f8   :  { %2262 = vmatpush1.msra.mxu1 %v9246_v21  ;;  %2192 = vmatprep.subr.mxu0 %v9247_v1  ;;  %v9256_v21 = vld [vmem:[#allocation4_spill] sm:$0xff]  ;;  %v9257_v1 = vld [vmem:[#allocation10_spill] sm:$0xff] }
 0x9f9   :  { %2263 = vmatprep.subr.mxu1 %v9248_v13  ;;  %2193 = vmatpush1.msra.mxu0 %v9249_v52 }
 0x9fa   :  { %2264 = vmatpush1.msra.mxu1 %v9250_v16  ;;  %2194 = vmatprep.subr.mxu0 %v9251_v60 }
 0x9fb   :  { %2265 = vmatprep.subr.mxu1 %v9252_v0  ;;  %2195 = vmatpush1.msra.mxu0 %v9253_v63  ;;  %v9258_v0 = vld [vmem:[#allocation16_spill] sm:$0xff] }
 0x9fc   :  { %2228 = vmatprep.mubr.f32.mxu0 %v9254_v59  ;;  %2266 = vmatpush1.msra.mxu1 %v9255_v53 }
 0x9fd   :  { %2299 = vmatprep.mubr.f32.mxu1 %v9254_v59  ;;  %2332 = vmatprep.subr.mxu0 %v9256_v21 }
 0x9fe   :  { %2403 = vmatprep.subr.mxu1 %v9257_v1 }
 0xa67   :  { %v4390_v13 = vpop.xlane.xlu0 %4389 }
 0xa68   :  { %4421 = vst.msk [vmem:[%s8856_s7 + $0x8] sm:$0xff] %vm4419_vm0, %v4390_v13 }
 0xa9c   :  { %v2062_v60 = vpop.f32.mrf.mxu0  ;;  %v2133_v53 = vpop.f32.mrf.mxu1 }
 0xa9d   :  { %v2063_v16 = vadd.f32 %v2062_v60, %v9258_v0  ;;  %v2134_v51 = vadd.f32 %v2133_v53, %v7157_v44 }
 0xa9e   :  { %v2064_v63 = vpop.f32.mrf.mxu0  ;;  %v2135_v21 = vpop.f32.mrf.mxu1 }
 0xa9f   :  { %v4498_v52 = vmul.f32 -1.442695, %v2063_v16  ;;  %v2065_v8 = vadd.f32 %v2064_v63, %v9259_v11  ;;  %v2136_v1 = vadd.f32 %v2135_v21, %v9260_v50 }
 0xaa1   :  { %4702 = vpow2.f32 %v4498_v52  ;;  %v4499_v59 = vmul.f32 -1.442695, %v2065_v8  ;;  %v4500_v3 = vmul.f32 -1.442695, %v2136_v1  ;;  %v9264_v1 = vld [vmem:[#allocation17_spill] sm:$0xff] }
 0xaa3   :  { %4704 = vpow2.f32 %v4499_v59 }
 0xaa4   :  { %4706 = vpow2.f32 %v4500_v3 }
 0xaae   :  { %v4703_v54 = vpop.eup %4702 }
 0xaaf   :  { %v2141_v56 = vadd.f32 1.0, %v4703_v54 }
 0xab0   :  { %v4705_v13 = vpop.eup %4704 }
 0xab1   :  { %4708 = vrcp.f32 %v2141_v56  ;;  %v2147_v60 = vadd.f32 1.0, %v4705_v13  ;;  %v4707_v16 = vpop.eup %4706  ;;  %v9266_v13 = vld [vmem:[#allocation9_spill] sm:$0xff] }
 0xab2   :  { %4710 = vtanh.f32 %v2134_v51  ;;  %v2154_v8 = vadd.f32 1.0, %v4707_v16  ;;  %v9262_v51 = vld [vmem:[#allocation8_spill] sm:$0xff]  ;;  %v9268_v16 = vld [vmem:[#allocation18_spill] sm:$0xff] }
 0xab3   :  { %4712 = vrcp.f32 %v2147_v60  ;;  %v9267_v60 = vld [vmem:[#allocation6_spill] sm:$0xff] }
 0xab4   :  { %4714 = vrcp.f32 %v2154_v8  ;;  %v9271_v8 = vld [vmem:[#allocation7_spill] sm:$0xff] }
 0xabe   :  { %v4709_v63 = vpop.eup %4708 }
 0xabf   :  { %v4711_v52 = vpop.eup %4710 }
 0xac0   :  { %v4713_v11 = vpop.eup %4712  ;;  %v2158_v59 = vmul.f32 %v4711_v52, %v4709_v63  ;;  %v9269_v63 = vld [vmem:[#allocation14_spill] sm:$0xff]  ;;  %v9270_v52 = vld [vmem:[#allocation11_spill] sm:$0xff] }
 0xac1   :  { %v2157_v0 = vmul.f32 %v4713_v11, %v7161_v48  ;;  %v4715_v54 = vpop.eup %4714  ;;  %v9261_v48 = vld [vmem:[#allocation3_spill] sm:$0xff]  ;;  %v9263_v11 = vld [vmem:[#allocation5_spill] sm:$0xff] }
 0xac3   :  { %v7240_v21 = vadd.f32 %v2158_v59, %v2157_v0  ;;  %v9265_v0 = vld [vmem:[#allocation12_spill] sm:$0xff]  ;;  %v9272_v59 = vld [vmem:[#allocation19_spill] sm:$0xff] }
 0xac5   :  { %4716 = vtanh.f32 %v7240_v21 }
 0xad2   :  { %v4717_v53 = vpop.eup %4716 }
 0xad3   :  { %v2161_v3 = vmul.f32 %v4717_v53, %v4715_v54  ;;  %v9273_v54 = vld [vmem:[#allocation13_spill] sm:$0xff]  ;;  %v9274_v53 = vld [vmem:[#allocation20_spill] sm:$0xff] }
 0xad5   :  { %2229 = vmatmul.mubr.f32.vlgmr.msra.gmra.mxu0 %v2161_v3  ;;  %2300 = vmatmul.mubr.f32.vlgmr.msra.gmra.mxu1 %v2161_v3  ;;  %v4373_v56 = vmul.f32 %v7064_v6, %v2161_v3  ;;  %v9275_v3 = vld [vmem:[#allocation15_spill] sm:$0xff] }
 0xad6   :  { %2333 = vmatpush1.msra.mxu0 %v6669_v22  ;;  %2404 = vmatpush1.msra.mxu1 %v6674_v23 }
 0xad7   :  { %4391 = vadd.xlane.f32.xlu1 %v4373_v56  ;;  %2334 = vmatprep.subr.mxu0 %v6681_v24  ;;  %v9276_v56 = vld [vmem:[#allocation21_spill] sm:$0xff] }
 0xad8   :  { %2405 = vmatprep.subr.mxu1 %v6686_v25  ;;  %2335 = vmatpush1.msra.mxu0 %v6693_v26 }
 0xad9   :  { %2406 = vmatpush1.msra.mxu1 %v6698_v27  ;;  %2336 = vmatprep.subr.mxu0 %v6705_v28 }
 0xada   :  { %2407 = vmatprep.subr.mxu1 %v6710_v29  ;;  %2337 = vmatpush1.msra.mxu0 %v6717_v30 }
 0xadb   :  { %2408 = vmatpush1.msra.mxu1 %v6722_v31  ;;  %2338 = vmatprep.subr.mxu0 %v6729_v32 }
 0xadc   :  { %2409 = vmatprep.subr.mxu1 %v6734_v33  ;;  %2339 = vmatpush1.msra.mxu0 %v6741_v34 }
 0xadd   :  { %2410 = vmatpush1.msra.mxu1 %v6746_v35  ;;  %2340 = vmatprep.subr.mxu0 %v6753_v36 }
 0xade   :  { %2411 = vmatprep.subr.mxu1 %v6758_v37  ;;  %2341 = vmatpush1.msra.mxu0 %v6765_v38 }
 0xadf   :  { %2412 = vmatpush1.msra.mxu1 %v6770_v39  ;;  %2342 = vmatprep.subr.mxu0 %v6777_v40 }
 0xae0   :  { %2413 = vmatprep.subr.mxu1 %v6782_v41  ;;  %2343 = vmatpush1.msra.mxu0 %v6789_v42 }
 0xae1   :  { %2414 = vmatpush1.msra.mxu1 %v6794_v43  ;;  %2344 = vmatprep.subr.mxu0 %v6801_v45 }
 0xae2   :  { %2415 = vmatprep.subr.mxu1 %v6806_v47  ;;  %2345 = vmatpush1.msra.mxu0 %v6813_v7 }
 0xae3   :  { %2416 = vmatpush1.msra.mxu1 %v6818_v18  ;;  %2346 = vmatprep.subr.mxu0 %v6825_v57 }
 0xae4   :  { %2417 = vmatprep.subr.mxu1 %v6830_v62  ;;  %2347 = vmatpush1.msra.mxu0 %v6835_v12 }
 0xae5   :  { %2418 = vmatpush1.msra.mxu1 %v6842_v14  ;;  %2348 = vmatprep.subr.mxu0 %v6847_v49 }
 0xae6   :  { %2419 = vmatprep.subr.mxu1 %v6852_v15  ;;  %2349 = vmatpush1.msra.mxu0 %v6859_v10 }
 0xae7   :  { %2420 = vmatpush1.msra.mxu1 %v6864_v61  ;;  %2350 = vmatprep.subr.mxu0 %v6869_v20 }
 0xae8   :  { %2421 = vmatprep.subr.mxu1 %v6876_v19  ;;  %2351 = vmatpush1.msra.mxu0 %v6881_v5 }
 0xae9   :  { %2422 = vmatpush1.msra.mxu1 %v6886_v2  ;;  %2352 = vmatprep.subr.mxu0 %v6893_v17 }
 0xaea   :  { %2423 = vmatprep.subr.mxu1 %v6898_v46  ;;  %2353 = vmatpush1.msra.mxu0 %v6905_v55 }
 0xaeb   :  { %2424 = vmatpush1.msra.mxu1 %v6910_v58  ;;  %2354 = vmatprep.subr.mxu0 %v6917_v9 }
 0xaec   :  { %2425 = vmatprep.subr.mxu1 %v9208_v4  ;;  %2355 = vmatpush1.msra.mxu0 %v9261_v48 }
 0xaed   :  { %2426 = vmatpush1.msra.mxu1 %v9262_v51  ;;  %2356 = vmatprep.subr.mxu0 %v9263_v11 }
 0xaee   :  { %2427 = vmatprep.subr.mxu1 %v9264_v1  ;;  %2357 = vmatpush1.msra.mxu0 %v9265_v0 }
 0xaef   :  { %2428 = vmatpush1.msra.mxu1 %v9266_v13  ;;  %2358 = vmatprep.subr.mxu0 %v9267_v60  ;;  %v9277_v13 = vld [vmem:[#allocation22_spill] sm:$0xff]  ;;  %v9278_v60 = vmov 0.0  }
 0xaf0   :  { %2429 = vmatprep.subr.mxu1 %v9268_v16  ;;  %2359 = vmatpush1.msra.mxu0 %v9269_v63  ;;  %v9279_v16 = vld [vmem:[#allocation23_spill] sm:$0xff]  ;;  %v9283_v63 = vld [vmem:[#allocation24_spill] sm:$0xff] }
 0xaf1   :  { %2430 = vmatpush1.msra.mxu1 %v9270_v52  ;;  %2360 = vmatprep.subr.mxu0 %v9271_v8  ;;  %v9280_v52 = vld [vmem:[#allocation4_spill] sm:$0xff]  ;;  %v9281_v8 = vld [vmem:[#allocation10_spill] sm:$0xff] }
 0xaf2   :  { %2431 = vmatprep.subr.mxu1 %v9272_v59  ;;  %2361 = vmatpush1.msra.mxu0 %v9273_v54 }
 0xaf3   :  { %2432 = vmatpush1.msra.mxu1 %v9274_v53  ;;  %2362 = vmatprep.subr.mxu0 %v9275_v3 }
 0xaf4   :  { %2433 = vmatprep.subr.mxu1 %v9276_v56  ;;  %2363 = vmatpush1.msra.mxu0 %v9277_v13  ;;  %v9282_v56 = vld [vmem:[#allocation16_spill] sm:$0xff] }
 0xaf5   :  { %2396 = vmatprep.mubr.f32.mxu0 %v9278_v60  ;;  %2434 = vmatpush1.msra.mxu1 %v9279_v16 }
 0xaf6   :  { %2467 = vmatprep.mubr.f32.mxu1 %v9278_v60  ;;  %2500 = vmatprep.subr.mxu0 %v9280_v52 }
 0xaf7   :  { %2571 = vmatprep.subr.mxu1 %v9281_v8 }
 0xb60   :  { %v4392_v59 = vpop.xlane.xlu1 %4391 }
 0xb61   :  { %4422 = vst.msk [vmem:[%s8856_s7 + $0x10] sm:$0xff] %vm4419_vm0, %v4392_v59 }
 0xb95   :  { %v2230_v3 = vpop.f32.mrf.mxu0  ;;  %v2301_v16 = vpop.f32.mrf.mxu1 }
 0xb96   :  { %v2231_v53 = vadd.f32 %v2230_v3, %v9282_v56  ;;  %v2302_v51 = vadd.f32 %v2301_v16, %v7157_v44 }
 0xb97   :  { %v2232_v13 = vpop.f32.mrf.mxu0  ;;  %v2303_v52 = vpop.f32.mrf.mxu1 }
 0xb98   :  { %v4501_v54 = vmul.f32 -1.442695, %v2231_v53  ;;  %v2233_v0 = vadd.f32 %v2232_v13, %v9283_v63  ;;  %v2304_v8 = vadd.f32 %v2303_v52, %v9260_v50 }
 0xb9a   :  { %4718 = vpow2.f32 %v4501_v54  ;;  %v4502_v60 = vmul.f32 -1.442695, %v2233_v0  ;;  %v4503_v1 = vmul.f32 -1.442695, %v2304_v8 }
 0xb9c   :  { %4720 = vpow2.f32 %v4502_v60 }
 0xb9d   :  { %4722 = vpow2.f32 %v4503_v1 }
 0xba7   :  { %v4719_v11 = vpop.eup %4718 }
 0xba8   :  { %v2309_v48 = vadd.f32 1.0, %v4719_v11 }
 0xba9   :  { %v4721_v59 = vpop.eup %4720 }
 0xbaa   :  { %4724 = vrcp.f32 %v2309_v48  ;;  %v2315_v3 = vadd.f32 1.0, %v4721_v59  ;;  %v4723_v53 = vpop.eup %4722 }
 0xbab   :  { %4726 = vtanh.f32 %v2302_v51  ;;  %v2322_v0 = vadd.f32 1.0, %v4723_v53  ;;  %v7415_v53 = vld [vmem:[%s8853_s4 + $0x1e0] sm:$0xff] }
 0xbac   :  { %4728 = vrcp.f32 %v2315_v3 }
 0xbad   :  { %4730 = vrcp.f32 %v2322_v0  ;;  %v7439_v0 = vld [vmem:[%s8853_s4 + $0x1c0] sm:$0xff] }
 0xbb7   :  { %v4725_v13 = vpop.eup %4724 }
 0xbb8   :  { %v4727_v54 = vpop.eup %4726 }
 0xbb9   :  { %v4729_v63 = vpop.eup %4728  ;;  %v2326_v60 = vmul.f32 %v4727_v54, %v4725_v13  ;;  %v7421_v13 = vld [vmem:[%s8853_s4 + $0x1f0] sm:$0xff]  ;;  %v7427_v54 = vld [vmem:[%s8853_s4 + $0x1c8] sm:$0xff] }
 0xbba   :  { %v2325_v56 = vmul.f32 %v4729_v63, %v7240_v21  ;;  %v4731_v11 = vpop.eup %4730 }
 0xbbc   :  { %v7319_v52 = vadd.f32 %v2326_v60, %v2325_v56  ;;  %v7445_v60 = vld [vmem:[%s8853_s4 + $0x1d0] sm:$0xff] }
 0xbbe   :  { %4732 = vtanh.f32 %v7319_v52 }
 0xbcb   :  { %v4733_v16 = vpop.eup %4732 }
 0xbcc   :  { %v2329_v1 = vmul.f32 %v4733_v16, %v4731_v11  ;;  %v7457_v11 = vld [vmem:[%s8853_s4 + $0x1b8] sm:$0xff]  ;;  %v7463_v16 = vld [vmem:[%s8853_s4 + $0x1a0] sm:$0xff] }
 0xbce   :  { %2397 = vmatmul.mubr.f32.vlgmr.msra.gmra.mxu0 %v2329_v1  ;;  %2468 = vmatmul.mubr.f32.vlgmr.msra.gmra.mxu1 %v2329_v1  ;;  %v4374_v48 = vmul.f32 %v7064_v6, %v2329_v1  ;;  %v7469_v1 = vld [vmem:[%s8853_s4 + $0x1b0] sm:$0xff] }
 0xbcf   :  { %2501 = vmatpush1.msra.mxu0 %v6669_v22  ;;  %2572 = vmatpush1.msra.mxu1 %v6674_v23  ;;  %v9284_v22 = vld [vmem:[#allocation3_spill] sm:$0xff]  ;;  %v9285_v23 = vld [vmem:[#allocation8_spill] sm:$0xff] }
 0xbd0   :  { %4393 = vadd.xlane.f32.xlu1 %v4374_v48  ;;  %2502 = vmatprep.subr.mxu0 %v6681_v24  ;;  %v9286_v24 = vld [vmem:[#allocation5_spill] sm:$0xff]  ;;  %v7475_v48 = vld [vmem:[%s8853_s4 + $0x188] sm:$0xff] }
 0xbd1   :  { %2573 = vmatprep.subr.mxu1 %v6686_v25  ;;  %2503 = vmatpush1.msra.mxu0 %v6693_v26  ;;  %v9287_v25 = vld [vmem:[#allocation17_spill] sm:$0xff]  ;;  %v9288_v26 = vld [vmem:[#allocation12_spill] sm:$0xff] }
 0xbd2   :  { %2574 = vmatpush1.msra.mxu1 %v6698_v27  ;;  %2504 = vmatprep.subr.mxu0 %v6705_v28  ;;  %v9289_v27 = vld [vmem:[#allocation9_spill] sm:$0xff]  ;;  %v9290_v28 = vld [vmem:[#allocation6_spill] sm:$0xff] }
 0xbd3   :  { %2575 = vmatprep.subr.mxu1 %v6710_v29  ;;  %2505 = vmatpush1.msra.mxu0 %v6717_v30  ;;  %v9291_v29 = vld [vmem:[#allocation18_spill] sm:$0xff] }
 0xbd4   :  { %2576 = vmatpush1.msra.mxu1 %v6722_v31  ;;  %2506 = vmatprep.subr.mxu0 %v6729_v32  ;;  %v9292_v30 = vld [vmem:[#allocation14_spill] sm:$0xff]  ;;  %v9293_v31 = vld [vmem:[#allocation11_spill] sm:$0xff] }
 0xbd5   :  { %2577 = vmatprep.subr.mxu1 %v6734_v33  ;;  %2507 = vmatpush1.msra.mxu0 %v6741_v34  ;;  %v9294_v32 = vld [vmem:[#allocation7_spill] sm:$0xff]  ;;  %v9296_v34 = vld [vmem:[#allocation13_spill] sm:$0xff] }
 0xbd6   :  { %2578 = vmatpush1.msra.mxu1 %v6746_v35  ;;  %2508 = vmatprep.subr.mxu0 %v6753_v36  ;;  %v9295_v33 = vld [vmem:[#allocation19_spill] sm:$0xff]  ;;  %v9297_v35 = vld [vmem:[#allocation20_spill] sm:$0xff] }
 0xbd7   :  { %2579 = vmatprep.subr.mxu1 %v6758_v37  ;;  %2509 = vmatpush1.msra.mxu0 %v6765_v38  ;;  %v9298_v36 = vld [vmem:[#allocation15_spill] sm:$0xff]  ;;  %v9299_v37 = vld [vmem:[#allocation21_spill] sm:$0xff]  ;;  %v9300_v38 = vld [vmem:[#allocation22_spill] sm:$0xff] }
 0xbd8   :  { %2580 = vmatpush1.msra.mxu1 %v6770_v39  ;;  %2510 = vmatprep.subr.mxu0 %v6777_v40  ;;  %v9301_v39 = vmov 0.0   ;;  %v9302_v40 = vld [vmem:[#allocation23_spill] sm:$0xff] }
 0xbd9   :  { %2581 = vmatprep.subr.mxu1 %v6782_v41  ;;  %2511 = vmatpush1.msra.mxu0 %v6789_v42  ;;  %v7390_v41 = vld [vmem:[%s8853_s4 + $0x1e8] sm:$0xff]  ;;  %v7396_v42 = vld [vmem:[%s8853_s4 + $0x1f8] sm:$0xff] }
 0xbda   :  { %2582 = vmatpush1.msra.mxu1 %v6794_v43  ;;  %2512 = vmatprep.subr.mxu0 %v6801_v45  ;;  %9303 = vst [vmem:[#allocation25_spill] sm:$0xff] %v7390_v41  ;;  %9304 = vst [vmem:[#allocation4_spill] sm:$0xff] %v7396_v42 }
 0xbdb   :  { %2583 = vmatprep.subr.mxu1 %v6806_v47  ;;  %2513 = vmatpush1.msra.mxu0 %v6813_v7  ;;  %v9305_v47 = vld [vmem:[#allocation16_spill] sm:$0xff] }
 0xbdc   :  { %2584 = vmatpush1.msra.mxu1 %v6818_v18  ;;  %2514 = vmatprep.subr.mxu0 %v6825_v57 }
 0xbdd   :  { %2585 = vmatprep.subr.mxu1 %v6830_v62  ;;  %2515 = vmatpush1.msra.mxu0 %v6835_v12  ;;  %v9306_v62 = vld [vmem:[#allocation24_spill] sm:$0xff] }
 0xbde   :  { %2586 = vmatpush1.msra.mxu1 %v6842_v14  ;;  %2516 = vmatprep.subr.mxu0 %v6847_v49 }
 0xbdf   :  { %2587 = vmatprep.subr.mxu1 %v6852_v15  ;;  %2517 = vmatpush1.msra.mxu0 %v6859_v10 }
 0xbe0   :  { %2588 = vmatpush1.msra.mxu1 %v6864_v61  ;;  %2518 = vmatprep.subr.mxu0 %v6869_v20 }
 0xbe1   :  { %2589 = vmatprep.subr.mxu1 %v6876_v19  ;;  %2519 = vmatpush1.msra.mxu0 %v6881_v5 }
 0xbe2   :  { %2590 = vmatpush1.msra.mxu1 %v6886_v2  ;;  %2520 = vmatprep.subr.mxu0 %v6893_v17 }
 0xbe3   :  { %2591 = vmatprep.subr.mxu1 %v6898_v46  ;;  %2521 = vmatpush1.msra.mxu0 %v6905_v55 }
 0xbe4   :  { %2592 = vmatpush1.msra.mxu1 %v6910_v58  ;;  %2522 = vmatprep.subr.mxu0 %v6917_v9 }
 0xbe5   :  { %2593 = vmatprep.subr.mxu1 %v9208_v4  ;;  %2523 = vmatpush1.msra.mxu0 %v9284_v22  ;;  %v7481_v22 = vld [vmem:[%s8853_s4 + $0x198] sm:$0xff] }
 0xbe6   :  { %2594 = vmatpush1.msra.mxu1 %v9285_v23  ;;  %2524 = vmatprep.subr.mxu0 %v9286_v24  ;;  %v7487_v23 = vld [vmem:[%s8853_s4 + $0x180] sm:$0xff]  ;;  %v7493_v24 = vld [vmem:[%s8853_s4 + $0x190] sm:$0xff] }
 0xbe7   :  { %2595 = vmatprep.subr.mxu1 %v9287_v25  ;;  %2525 = vmatpush1.msra.mxu0 %v9288_v26  ;;  %v7499_v25 = vld [vmem:[%s8853_s4 + $0x168] sm:$0xff]  ;;  %v7505_v26 = vld [vmem:[%s8853_s4 + $0x178] sm:$0xff] }
 0xbe8   :  { %2596 = vmatpush1.msra.mxu1 %v9289_v27  ;;  %2526 = vmatprep.subr.mxu0 %v9290_v28  ;;  %v7511_v27 = vld [vmem:[%s8853_s4 + $0x160] sm:$0xff]  ;;  %v7517_v28 = vld [vmem:[%s8853_s4 + $0x170] sm:$0xff] }
 0xbe9   :  { %2597 = vmatprep.subr.mxu1 %v9291_v29  ;;  %2527 = vmatpush1.msra.mxu0 %v9292_v30  ;;  %v7523_v29 = vld [vmem:[%s8853_s4 + $0x148] sm:$0xff]  ;;  %v7529_v30 = vld [vmem:[%s8853_s4 + $0x158] sm:$0xff] }
 0xbea   :  { %2598 = vmatpush1.msra.mxu1 %v9293_v31  ;;  %2528 = vmatprep.subr.mxu0 %v9294_v32  ;;  %v7535_v31 = vld [vmem:[%s8853_s4 + $0x140] sm:$0xff]  ;;  %v7541_v32 = vld [vmem:[%s8853_s4 + $0x150] sm:$0xff] }
 0xbeb   :  { %2599 = vmatprep.subr.mxu1 %v9295_v33  ;;  %2529 = vmatpush1.msra.mxu0 %v9296_v34  ;;  %v7547_v33 = vld [vmem:[%s8853_s4 + $0x128] sm:$0xff]  ;;  %v7553_v34 = vld [vmem:[%s8853_s4 + $0x138] sm:$0xff] }
 0xbec   :  { %2600 = vmatpush1.msra.mxu1 %v9297_v35  ;;  %2530 = vmatprep.subr.mxu0 %v9298_v36  ;;  %v7559_v35 = vld [vmem:[%s8853_s4 + $0x120] sm:$0xff]  ;;  %v7565_v36 = vld [vmem:[%s8853_s4 + $0x130] sm:$0xff] }
 0xbed   :  { %2601 = vmatprep.subr.mxu1 %v9299_v37  ;;  %2531 = vmatpush1.msra.mxu0 %v9300_v38  ;;  %v7571_v37 = vld [vmem:[%s8853_s4 + $0x108] sm:$0xff]  ;;  %v7577_v38 = vld [vmem:[%s8853_s4 + $0x118] sm:$0xff] }
 0xbee   :  { %2564 = vmatprep.mubr.f32.mxu0 %v9301_v39  ;;  %2602 = vmatpush1.msra.mxu1 %v9302_v40  ;;  %v7583_v40 = vld [vmem:[%s8853_s4 + $0x100] sm:$0xff] }
 0xbef   :  { %2635 = vmatprep.mubr.f32.mxu1 %v9301_v39  ;;  %2668 = vmatprep.subr.mxu0 %v7390_v41 }
 0xbf0   :  { %2739 = vmatprep.subr.mxu1 %v7396_v42 }
 0xc59   :  { %v4394_v43 = vpop.xlane.xlu1 %4393 }
 0xc5a   :  { %4423 = vst.msk [vmem:[%s8856_s7 + $0x18] sm:$0xff] %vm4419_vm0, %v4394_v43  ;;  %v7589_v43 = vld [vmem:[%s8853_s4 + $0x110] sm:$0xff] }
 0xc8e   :  { %v2398_v45 = vpop.f32.mrf.mxu0  ;;  %v2469_v14 = vpop.f32.mrf.mxu1 }
 0xc8f   :  { %v2399_v7 = vadd.f32 %v2398_v45, %v9305_v47  ;;  %v2470_v19 = vadd.f32 %v2469_v14, %v7157_v44  ;;  %v7595_v45 = vld [vmem:[%s8853_s4 + $0xe8] sm:$0xff]  ;;  %v7625_v14 = vld [vmem:[%s8853_s4 + $0xd8] sm:$0xff] }
 0xc90   :  { %v2400_v18 = vpop.f32.mrf.mxu0  ;;  %v2471_v15 = vpop.f32.mrf.mxu1 }
 0xc91   :  { %v4504_v57 = vmul.f32 -1.442695, %v2399_v7  ;;  %v2401_v12 = vadd.f32 %v2400_v18, %v9306_v62  ;;  %v2472_v10 = vadd.f32 %v2471_v15, %v9260_v50  ;;  %v7601_v7 = vld [vmem:[%s8853_s4 + $0xf8] sm:$0xff]  ;;  %v7607_v18 = vld [vmem:[%s8853_s4 + $0xe0] sm:$0xff]  ;;  %v7637_v15 = vld [vmem:[%s8853_s4 + $0xd0] sm:$0xff] }
 0xc93   :  { %4734 = vpow2.f32 %v4504_v57  ;;  %v4505_v49 = vmul.f32 -1.442695, %v2401_v12  ;;  %v4506_v61 = vmul.f32 -1.442695, %v2472_v10  ;;  %v7613_v57 = vld [vmem:[%s8853_s4 + $0xf0] sm:$0xff]  ;;  %v7619_v12 = vld [vmem:[%s8853_s4 + $0xc8] sm:$0xff] }
 0xc94   :  { %v7643_v10 = vld [vmem:[%s8853_s4 + $0xa8] sm:$0xff] }
 0xc95   :  { %4736 = vpow2.f32 %v4505_v49  ;;  %v7631_v49 = vld [vmem:[%s8853_s4 + $0xc0] sm:$0xff] }
 0xc96   :  { %4738 = vpow2.f32 %v4506_v61  ;;  %v7649_v61 = vld [vmem:[%s8853_s4 + $0xb8] sm:$0xff] }
 0xca0   :  { %v4735_v20 = vpop.eup %4734 }
 0xca1   :  { %v2477_v5 = vadd.f32 1.0, %v4735_v20  ;;  %v7655_v20 = vld [vmem:[%s8853_s4 + $0xa0] sm:$0xff] }
 0xca2   :  { %v4737_v2 = vpop.eup %4736 }
 0xca3   :  { %4740 = vrcp.f32 %v2477_v5  ;;  %v2483_v17 = vadd.f32 1.0, %v4737_v2  ;;  %v4739_v46 = vpop.eup %4738  ;;  %v7667_v5 = vld [vmem:[%s8853_s4 + $0x88] sm:$0xff]  ;;  %v7673_v2 = vld [vmem:[%s8853_s4 + $0x98] sm:$0xff] }
 0xca4   :  { %4742 = vtanh.f32 %v2470_v19  ;;  %v2490_v4 = vadd.f32 1.0, %v4739_v46  ;;  %v7661_v19 = vld [vmem:[%s8853_s4 + $0xb0] sm:$0xff] }
 0xca5   :  { %4744 = vrcp.f32 %v2483_v17  ;;  %v7679_v17 = vld [vmem:[%s8853_s4 + $0x80] sm:$0xff]  ;;  %v7685_v46 = vld [vmem:[%s8853_s4 + $0x90] sm:$0xff] }
 0xca6   :  { %4746 = vrcp.f32 %v2490_v4  ;;  %9307 = vst [vmem:[#allocation10_spill] sm:$0xff] %v7679_v17  ;;  %9308 = vst [vmem:[#allocation3_spill] sm:$0xff] %v7685_v46  ;;  %v7709_v4 = vld [vmem:[%s8853_s4 + $0x70] sm:$0xff] }
 0xca7   :  { %9312 = vst [vmem:[#allocation12_spill] sm:$0xff] %v7709_v4 }
 0xcb0   :  { %v4741_v55 = vpop.eup %4740 }
 0xcb1   :  { %v4743_v58 = vpop.eup %4742 }
 0xcb2   :  { %v4745_v9 = vpop.eup %4744  ;;  %v2494_v21 = vmul.f32 %v4743_v58, %v4741_v55  ;;  %v7691_v55 = vld [vmem:[%s8853_s4 + $0x68] sm:$0xff]  ;;  %v7697_v58 = vld [vmem:[%s8853_s4 + $0x78] sm:$0xff] }
 0xcb3   :  { %v2493_v51 = vmul.f32 %v4745_v9, %v7319_v52  ;;  %v4747_v56 = vpop.eup %4746  ;;  %v7451_v52 = vld [vmem:[%s8853_s4 + $0x1a8] sm:$0xff]  ;;  %9309 = vst [vmem:[#allocation8_spill] sm:$0xff] %v7691_v55  ;;  %9310 = vst [vmem:[#allocation5_spill] sm:$0xff] %v7697_v58  ;;  %v7703_v9 = vld [vmem:[%s8853_s4 + $0x60] sm:$0xff] }
 0xcb4   :  { %9311 = vst [vmem:[#allocation17_spill] sm:$0xff] %v7703_v9 }
 0xcb5   :  { %v7408_v63 = vadd.f32 %v2494_v21, %v2493_v51  ;;  %v7715_v21 = vld [vmem:[%s8853_s4 + $0x48] sm:$0xff]  ;;  %v7721_v51 = vld [vmem:[%s8853_s4 + $0x58] sm:$0xff] }
 0xcb6   :  { %9313 = vst [vmem:[#allocation9_spill] sm:$0xff] %v7715_v21  ;;  %9314 = vst [vmem:[#allocation6_spill] sm:$0xff] %v7721_v51 }
 0xcb7   :  { %4748 = vtanh.f32 %v7408_v63 }
 0xcc4   :  { %v4749_v8 = vpop.eup %4748 }
 0xcc5   :  { %v2497_v59 = vmul.f32 %v4749_v8, %v4747_v56  ;;  %v7727_v56 = vld [vmem:[%s8853_s4 + $0x40] sm:$0xff]  ;;  %v7733_v8 = vld [vmem:[%s8853_s4 + $0x50] sm:$0xff] }
 0xcc6   :  { %9315 = vst [vmem:[#allocation18_spill] sm:$0xff] %v7727_v56  ;;  %9316 = vst [vmem:[#allocation14_spill] sm:$0xff] %v7733_v8 }
 0xcc7   :  { %2565 = vmatmul.mubr.f32.vlgmr.msra.gmra.mxu0 %v2497_v59  ;;  %2636 = vmatmul.mubr.f32.vlgmr.msra.gmra.mxu1 %v2497_v59  ;;  %v4375_v3 = vmul.f32 %v7064_v6, %v2497_v59  ;;  %v7433_v6 = vld [vmem:[%s8853_s4 + $0x1d8] sm:$0xff]  ;;  %v7739_v59 = vld [vmem:[%s8853_s4 + $0x28] sm:$0xff] }
 0xcc8   :  { %2669 = vmatpush1.msra.mxu0 %v7415_v53  ;;  %2740 = vmatpush1.msra.mxu1 %v7421_v13  ;;  %9317 = vst [vmem:[#allocation11_spill] sm:$0xff] %v7739_v59 }
 0xcc9   :  { %4395 = vadd.xlane.f32.xlu0 %v4375_v3  ;;  %2670 = vmatprep.subr.mxu0 %v7427_v54  ;;  %v7745_v3 = vld [vmem:[%s8853_s4 + $0x38] sm:$0xff] }
 0xcca   :  { %2741 = vmatprep.subr.mxu1 %v7433_v6  ;;  %2671 = vmatpush1.msra.mxu0 %v7439_v0  ;;  %9318 = vst [vmem:[#allocation7_spill] sm:$0xff] %v7745_v3 }
 0xccb   :  { %2742 = vmatpush1.msra.mxu1 %v7445_v60  ;;  %2672 = vmatprep.subr.mxu0 %v7451_v52 }
 0xccc   :  { %2743 = vmatprep.subr.mxu1 %v7457_v11  ;;  %2673 = vmatpush1.msra.mxu0 %v7463_v16 }
 0xccd   :  { %2744 = vmatpush1.msra.mxu1 %v7469_v1  ;;  %2674 = vmatprep.subr.mxu0 %v7475_v48 }
 0xcce   :  { %2745 = vmatprep.subr.mxu1 %v7481_v22  ;;  %2675 = vmatpush1.msra.mxu0 %v7487_v23 }
 0xccf   :  { %2746 = vmatpush1.msra.mxu1 %v7493_v24  ;;  %2676 = vmatprep.subr.mxu0 %v7499_v25 }
 0xcd0   :  { %2747 = vmatprep.subr.mxu1 %v7505_v26  ;;  %2677 = vmatpush1.msra.mxu0 %v7511_v27 }
 0xcd1   :  { %2748 = vmatpush1.msra.mxu1 %v7517_v28  ;;  %2678 = vmatprep.subr.mxu0 %v7523_v29 }
 0xcd2   :  { %2749 = vmatprep.subr.mxu1 %v7529_v30  ;;  %2679 = vmatpush1.msra.mxu0 %v7535_v31 }
 0xcd3   :  { %2750 = vmatpush1.msra.mxu1 %v7541_v32  ;;  %2680 = vmatprep.subr.mxu0 %v7547_v33 }
 0xcd4   :  { %2751 = vmatprep.subr.mxu1 %v7553_v34  ;;  %2681 = vmatpush1.msra.mxu0 %v7559_v35 }
 0xcd5   :  { %2752 = vmatpush1.msra.mxu1 %v7565_v36  ;;  %2682 = vmatprep.subr.mxu0 %v7571_v37 }
 0xcd6   :  { %2753 = vmatprep.subr.mxu1 %v7577_v38  ;;  %2683 = vmatpush1.msra.mxu0 %v7583_v40 }
 0xcd7   :  { %2754 = vmatpush1.msra.mxu1 %v7589_v43  ;;  %2684 = vmatprep.subr.mxu0 %v7595_v45 }
 0xcd8   :  { %2755 = vmatprep.subr.mxu1 %v7601_v7  ;;  %2685 = vmatpush1.msra.mxu0 %v7607_v18 }
 0xcd9   :  { %2756 = vmatpush1.msra.mxu1 %v7613_v57  ;;  %2686 = vmatprep.subr.mxu0 %v7619_v12 }
 0xcda   :  { %2757 = vmatprep.subr.mxu1 %v7625_v14  ;;  %2687 = vmatpush1.msra.mxu0 %v7631_v49 }
 0xcdb   :  { %2758 = vmatpush1.msra.mxu1 %v7637_v15  ;;  %2688 = vmatprep.subr.mxu0 %v7643_v10 }
 0xcdc   :  { %2759 = vmatprep.subr.mxu1 %v7649_v61  ;;  %2689 = vmatpush1.msra.mxu0 %v7655_v20 }
 0xcdd   :  { %2760 = vmatpush1.msra.mxu1 %v7661_v19  ;;  %2690 = vmatprep.subr.mxu0 %v7667_v5 }
 0xcde   :  { %2761 = vmatprep.subr.mxu1 %v7673_v2  ;;  %2691 = vmatpush1.msra.mxu0 %v7679_v17 }
 0xcdf   :  { %2762 = vmatpush1.msra.mxu1 %v7685_v46  ;;  %2692 = vmatprep.subr.mxu0 %v7691_v55 }
 0xce0   :  { %2763 = vmatprep.subr.mxu1 %v7697_v58  ;;  %2693 = vmatpush1.msra.mxu0 %v7703_v9 }
 0xce1   :  { %2764 = vmatpush1.msra.mxu1 %v7709_v4  ;;  %2694 = vmatprep.subr.mxu0 %v7715_v21 }
 0xce2   :  { %2765 = vmatprep.subr.mxu1 %v7721_v51  ;;  %2695 = vmatpush1.msra.mxu0 %v7727_v56  ;;  %v7751_v56 = vld [vmem:[%s8853_s4 + $0x20] sm:$0xff] }
 0xce3   :  { %2766 = vmatpush1.msra.mxu1 %v7733_v8  ;;  %2696 = vmatprep.subr.mxu0 %v7739_v59  ;;  %9319 = vst [vmem:[#allocation19_spill] sm:$0xff] %v7751_v56  ;;  %v7757_v8 = vld [vmem:[%s8853_s4 + $0x30] sm:$0xff]  ;;  %v7763_v59 = vld [vmem:[%s8853_s4 + $0x8] sm:$0xff] }
 0xce4   :  { %2767 = vmatprep.subr.mxu1 %v7745_v3  ;;  %2697 = vmatpush1.msra.mxu0 %v7751_v56  ;;  %9320 = vst [vmem:[#allocation13_spill] sm:$0xff] %v7757_v8  ;;  %9321 = vst [vmem:[#allocation20_spill] sm:$0xff] %v7763_v59  ;;  %v7769_v3 = vld [vmem:[%s8853_s4 + $0x18] sm:$0xff]  ;;  %v7775_v56 = vld [vmem:[%s8853_s4] sm:$0xff] }
 0xce5   :  { %2768 = vmatpush1.msra.mxu1 %v7757_v8  ;;  %2698 = vmatprep.subr.mxu0 %v7763_v59  ;;  %9322 = vst [vmem:[#allocation15_spill] sm:$0xff] %v7769_v3  ;;  %9323 = vst [vmem:[#allocation21_spill] sm:$0xff] %v7775_v56  ;;  %v7782_v59 = vld [vmem:[%s8853_s4 + $0x10] sm:$0xff] }
 0xce6   :  { %2769 = vmatprep.subr.mxu1 %v7769_v3  ;;  %2699 = vmatpush1.msra.mxu0 %v7775_v56  ;;  %9324 = vst [vmem:[#allocation22_spill] sm:$0xff] %v7782_v59 }
 0xce7   :  { %2732 = vmatprep.mubr.f32.mxu0 %v9301_v39  ;;  %2770 = vmatpush1.msra.mxu1 %v7782_v59 }
 0xce8   :  { %2803 = vmatprep.mubr.f32.mxu1 %v9301_v39  ;;  %2836 = vmatprep.subr.mxu0 %v7390_v41 }
 0xce9   :  { %2907 = vmatprep.subr.mxu1 %v7396_v42 }
 0xd52   :  { %v4396_v3 = vpop.xlane.xlu0 %4395 }
 0xd53   :  { %4424 = vst.msk [vmem:[%s8856_s7 + $0x20] sm:$0xff] %vm4419_vm0, %v4396_v3 }
 0xd87   :  { %v2566_v56 = vpop.f32.mrf.mxu0  ;;  %v2637_v59 = vpop.f32.mrf.mxu1 }
 0xd88   :  { %v2567_v8 = vadd.f32 %v2566_v56, %v9305_v47  ;;  %v2638_v55 = vadd.f32 %v2637_v59, %v7157_v44  ;;  %v9328_v59 = vld [vmem:[#allocation17_spill] sm:$0xff] }
 0xd89   :  { %v2568_v51 = vpop.f32.mrf.mxu0  ;;  %v2639_v41 = vpop.f32.mrf.mxu1 }
 0xd8a   :  { %v4507_v21 = vmul.f32 -1.442695, %v2567_v8  ;;  %v2569_v4 = vadd.f32 %v2568_v51, %v9306_v62  ;;  %v2640_v42 = vadd.f32 %v2639_v41, %v9260_v50 }
 0xd8c   :  { %4750 = vpow2.f32 %v4507_v21  ;;  %v4508_v39 = vmul.f32 -1.442695, %v2569_v4  ;;  %v4509_v9 = vmul.f32 -1.442695, %v2640_v42 }
 0xd8e   :  { %4752 = vpow2.f32 %v4508_v39 }
 0xd8f   :  { %4754 = vpow2.f32 %v4509_v9 }
 0xd99   :  { %v4751_v58 = vpop.eup %4750 }
 0xd9a   :  { %v2645_v46 = vadd.f32 1.0, %v4751_v58 }
 0xd9b   :  { %v4753_v3 = vpop.eup %4752 }
 0xd9c   :  { %4756 = vrcp.f32 %v2645_v46  ;;  %v2651_v56 = vadd.f32 1.0, %v4753_v3  ;;  %v4755_v8 = vpop.eup %4754  ;;  %v7803_v46 = vld [vmem:[%s8855_s6] ss:$0 sm:$0xff]  ;;  %v9329_v3 = vld [vmem:[#allocation12_spill] sm:$0xff] }
 0xd9d   :  { %4758 = vtanh.f32 %v2638_v55  ;;  %v2658_v4 = vadd.f32 1.0, %v4755_v8  ;;  %v9331_v8 = vld [vmem:[#allocation6_spill] sm:$0xff] }
 0xd9e   :  { %4760 = vrcp.f32 %v2651_v56  ;;  %v9330_v56 = vld [vmem:[#allocation9_spill] sm:$0xff] }
 0xd9f   :  { %4762 = vrcp.f32 %v2658_v4  ;;  %v9334_v4 = vld [vmem:[#allocation11_spill] sm:$0xff] }
 0xda9   :  { %v4757_v51 = vpop.eup %4756 }
 0xdaa   :  { %v4759_v21 = vpop.eup %4758 }
 0xdab   :  { %v4761_v62 = vpop.eup %4760  ;;  %v2662_v39 = vmul.f32 %v4759_v21, %v4757_v51  ;;  %v9332_v51 = vld [vmem:[#allocation18_spill] sm:$0xff] }
 0xdac   :  { %v2661_v47 = vmul.f32 %v4761_v62, %v7408_v63  ;;  %v4763_v42 = vpop.eup %4762  ;;  %v9326_v62 = vld [vmem:[#allocation8_spill] sm:$0xff]  ;;  %v9327_v63 = vld [vmem:[#allocation5_spill] sm:$0xff]  ;;  %v9333_v21 = vld [vmem:[#allocation14_spill] sm:$0xff] }
 0xdae   :  { %v7797_v41 = vadd.f32 %v2662_v39, %v2661_v47  ;;  %v9325_v47 = vld [vmem:[#allocation3_spill] sm:$0xff] }
 0xdaf   :  { %v9335_v39 = vld [vmem:[#allocation7_spill] sm:$0xff] }
 0xdb0   :  { %4764 = vtanh.f32 %v7797_v41 }
 0xdbd   :  { %v4765_v58 = vpop.eup %4764 }
 0xdbe   :  { %v2665_v9 = vmul.f32 %v4765_v58, %v4763_v42  ;;  %v9336_v42 = vld [vmem:[#allocation19_spill] sm:$0xff]  ;;  %v9337_v58 = vld [vmem:[#allocation13_spill] sm:$0xff] }
 0xdc0   :  { %2733 = vmatmul.mubr.f32.vlgmr.msra.gmra.mxu0 %v2665_v9  ;;  %2804 = vmatmul.mubr.f32.vlgmr.msra.gmra.mxu1 %v2665_v9  ;;  %v4376_v55 = vmul.f32 %v7803_v46, %v2665_v9  ;;  %v9338_v9 = vld [vmem:[#allocation20_spill] sm:$0xff] }
 0xdc1   :  { %2837 = vmatpush1.msra.mxu0 %v7415_v53  ;;  %2908 = vmatpush1.msra.mxu1 %v7421_v13 }
 0xdc2   :  { %4397 = vadd.xlane.f32.xlu1 %v4376_v55  ;;  %2838 = vmatprep.subr.mxu0 %v7427_v54  ;;  %v9339_v55 = vld [vmem:[#allocation15_spill] sm:$0xff] }
 0xdc3   :  { %2909 = vmatprep.subr.mxu1 %v7433_v6  ;;  %2839 = vmatpush1.msra.mxu0 %v7439_v0 }
 0xdc4   :  { %2910 = vmatpush1.msra.mxu1 %v7445_v60  ;;  %2840 = vmatprep.subr.mxu0 %v7451_v52 }
 0xdc5   :  { %2911 = vmatprep.subr.mxu1 %v7457_v11  ;;  %2841 = vmatpush1.msra.mxu0 %v7463_v16 }
 0xdc6   :  { %2912 = vmatpush1.msra.mxu1 %v7469_v1  ;;  %2842 = vmatprep.subr.mxu0 %v7475_v48 }
 0xdc7   :  { %2913 = vmatprep.subr.mxu1 %v7481_v22  ;;  %2843 = vmatpush1.msra.mxu0 %v7487_v23 }
 0xdc8   :  { %2914 = vmatpush1.msra.mxu1 %v7493_v24  ;;  %2844 = vmatprep.subr.mxu0 %v7499_v25 }
 0xdc9   :  { %2915 = vmatprep.subr.mxu1 %v7505_v26  ;;  %2845 = vmatpush1.msra.mxu0 %v7511_v27 }
 0xdca   :  { %2916 = vmatpush1.msra.mxu1 %v7517_v28  ;;  %2846 = vmatprep.subr.mxu0 %v7523_v29 }
 0xdcb   :  { %2917 = vmatprep.subr.mxu1 %v7529_v30  ;;  %2847 = vmatpush1.msra.mxu0 %v7535_v31 }
 0xdcc   :  { %2918 = vmatpush1.msra.mxu1 %v7541_v32  ;;  %2848 = vmatprep.subr.mxu0 %v7547_v33 }
 0xdcd   :  { %2919 = vmatprep.subr.mxu1 %v7553_v34  ;;  %2849 = vmatpush1.msra.mxu0 %v7559_v35 }
 0xdce   :  { %2920 = vmatpush1.msra.mxu1 %v7565_v36  ;;  %2850 = vmatprep.subr.mxu0 %v7571_v37 }
 0xdcf   :  { %2921 = vmatprep.subr.mxu1 %v7577_v38  ;;  %2851 = vmatpush1.msra.mxu0 %v7583_v40 }
 0xdd0   :  { %2922 = vmatpush1.msra.mxu1 %v7589_v43  ;;  %2852 = vmatprep.subr.mxu0 %v7595_v45 }
 0xdd1   :  { %2923 = vmatprep.subr.mxu1 %v7601_v7  ;;  %2853 = vmatpush1.msra.mxu0 %v7607_v18 }
 0xdd2   :  { %2924 = vmatpush1.msra.mxu1 %v7613_v57  ;;  %2854 = vmatprep.subr.mxu0 %v7619_v12 }
 0xdd3   :  { %2925 = vmatprep.subr.mxu1 %v7625_v14  ;;  %2855 = vmatpush1.msra.mxu0 %v7631_v49 }
 0xdd4   :  { %2926 = vmatpush1.msra.mxu1 %v7637_v15  ;;  %2856 = vmatprep.subr.mxu0 %v7643_v10 }
 0xdd5   :  { %2927 = vmatprep.subr.mxu1 %v7649_v61  ;;  %2857 = vmatpush1.msra.mxu0 %v7655_v20 }
 0xdd6   :  { %2928 = vmatpush1.msra.mxu1 %v7661_v19  ;;  %2858 = vmatprep.subr.mxu0 %v7667_v5 }
 0xdd7   :  { %2929 = vmatprep.subr.mxu1 %v7673_v2  ;;  %2859 = vmatpush1.msra.mxu0 %v7679_v17 }
 0xdd8   :  { %2930 = vmatpush1.msra.mxu1 %v9325_v47  ;;  %2860 = vmatprep.subr.mxu0 %v9326_v62 }
 0xdd9   :  { %2931 = vmatprep.subr.mxu1 %v9327_v63  ;;  %2861 = vmatpush1.msra.mxu0 %v9328_v59 }
 0xdda   :  { %2932 = vmatpush1.msra.mxu1 %v9329_v3  ;;  %2862 = vmatprep.subr.mxu0 %v9330_v56  ;;  %v9340_v3 = vld [vmem:[#allocation21_spill] sm:$0xff]  ;;  %v9341_v56 = vmov 0.0  }
 0xddb   :  { %2933 = vmatprep.subr.mxu1 %v9331_v8  ;;  %2863 = vmatpush1.msra.mxu0 %v9332_v51  ;;  %v9342_v8 = vld [vmem:[#allocation22_spill] sm:$0xff]  ;;  %v9346_v51 = vld [vmem:[#allocation24_spill] sm:$0xff] }
 0xddc   :  { %2934 = vmatpush1.msra.mxu1 %v9333_v21  ;;  %2864 = vmatprep.subr.mxu0 %v9334_v4  ;;  %v9343_v21 = vld [vmem:[#allocation25_spill] sm:$0xff]  ;;  %v9344_v4 = vld [vmem:[#allocation4_spill] sm:$0xff] }
 0xddd   :  { %2935 = vmatprep.subr.mxu1 %v9335_v39  ;;  %2865 = vmatpush1.msra.mxu0 %v9336_v42 }
 0xdde   :  { %2936 = vmatpush1.msra.mxu1 %v9337_v58  ;;  %2866 = vmatprep.subr.mxu0 %v9338_v9 }
 0xddf   :  { %2937 = vmatprep.subr.mxu1 %v9339_v55  ;;  %2867 = vmatpush1.msra.mxu0 %v9340_v3  ;;  %v9345_v55 = vld [vmem:[#allocation16_spill] sm:$0xff] }
 0xde0   :  { %2900 = vmatprep.mubr.f32.mxu0 %v9341_v56  ;;  %2938 = vmatpush1.msra.mxu1 %v9342_v8 }
 0xde1   :  { %2971 = vmatprep.mubr.f32.mxu1 %v9341_v56  ;;  %3004 = vmatprep.subr.mxu0 %v9343_v21 }
 0xde2   :  { %3075 = vmatprep.subr.mxu1 %v9344_v4 }
 0xe4b   :  { %v4398_v39 = vpop.xlane.xlu1 %4397 }
 0xe4c   :  { %4425 = vst.msk [vmem:[%s8856_s7 + $0x28] sm:$0xff] %vm4419_vm0, %v4398_v39 }
 0xe80   :  { %v2734_v9 = vpop.f32.mrf.mxu0  ;;  %v2805_v8 = vpop.f32.mrf.mxu1 }
 0xe81   :  { %v2735_v58 = vadd.f32 %v2734_v9, %v9345_v55  ;;  %v2806_v47 = vadd.f32 %v2805_v8, %v7157_v44 }
 0xe82   :  { %v2736_v3 = vpop.f32.mrf.mxu0  ;;  %v2807_v21 = vpop.f32.mrf.mxu1 }
 0xe83   :  { %v4510_v42 = vmul.f32 -1.442695, %v2735_v58  ;;  %v2737_v59 = vadd.f32 %v2736_v3, %v9346_v51  ;;  %v2808_v4 = vadd.f32 %v2807_v21, %v9260_v50 }
 0xe85   :  { %4766 = vpow2.f32 %v4510_v42  ;;  %v4511_v56 = vmul.f32 -1.442695, %v2737_v59  ;;  %v4512_v63 = vmul.f32 -1.442695, %v2808_v4  ;;  %v9350_v4 = vld [vmem:[#allocation5_spill] sm:$0xff] }
 0xe87   :  { %4768 = vpow2.f32 %v4511_v56 }
 0xe88   :  { %4770 = vpow2.f32 %v4512_v63 }
 0xe92   :  { %v4767_v62 = vpop.eup %4766 }
 0xe93   :  { %v2813_v17 = vadd.f32 1.0, %v4767_v62 }
 0xe94   :  { %v4769_v39 = vpop.eup %4768 }
 0xe95   :  { %4772 = vrcp.f32 %v2813_v17  ;;  %v2819_v9 = vadd.f32 1.0, %v4769_v39  ;;  %v4771_v58 = vpop.eup %4770  ;;  %v9352_v39 = vld [vmem:[#allocation12_spill] sm:$0xff] }
 0xe96   :  { %4774 = vtanh.f32 %v2806_v47  ;;  %v2826_v59 = vadd.f32 1.0, %v4771_v58  ;;  %v9348_v47 = vld [vmem:[#allocation3_spill] sm:$0xff]  ;;  %v9354_v58 = vld [vmem:[#allocation6_spill] sm:$0xff] }
 0xe97   :  { %4776 = vrcp.f32 %v2819_v9  ;;  %v9353_v9 = vld [vmem:[#allocation9_spill] sm:$0xff] }
 0xe98   :  { %4778 = vrcp.f32 %v2826_v59  ;;  %v9357_v59 = vld [vmem:[#allocation11_spill] sm:$0xff] }
 0xea2   :  { %v4773_v3 = vpop.eup %4772 }
 0xea3   :  { %v4775_v42 = vpop.eup %4774 }
 0xea4   :  { %v4777_v51 = vpop.eup %4776  ;;  %v2830_v56 = vmul.f32 %v4775_v42, %v4773_v3  ;;  %v9355_v3 = vld [vmem:[#allocation18_spill] sm:$0xff] }
 0xea5   :  { %v2829_v55 = vmul.f32 %v4777_v51, %v7797_v41  ;;  %v4779_v62 = vpop.eup %4778  ;;  %v9347_v41 = vld [vmem:[#allocation10_spill] sm:$0xff]  ;;  %v9349_v51 = vld [vmem:[#allocation8_spill] sm:$0xff] }
 0xea6   :  { %v9356_v42 = vld [vmem:[#allocation14_spill] sm:$0xff] }
 0xea7   :  { %v7881_v21 = vadd.f32 %v2830_v56, %v2829_v55  ;;  %v9351_v55 = vld [vmem:[#allocation17_spill] sm:$0xff]  ;;  %v9358_v56 = vld [vmem:[#allocation7_spill] sm:$0xff] }
 0xea9   :  { %4780 = vtanh.f32 %v7881_v21 }
 0xeb6   :  { %v4781_v8 = vpop.eup %4780 }
 0xeb7   :  { %v2833_v63 = vmul.f32 %v4781_v8, %v4779_v62  ;;  %v9359_v62 = vld [vmem:[#allocation19_spill] sm:$0xff]  ;;  %v9360_v8 = vld [vmem:[#allocation13_spill] sm:$0xff] }
 0xeb9   :  { %2901 = vmatmul.mubr.f32.vlgmr.msra.gmra.mxu0 %v2833_v63  ;;  %2972 = vmatmul.mubr.f32.vlgmr.msra.gmra.mxu1 %v2833_v63  ;;  %v4377_v17 = vmul.f32 %v7803_v46, %v2833_v63  ;;  %v9361_v63 = vld [vmem:[#allocation20_spill] sm:$0xff] }
 0xeba   :  { %3005 = vmatpush1.msra.mxu0 %v7415_v53  ;;  %3076 = vmatpush1.msra.mxu1 %v7421_v13 }
 0xebb   :  { %4399 = vadd.xlane.f32.xlu0 %v4377_v17  ;;  %3006 = vmatprep.subr.mxu0 %v7427_v54  ;;  %v9362_v17 = vld [vmem:[#allocation15_spill] sm:$0xff] }
 0xebc   :  { %3077 = vmatprep.subr.mxu1 %v7433_v6  ;;  %3007 = vmatpush1.msra.mxu0 %v7439_v0 }
 0xebd   :  { %3078 = vmatpush1.msra.mxu1 %v7445_v60  ;;  %3008 = vmatprep.subr.mxu0 %v7451_v52 }
 0xebe   :  { %3079 = vmatprep.subr.mxu1 %v7457_v11  ;;  %3009 = vmatpush1.msra.mxu0 %v7463_v16 }
 0xebf   :  { %3080 = vmatpush1.msra.mxu1 %v7469_v1  ;;  %3010 = vmatprep.subr.mxu0 %v7475_v48 }
 0xec0   :  { %3081 = vmatprep.subr.mxu1 %v7481_v22  ;;  %3011 = vmatpush1.msra.mxu0 %v7487_v23 }
 0xec1   :  { %3082 = vmatpush1.msra.mxu1 %v7493_v24  ;;  %3012 = vmatprep.subr.mxu0 %v7499_v25 }
 0xec2   :  { %3083 = vmatprep.subr.mxu1 %v7505_v26  ;;  %3013 = vmatpush1.msra.mxu0 %v7511_v27 }
 0xec3   :  { %3084 = vmatpush1.msra.mxu1 %v7517_v28  ;;  %3014 = vmatprep.subr.mxu0 %v7523_v29 }
 0xec4   :  { %3085 = vmatprep.subr.mxu1 %v7529_v30  ;;  %3015 = vmatpush1.msra.mxu0 %v7535_v31 }
 0xec5   :  { %3086 = vmatpush1.msra.mxu1 %v7541_v32  ;;  %3016 = vmatprep.subr.mxu0 %v7547_v33 }
 0xec6   :  { %3087 = vmatprep.subr.mxu1 %v7553_v34  ;;  %3017 = vmatpush1.msra.mxu0 %v7559_v35 }
 0xec7   :  { %3088 = vmatpush1.msra.mxu1 %v7565_v36  ;;  %3018 = vmatprep.subr.mxu0 %v7571_v37 }
 0xec8   :  { %3089 = vmatprep.subr.mxu1 %v7577_v38  ;;  %3019 = vmatpush1.msra.mxu0 %v7583_v40 }
 0xec9   :  { %3090 = vmatpush1.msra.mxu1 %v7589_v43  ;;  %3020 = vmatprep.subr.mxu0 %v7595_v45 }
 0xeca   :  { %3091 = vmatprep.subr.mxu1 %v7601_v7  ;;  %3021 = vmatpush1.msra.mxu0 %v7607_v18 }
 0xecb   :  { %3092 = vmatpush1.msra.mxu1 %v7613_v57  ;;  %3022 = vmatprep.subr.mxu0 %v7619_v12 }
 0xecc   :  { %3093 = vmatprep.subr.mxu1 %v7625_v14  ;;  %3023 = vmatpush1.msra.mxu0 %v7631_v49 }
 0xecd   :  { %3094 = vmatpush1.msra.mxu1 %v7637_v15  ;;  %3024 = vmatprep.subr.mxu0 %v7643_v10 }
 0xece   :  { %3095 = vmatprep.subr.mxu1 %v7649_v61  ;;  %3025 = vmatpush1.msra.mxu0 %v7655_v20 }
 0xecf   :  { %3096 = vmatpush1.msra.mxu1 %v7661_v19  ;;  %3026 = vmatprep.subr.mxu0 %v7667_v5 }
 0xed0   :  { %3097 = vmatprep.subr.mxu1 %v7673_v2  ;;  %3027 = vmatpush1.msra.mxu0 %v9347_v41 }
 0xed1   :  { %3098 = vmatpush1.msra.mxu1 %v9348_v47  ;;  %3028 = vmatprep.subr.mxu0 %v9349_v51 }
 0xed2   :  { %3099 = vmatprep.subr.mxu1 %v9350_v4  ;;  %3029 = vmatpush1.msra.mxu0 %v9351_v55 }
 0xed3   :  { %3100 = vmatpush1.msra.mxu1 %v9352_v39  ;;  %3030 = vmatprep.subr.mxu0 %v9353_v9  ;;  %v9363_v39 = vld [vmem:[#allocation21_spill] sm:$0xff]  ;;  %v9364_v9 = vmov 0.0  }
 0xed4   :  { %3101 = vmatprep.subr.mxu1 %v9354_v58  ;;  %3031 = vmatpush1.msra.mxu0 %v9355_v3  ;;  %v9365_v58 = vld [vmem:[#allocation22_spill] sm:$0xff]  ;;  %v9369_v3 = vld [vmem:[#allocation24_spill] sm:$0xff] }
 0xed5   :  { %3102 = vmatpush1.msra.mxu1 %v9356_v42  ;;  %3032 = vmatprep.subr.mxu0 %v9357_v59  ;;  %v9366_v42 = vld [vmem:[#allocation25_spill] sm:$0xff]  ;;  %v9367_v59 = vld [vmem:[#allocation4_spill] sm:$0xff] }
 0xed6   :  { %3103 = vmatprep.subr.mxu1 %v9358_v56  ;;  %3033 = vmatpush1.msra.mxu0 %v9359_v62 }
 0xed7   :  { %3104 = vmatpush1.msra.mxu1 %v9360_v8  ;;  %3034 = vmatprep.subr.mxu0 %v9361_v63 }
 0xed8   :  { %3105 = vmatprep.subr.mxu1 %v9362_v17  ;;  %3035 = vmatpush1.msra.mxu0 %v9363_v39  ;;  %v9368_v17 = vld [vmem:[#allocation16_spill] sm:$0xff] }
 0xed9   :  { %3068 = vmatprep.mubr.f32.mxu0 %v9364_v9  ;;  %3106 = vmatpush1.msra.mxu1 %v9365_v58 }
 0xeda   :  { %3139 = vmatprep.mubr.f32.mxu1 %v9364_v9  ;;  %3172 = vmatprep.subr.mxu0 %v9366_v42 }
 0xedb   :  { %3243 = vmatprep.subr.mxu1 %v9367_v59 }
 0xf44   :  { %v4400_v56 = vpop.xlane.xlu0 %4399 }
 0xf45   :  { %4426 = vst.msk [vmem:[%s8856_s7 + $0x30] sm:$0xff] %vm4419_vm0, %v4400_v56 }
 0xf79   :  { %v2902_v63 = vpop.f32.mrf.mxu0  ;;  %v2973_v58 = vpop.f32.mrf.mxu1 }
 0xf7a   :  { %v2903_v8 = vadd.f32 %v2902_v63, %v9368_v17  ;;  %v2974_v47 = vadd.f32 %v2973_v58, %v7157_v44 }
 0xf7b   :  { %v2904_v39 = vpop.f32.mrf.mxu0  ;;  %v2975_v42 = vpop.f32.mrf.mxu1 }
 0xf7c   :  { %v4513_v62 = vmul.f32 -1.442695, %v2903_v8  ;;  %v2905_v55 = vadd.f32 %v2904_v39, %v9369_v3  ;;  %v2976_v59 = vadd.f32 %v2975_v42, %v9260_v50 }
 0xf7e   :  { %4782 = vpow2.f32 %v4513_v62  ;;  %v4514_v9 = vmul.f32 -1.442695, %v2905_v55  ;;  %v4515_v4 = vmul.f32 -1.442695, %v2976_v59  ;;  %v9373_v59 = vld [vmem:[#allocation5_spill] sm:$0xff] }
 0xf80   :  { %4784 = vpow2.f32 %v4514_v9 }
 0xf81   :  { %4786 = vpow2.f32 %v4515_v4 }
 0xf8b   :  { %v4783_v51 = vpop.eup %4782 }
 0xf8c   :  { %v2981_v41 = vadd.f32 1.0, %v4783_v51 }
 0xf8d   :  { %v4785_v56 = vpop.eup %4784 }
 0xf8e   :  { %4788 = vrcp.f32 %v2981_v41  ;;  %v2987_v63 = vadd.f32 1.0, %v4785_v56  ;;  %v4787_v8 = vpop.eup %4786  ;;  %v9375_v56 = vld [vmem:[#allocation12_spill] sm:$0xff] }
 0xf8f   :  { %4790 = vtanh.f32 %v2974_v47  ;;  %v2994_v55 = vadd.f32 1.0, %v4787_v8  ;;  %v9371_v47 = vld [vmem:[#allocation3_spill] sm:$0xff]  ;;  %v9377_v8 = vld [vmem:[#allocation6_spill] sm:$0xff] }
 0xf90   :  { %4792 = vrcp.f32 %v2987_v63  ;;  %v9376_v63 = vld [vmem:[#allocation9_spill] sm:$0xff] }
 0xf91   :  { %4794 = vrcp.f32 %v2994_v55  ;;  %v9380_v55 = vld [vmem:[#allocation11_spill] sm:$0xff] }
 0xf9b   :  { %v4789_v39 = vpop.eup %4788 }
 0xf9c   :  { %v4791_v62 = vpop.eup %4790 }
 0xf9d   :  { %v4793_v3 = vpop.eup %4792  ;;  %v2998_v9 = vmul.f32 %v4791_v62, %v4789_v39  ;;  %v9378_v39 = vld [vmem:[#allocation18_spill] sm:$0xff] }
 0xf9e   :  { %v2997_v17 = vmul.f32 %v4793_v3, %v7881_v21  ;;  %v4795_v51 = vpop.eup %4794  ;;  %v9370_v21 = vld [vmem:[#allocation10_spill] sm:$0xff]  ;;  %v9372_v3 = vld [vmem:[#allocation8_spill] sm:$0xff] }
 0xf9f   :  { %v9379_v62 = vld [vmem:[#allocation14_spill] sm:$0xff] }
 0xfa0   :  { %v7960_v42 = vadd.f32 %v2998_v9, %v2997_v17  ;;  %v9374_v17 = vld [vmem:[#allocation17_spill] sm:$0xff]  ;;  %v9381_v9 = vld [vmem:[#allocation7_spill] sm:$0xff] }
 0xfa2   :  { %4796 = vtanh.f32 %v7960_v42 }
 0xfaf   :  { %v4797_v58 = vpop.eup %4796 }
 0xfb0   :  { %v3001_v4 = vmul.f32 %v4797_v58, %v4795_v51  ;;  %v9382_v51 = vld [vmem:[#allocation19_spill] sm:$0xff]  ;;  %v9383_v58 = vld [vmem:[#allocation13_spill] sm:$0xff] }
 0xfb2   :  { %3069 = vmatmul.mubr.f32.vlgmr.msra.gmra.mxu0 %v3001_v4  ;;  %3140 = vmatmul.mubr.f32.vlgmr.msra.gmra.mxu1 %v3001_v4  ;;  %v4378_v41 = vmul.f32 %v7803_v46, %v3001_v4  ;;  %v9384_v4 = vld [vmem:[#allocation20_spill] sm:$0xff] }
 0xfb3   :  { %3173 = vmatpush1.msra.mxu0 %v7415_v53  ;;  %3244 = vmatpush1.msra.mxu1 %v7421_v13 }
 0xfb4   :  { %4401 = vadd.xlane.f32.xlu1 %v4378_v41  ;;  %3174 = vmatprep.subr.mxu0 %v7427_v54  ;;  %v9385_v41 = vld [vmem:[#allocation15_spill] sm:$0xff] }
 0xfb5   :  { %3245 = vmatprep.subr.mxu1 %v7433_v6  ;;  %3175 = vmatpush1.msra.mxu0 %v7439_v0 }
 0xfb6   :  { %3246 = vmatpush1.msra.mxu1 %v7445_v60  ;;  %3176 = vmatprep.subr.mxu0 %v7451_v52 }
 0xfb7   :  { %3247 = vmatprep.subr.mxu1 %v7457_v11  ;;  %3177 = vmatpush1.msra.mxu0 %v7463_v16 }
 0xfb8   :  { %3248 = vmatpush1.msra.mxu1 %v7469_v1  ;;  %3178 = vmatprep.subr.mxu0 %v7475_v48 }
 0xfb9   :  { %3249 = vmatprep.subr.mxu1 %v7481_v22  ;;  %3179 = vmatpush1.msra.mxu0 %v7487_v23 }
 0xfba   :  { %3250 = vmatpush1.msra.mxu1 %v7493_v24  ;;  %3180 = vmatprep.subr.mxu0 %v7499_v25 }
 0xfbb   :  { %3251 = vmatprep.subr.mxu1 %v7505_v26  ;;  %3181 = vmatpush1.msra.mxu0 %v7511_v27 }
 0xfbc   :  { %3252 = vmatpush1.msra.mxu1 %v7517_v28  ;;  %3182 = vmatprep.subr.mxu0 %v7523_v29 }
 0xfbd   :  { %3253 = vmatprep.subr.mxu1 %v7529_v30  ;;  %3183 = vmatpush1.msra.mxu0 %v7535_v31 }
 0xfbe   :  { %3254 = vmatpush1.msra.mxu1 %v7541_v32  ;;  %3184 = vmatprep.subr.mxu0 %v7547_v33 }
 0xfbf   :  { %3255 = vmatprep.subr.mxu1 %v7553_v34  ;;  %3185 = vmatpush1.msra.mxu0 %v7559_v35 }
 0xfc0   :  { %3256 = vmatpush1.msra.mxu1 %v7565_v36  ;;  %3186 = vmatprep.subr.mxu0 %v7571_v37 }
 0xfc1   :  { %3257 = vmatprep.subr.mxu1 %v7577_v38  ;;  %3187 = vmatpush1.msra.mxu0 %v7583_v40 }
 0xfc2   :  { %3258 = vmatpush1.msra.mxu1 %v7589_v43  ;;  %3188 = vmatprep.subr.mxu0 %v7595_v45 }
 0xfc3   :  { %3259 = vmatprep.subr.mxu1 %v7601_v7  ;;  %3189 = vmatpush1.msra.mxu0 %v7607_v18 }
 0xfc4   :  { %3260 = vmatpush1.msra.mxu1 %v7613_v57  ;;  %3190 = vmatprep.subr.mxu0 %v7619_v12 }
 0xfc5   :  { %3261 = vmatprep.subr.mxu1 %v7625_v14  ;;  %3191 = vmatpush1.msra.mxu0 %v7631_v49 }
 0xfc6   :  { %3262 = vmatpush1.msra.mxu1 %v7637_v15  ;;  %3192 = vmatprep.subr.mxu0 %v7643_v10 }
 0xfc7   :  { %3263 = vmatprep.subr.mxu1 %v7649_v61  ;;  %3193 = vmatpush1.msra.mxu0 %v7655_v20 }
 0xfc8   :  { %3264 = vmatpush1.msra.mxu1 %v7661_v19  ;;  %3194 = vmatprep.subr.mxu0 %v7667_v5 }
 0xfc9   :  { %3265 = vmatprep.subr.mxu1 %v7673_v2  ;;  %3195 = vmatpush1.msra.mxu0 %v9370_v21 }
 0xfca   :  { %3266 = vmatpush1.msra.mxu1 %v9371_v47  ;;  %3196 = vmatprep.subr.mxu0 %v9372_v3 }
 0xfcb   :  { %3267 = vmatprep.subr.mxu1 %v9373_v59  ;;  %3197 = vmatpush1.msra.mxu0 %v9374_v17 }
 0xfcc   :  { %3268 = vmatpush1.msra.mxu1 %v9375_v56  ;;  %3198 = vmatprep.subr.mxu0 %v9376_v63  ;;  %v9386_v56 = vld [vmem:[#allocation21_spill] sm:$0xff]  ;;  %v9387_v63 = vmov 0.0  }
 0xfcd   :  { %3269 = vmatprep.subr.mxu1 %v9377_v8  ;;  %3199 = vmatpush1.msra.mxu0 %v9378_v39  ;;  %v9388_v8 = vld [vmem:[#allocation22_spill] sm:$0xff]  ;;  %v9392_v39 = vld [vmem:[#allocation24_spill] sm:$0xff] }
 0xfce   :  { %3270 = vmatpush1.msra.mxu1 %v9379_v62  ;;  %3200 = vmatprep.subr.mxu0 %v9380_v55  ;;  %v9389_v62 = vld [vmem:[#allocation25_spill] sm:$0xff]  ;;  %v9390_v55 = vld [vmem:[#allocation4_spill] sm:$0xff] }
 0xfcf   :  { %3271 = vmatprep.subr.mxu1 %v9381_v9  ;;  %3201 = vmatpush1.msra.mxu0 %v9382_v51 }
 0xfd0   :  { %3272 = vmatpush1.msra.mxu1 %v9383_v58  ;;  %3202 = vmatprep.subr.mxu0 %v9384_v4 }
 0xfd1   :  { %3273 = vmatprep.subr.mxu1 %v9385_v41  ;;  %3203 = vmatpush1.msra.mxu0 %v9386_v56  ;;  %v9391_v41 = vld [vmem:[#allocation16_spill] sm:$0xff] }
 0xfd2   :  { %3236 = vmatprep.mubr.f32.mxu0 %v9387_v63  ;;  %3274 = vmatpush1.msra.mxu1 %v9388_v8 }
 0xfd3   :  { %3307 = vmatprep.mubr.f32.mxu1 %v9387_v63  ;;  %3340 = vmatprep.subr.mxu0 %v9389_v62 }
 0xfd4   :  { %3411 = vmatprep.subr.mxu1 %v9390_v55 }
0x103d   :  { %v4402_v9 = vpop.xlane.xlu1 %4401 }
0x103e   :  { %4427 = vst.msk [vmem:[%s8856_s7 + $0x38] sm:$0xff] %vm4419_vm0, %v4402_v9 }
0x1072   :  { %v3070_v4 = vpop.f32.mrf.mxu0  ;;  %v3141_v8 = vpop.f32.mrf.mxu1 }
0x1073   :  { %v3071_v58 = vadd.f32 %v3070_v4, %v9391_v41  ;;  %v3142_v47 = vadd.f32 %v3141_v8, %v7157_v44 }
0x1074   :  { %v3072_v56 = vpop.f32.mrf.mxu0  ;;  %v3143_v62 = vpop.f32.mrf.mxu1 }
0x1075   :  { %v4516_v51 = vmul.f32 -1.442695, %v3071_v58  ;;  %v3073_v17 = vadd.f32 %v3072_v56, %v9392_v39  ;;  %v3144_v55 = vadd.f32 %v3143_v62, %v9260_v50 }
0x1077   :  { %4798 = vpow2.f32 %v4516_v51  ;;  %v4517_v63 = vmul.f32 -1.442695, %v3073_v17  ;;  %v4518_v59 = vmul.f32 -1.442695, %v3144_v55 }
0x1079   :  { %4800 = vpow2.f32 %v4517_v63 }
0x107a   :  { %4802 = vpow2.f32 %v4518_v59 }
0x1084   :  { %v4799_v3 = vpop.eup %4798 }
0x1085   :  { %v3149_v21 = vadd.f32 1.0, %v4799_v3 }
0x1086   :  { %v4801_v9 = vpop.eup %4800 }
0x1087   :  { %4804 = vrcp.f32 %v3149_v21  ;;  %v3155_v4 = vadd.f32 1.0, %v4801_v9  ;;  %v4803_v58 = vpop.eup %4802 }
0x1088   :  { %4806 = vtanh.f32 %v3142_v47  ;;  %v3162_v17 = vadd.f32 1.0, %v4803_v58  ;;  %v8135_v58 = vld [vmem:[%s8853_s4 + $0x1e0] sm:$0xff] }
0x1089   :  { %4808 = vrcp.f32 %v3155_v4 }
0x108a   :  { %4810 = vrcp.f32 %v3162_v17  ;;  %v8159_v17 = vld [vmem:[%s8853_s4 + $0x1c0] sm:$0xff] }
0x1094   :  { %v4805_v56 = vpop.eup %4804 }
0x1095   :  { %v4807_v51 = vpop.eup %4806 }
0x1096   :  { %v4809_v39 = vpop.eup %4808  ;;  %v3166_v63 = vmul.f32 %v4807_v51, %v4805_v56  ;;  %v8141_v56 = vld [vmem:[%s8853_s4 + $0x1f0] sm:$0xff]  ;;  %v8147_v51 = vld [vmem:[%s8853_s4 + $0x1c8] sm:$0xff] }
0x1097   :  { %v3165_v41 = vmul.f32 %v4809_v39, %v7960_v42  ;;  %v4811_v3 = vpop.eup %4810 }
0x1099   :  { %v8039_v62 = vadd.f32 %v3166_v63, %v3165_v41  ;;  %v8165_v63 = vld [vmem:[%s8853_s4 + $0x1d0] sm:$0xff] }
0x109b   :  { %4812 = vtanh.f32 %v8039_v62 }
0x10a8   :  { %v4813_v8 = vpop.eup %4812 }
0x10a9   :  { %v3169_v59 = vmul.f32 %v4813_v8, %v4811_v3  ;;  %v8177_v3 = vld [vmem:[%s8853_s4 + $0x1b8] sm:$0xff]  ;;  %v8183_v8 = vld [vmem:[%s8853_s4 + $0x1a0] sm:$0xff] }
0x10ab   :  { %3237 = vmatmul.mubr.f32.vlgmr.msra.gmra.mxu0 %v3169_v59  ;;  %3308 = vmatmul.mubr.f32.vlgmr.msra.gmra.mxu1 %v3169_v59  ;;  %v4379_v21 = vmul.f32 %v7803_v46, %v3169_v59  ;;  %v8189_v59 = vld [vmem:[%s8853_s4 + $0x1b0] sm:$0xff] }
0x10ac   :  { %3341 = vmatpush1.msra.mxu0 %v7415_v53  ;;  %3412 = vmatpush1.msra.mxu1 %v7421_v13  ;;  %v9393_v53 = vld [vmem:[#allocation10_spill] sm:$0xff]  ;;  %v9394_v13 = vld [vmem:[#allocation3_spill] sm:$0xff] }
0x10ad   :  { %4403 = vadd.xlane.f32.xlu0 %v4379_v21  ;;  %3342 = vmatprep.subr.mxu0 %v7427_v54  ;;  %v9395_v54 = vld [vmem:[#allocation8_spill] sm:$0xff] }
0x10ae   :  { %3413 = vmatprep.subr.mxu1 %v7433_v6  ;;  %3343 = vmatpush1.msra.mxu0 %v7439_v0  ;;  %v9396_v6 = vld [vmem:[#allocation5_spill] sm:$0xff]  ;;  %v8195_v21 = vld [vmem:[%s8853_s4 + $0x188] sm:$0xff] }
0x10af   :  { %3414 = vmatpush1.msra.mxu1 %v7445_v60  ;;  %3344 = vmatprep.subr.mxu0 %v7451_v52  ;;  %v9397_v0 = vld [vmem:[#allocation17_spill] sm:$0xff]  ;;  %v9398_v60 = vld [vmem:[#allocation12_spill] sm:$0xff] }
0x10b0   :  { %3415 = vmatprep.subr.mxu1 %v7457_v11  ;;  %3345 = vmatpush1.msra.mxu0 %v7463_v16  ;;  %v9399_v52 = vld [vmem:[#allocation9_spill] sm:$0xff]  ;;  %v9400_v11 = vld [vmem:[#allocation6_spill] sm:$0xff] }
0x10b1   :  { %3416 = vmatpush1.msra.mxu1 %v7469_v1  ;;  %3346 = vmatprep.subr.mxu0 %v7475_v48  ;;  %v9401_v16 = vld [vmem:[#allocation18_spill] sm:$0xff]  ;;  %v9403_v48 = vld [vmem:[#allocation11_spill] sm:$0xff] }
0x10b2   :  { %3417 = vmatprep.subr.mxu1 %v7481_v22  ;;  %3347 = vmatpush1.msra.mxu0 %v7487_v23  ;;  %v9402_v1 = vld [vmem:[#allocation14_spill] sm:$0xff]  ;;  %v9404_v22 = vld [vmem:[#allocation7_spill] sm:$0xff] }
0x10b3   :  { %3418 = vmatpush1.msra.mxu1 %v7493_v24  ;;  %3348 = vmatprep.subr.mxu0 %v7499_v25  ;;  %v9405_v23 = vld [vmem:[#allocation19_spill] sm:$0xff]  ;;  %v9406_v24 = vld [vmem:[#allocation13_spill] sm:$0xff]  ;;  %v9407_v25 = vld [vmem:[#allocation20_spill] sm:$0xff] }
0x10b4   :  { %3419 = vmatprep.subr.mxu1 %v7505_v26  ;;  %3349 = vmatpush1.msra.mxu0 %v7511_v27  ;;  %v9408_v26 = vld [vmem:[#allocation15_spill] sm:$0xff]  ;;  %v9409_v27 = vld [vmem:[#allocation21_spill] sm:$0xff] }
0x10b5   :  { %3420 = vmatpush1.msra.mxu1 %v7517_v28  ;;  %3350 = vmatprep.subr.mxu0 %v7523_v29  ;;  %v9410_v28 = vmov 0.0   ;;  %v9411_v29 = vld [vmem:[#allocation22_spill] sm:$0xff] }
0x10b6   :  { %3421 = vmatprep.subr.mxu1 %v7529_v30  ;;  %3351 = vmatpush1.msra.mxu0 %v7535_v31  ;;  %v8110_v30 = vld [vmem:[%s8853_s4 + $0x1e8] sm:$0xff]  ;;  %v8116_v31 = vld [vmem:[%s8853_s4 + $0x1f8] sm:$0xff] }
0x10b7   :  { %3422 = vmatpush1.msra.mxu1 %v7541_v32  ;;  %3352 = vmatprep.subr.mxu0 %v7547_v33  ;;  %9412 = vst [vmem:[#allocation23_spill] sm:$0xff] %v8110_v30  ;;  %9413 = vst [vmem:[#allocation25_spill] sm:$0xff] %v8116_v31 }
0x10b8   :  { %3423 = vmatprep.subr.mxu1 %v7553_v34  ;;  %3353 = vmatpush1.msra.mxu0 %v7559_v35  ;;  %v9414_v34 = vld [vmem:[#allocation16_spill] sm:$0xff] }
0x10b9   :  { %3424 = vmatpush1.msra.mxu1 %v7565_v36  ;;  %3354 = vmatprep.subr.mxu0 %v7571_v37 }
0x10ba   :  { %3425 = vmatprep.subr.mxu1 %v7577_v38  ;;  %3355 = vmatpush1.msra.mxu0 %v7583_v40  ;;  %v9415_v38 = vld [vmem:[#allocation24_spill] sm:$0xff] }
0x10bb   :  { %3426 = vmatpush1.msra.mxu1 %v7589_v43  ;;  %3356 = vmatprep.subr.mxu0 %v7595_v45 }
0x10bc   :  { %3427 = vmatprep.subr.mxu1 %v7601_v7  ;;  %3357 = vmatpush1.msra.mxu0 %v7607_v18 }
0x10bd   :  { %3428 = vmatpush1.msra.mxu1 %v7613_v57  ;;  %3358 = vmatprep.subr.mxu0 %v7619_v12 }
0x10be   :  { %3429 = vmatprep.subr.mxu1 %v7625_v14  ;;  %3359 = vmatpush1.msra.mxu0 %v7631_v49 }
0x10bf   :  { %3430 = vmatpush1.msra.mxu1 %v7637_v15  ;;  %3360 = vmatprep.subr.mxu0 %v7643_v10 }
0x10c0   :  { %3431 = vmatprep.subr.mxu1 %v7649_v61  ;;  %3361 = vmatpush1.msra.mxu0 %v7655_v20 }
0x10c1   :  { %3432 = vmatpush1.msra.mxu1 %v7661_v19  ;;  %3362 = vmatprep.subr.mxu0 %v7667_v5 }
0x10c2   :  { %3433 = vmatprep.subr.mxu1 %v7673_v2  ;;  %3363 = vmatpush1.msra.mxu0 %v9393_v53  ;;  %v8201_v53 = vld [vmem:[%s8853_s4 + $0x198] sm:$0xff] }
0x10c3   :  { %3434 = vmatpush1.msra.mxu1 %v9394_v13  ;;  %3364 = vmatprep.subr.mxu0 %v9395_v54  ;;  %v8207_v13 = vld [vmem:[%s8853_s4 + $0x180] sm:$0xff]  ;;  %v8213_v54 = vld [vmem:[%s8853_s4 + $0x190] sm:$0xff] }
0x10c4   :  { %3435 = vmatprep.subr.mxu1 %v9396_v6  ;;  %3365 = vmatpush1.msra.mxu0 %v9397_v0  ;;  %v8219_v6 = vld [vmem:[%s8853_s4 + $0x168] sm:$0xff]  ;;  %v8225_v0 = vld [vmem:[%s8853_s4 + $0x178] sm:$0xff] }
0x10c5   :  { %3436 = vmatpush1.msra.mxu1 %v9398_v60  ;;  %3366 = vmatprep.subr.mxu0 %v9399_v52  ;;  %v8231_v60 = vld [vmem:[%s8853_s4 + $0x160] sm:$0xff]  ;;  %v8237_v52 = vld [vmem:[%s8853_s4 + $0x170] sm:$0xff] }
0x10c6   :  { %3437 = vmatprep.subr.mxu1 %v9400_v11  ;;  %3367 = vmatpush1.msra.mxu0 %v9401_v16  ;;  %v8243_v11 = vld [vmem:[%s8853_s4 + $0x148] sm:$0xff]  ;;  %v8249_v16 = vld [vmem:[%s8853_s4 + $0x158] sm:$0xff] }
0x10c7   :  { %3438 = vmatpush1.msra.mxu1 %v9402_v1  ;;  %3368 = vmatprep.subr.mxu0 %v9403_v48  ;;  %v8255_v1 = vld [vmem:[%s8853_s4 + $0x140] sm:$0xff]  ;;  %v8261_v48 = vld [vmem:[%s8853_s4 + $0x150] sm:$0xff] }
0x10c8   :  { %3439 = vmatprep.subr.mxu1 %v9404_v22  ;;  %3369 = vmatpush1.msra.mxu0 %v9405_v23  ;;  %v8267_v22 = vld [vmem:[%s8853_s4 + $0x128] sm:$0xff]  ;;  %v8273_v23 = vld [vmem:[%s8853_s4 + $0x138] sm:$0xff] }
0x10c9   :  { %3440 = vmatpush1.msra.mxu1 %v9406_v24  ;;  %3370 = vmatprep.subr.mxu0 %v9407_v25  ;;  %v8279_v24 = vld [vmem:[%s8853_s4 + $0x120] sm:$0xff]  ;;  %v8285_v25 = vld [vmem:[%s8853_s4 + $0x130] sm:$0xff] }
0x10ca   :  { %3441 = vmatprep.subr.mxu1 %v9408_v26  ;;  %3371 = vmatpush1.msra.mxu0 %v9409_v27  ;;  %v8291_v26 = vld [vmem:[%s8853_s4 + $0x108] sm:$0xff]  ;;  %v8297_v27 = vld [vmem:[%s8853_s4 + $0x118] sm:$0xff] }
0x10cb   :  { %3404 = vmatprep.mubr.f32.mxu0 %v9410_v28  ;;  %3442 = vmatpush1.msra.mxu1 %v9411_v29  ;;  %v8303_v29 = vld [vmem:[%s8853_s4 + $0x100] sm:$0xff] }
0x10cc   :  { %3475 = vmatprep.mubr.f32.mxu1 %v9410_v28  ;;  %3508 = vmatprep.subr.mxu0 %v8110_v30 }
0x10cd   :  { %3579 = vmatprep.subr.mxu1 %v8116_v31 }
0x1136   :  { %v4404_v32 = vpop.xlane.xlu0 %4403 }
0x1137   :  { %4428 = vst.msk [vmem:[%s8856_s7 + $0x40] sm:$0xff] %vm4419_vm0, %v4404_v32  ;;  %v8309_v32 = vld [vmem:[%s8853_s4 + $0x110] sm:$0xff] }
0x116b   :  { %v3238_v33 = vpop.f32.mrf.mxu0  ;;  %v3309_v43 = vpop.f32.mrf.mxu1 }
0x116c   :  { %v3239_v35 = vadd.f32 %v3238_v33, %v9414_v34  ;;  %v3310_v14 = vadd.f32 %v3309_v43, %v7157_v44  ;;  %v8315_v33 = vld [vmem:[%s8853_s4 + $0xe8] sm:$0xff]  ;;  %v8345_v43 = vld [vmem:[%s8853_s4 + $0xd8] sm:$0xff] }
0x116d   :  { %v3240_v36 = vpop.f32.mrf.mxu0  ;;  %v3311_v7 = vpop.f32.mrf.mxu1 }
0x116e   :  { %v4519_v37 = vmul.f32 -1.442695, %v3239_v35  ;;  %v3241_v40 = vadd.f32 %v3240_v36, %v9415_v38  ;;  %v3312_v18 = vadd.f32 %v3311_v7, %v9260_v50  ;;  %v8321_v35 = vld [vmem:[%s8853_s4 + $0xf8] sm:$0xff]  ;;  %v8327_v36 = vld [vmem:[%s8853_s4 + $0xe0] sm:$0xff]  ;;  %v8357_v7 = vld [vmem:[%s8853_s4 + $0xd0] sm:$0xff] }
0x1170   :  { %4814 = vpow2.f32 %v4519_v37  ;;  %v4520_v45 = vmul.f32 -1.442695, %v3241_v40  ;;  %v4521_v57 = vmul.f32 -1.442695, %v3312_v18  ;;  %v8333_v37 = vld [vmem:[%s8853_s4 + $0xf0] sm:$0xff]  ;;  %v8339_v40 = vld [vmem:[%s8853_s4 + $0xc8] sm:$0xff] }
0x1171   :  { %v8363_v18 = vld [vmem:[%s8853_s4 + $0xa8] sm:$0xff] }
0x1172   :  { %4816 = vpow2.f32 %v4520_v45  ;;  %v8351_v45 = vld [vmem:[%s8853_s4 + $0xc0] sm:$0xff] }
0x1173   :  { %4818 = vpow2.f32 %v4521_v57  ;;  %v8369_v57 = vld [vmem:[%s8853_s4 + $0xb8] sm:$0xff] }
0x117d   :  { %v4815_v12 = vpop.eup %4814 }
0x117e   :  { %v3317_v49 = vadd.f32 1.0, %v4815_v12  ;;  %v8375_v12 = vld [vmem:[%s8853_s4 + $0xa0] sm:$0xff] }
0x117f   :  { %v4817_v15 = vpop.eup %4816 }
0x1180   :  { %4820 = vrcp.f32 %v3317_v49  ;;  %v3323_v10 = vadd.f32 1.0, %v4817_v15  ;;  %v4819_v61 = vpop.eup %4818  ;;  %v8387_v49 = vld [vmem:[%s8853_s4 + $0x88] sm:$0xff]  ;;  %v8393_v15 = vld [vmem:[%s8853_s4 + $0x98] sm:$0xff] }
0x1181   :  { %4822 = vtanh.f32 %v3310_v14  ;;  %v3330_v2 = vadd.f32 1.0, %v4819_v61  ;;  %v8381_v14 = vld [vmem:[%s8853_s4 + $0xb0] sm:$0xff] }
0x1182   :  { %4824 = vrcp.f32 %v3323_v10  ;;  %v8399_v10 = vld [vmem:[%s8853_s4 + $0x80] sm:$0xff]  ;;  %v8405_v61 = vld [vmem:[%s8853_s4 + $0x90] sm:$0xff] }
0x1183   :  { %4826 = vrcp.f32 %v3330_v2  ;;  %9416 = vst [vmem:[#allocation4_spill] sm:$0xff] %v8399_v10  ;;  %9417 = vst [vmem:[#allocation10_spill] sm:$0xff] %v8405_v61  ;;  %v8429_v2 = vld [vmem:[%s8853_s4 + $0x70] sm:$0xff] }
0x1184   :  { %9421 = vst [vmem:[#allocation17_spill] sm:$0xff] %v8429_v2 }
0x118d   :  { %v4821_v20 = vpop.eup %4820 }
0x118e   :  { %v4823_v19 = vpop.eup %4822 }
0x118f   :  { %v4825_v5 = vpop.eup %4824  ;;  %v3334_v42 = vmul.f32 %v4823_v19, %v4821_v20  ;;  %v8411_v20 = vld [vmem:[%s8853_s4 + $0x68] sm:$0xff]  ;;  %v8417_v19 = vld [vmem:[%s8853_s4 + $0x78] sm:$0xff] }
0x1190   :  { %v3333_v47 = vmul.f32 %v4825_v5, %v8039_v62  ;;  %v4827_v41 = vpop.eup %4826  ;;  %v8171_v62 = vld [vmem:[%s8853_s4 + $0x1a8] sm:$0xff]  ;;  %9418 = vst [vmem:[#allocation3_spill] sm:$0xff] %v8411_v20  ;;  %9419 = vst [vmem:[#allocation8_spill] sm:$0xff] %v8417_v19  ;;  %v8423_v5 = vld [vmem:[%s8853_s4 + $0x60] sm:$0xff] }
0x1191   :  { %9420 = vst [vmem:[#allocation5_spill] sm:$0xff] %v8423_v5 }
0x1192   :  { %v8128_v39 = vadd.f32 %v3334_v42, %v3333_v47  ;;  %v8435_v42 = vld [vmem:[%s8853_s4 + $0x48] sm:$0xff]  ;;  %v8441_v47 = vld [vmem:[%s8853_s4 + $0x58] sm:$0xff] }
0x1193   :  { %9422 = vst [vmem:[#allocation12_spill] sm:$0xff] %v8435_v42  ;;  %9423 = vst [vmem:[#allocation9_spill] sm:$0xff] %v8441_v47 }
0x1194   :  { %4828 = vtanh.f32 %v8128_v39 }
0x11a1   :  { %v4829_v55 = vpop.eup %4828 }
0x11a2   :  { %v3337_v9 = vmul.f32 %v4829_v55, %v4827_v41  ;;  %v8447_v41 = vld [vmem:[%s8853_s4 + $0x40] sm:$0xff]  ;;  %v8453_v55 = vld [vmem:[%s8853_s4 + $0x50] sm:$0xff] }
0x11a3   :  { %9424 = vst [vmem:[#allocation6_spill] sm:$0xff] %v8447_v41  ;;  %9425 = vst [vmem:[#allocation18_spill] sm:$0xff] %v8453_v55 }
0x11a4   :  { %3405 = vmatmul.mubr.f32.vlgmr.msra.gmra.mxu0 %v3337_v9  ;;  %3476 = vmatmul.mubr.f32.vlgmr.msra.gmra.mxu1 %v3337_v9  ;;  %v4380_v4 = vmul.f32 %v7803_v46, %v3337_v9  ;;  %v8153_v46 = vld [vmem:[%s8853_s4 + $0x1d8] sm:$0xff]  ;;  %v8459_v9 = vld [vmem:[%s8853_s4 + $0x28] sm:$0xff] }
0x11a5   :  { %3509 = vmatpush1.msra.mxu0 %v8135_v58  ;;  %3580 = vmatpush1.msra.mxu1 %v8141_v56  ;;  %9426 = vst [vmem:[#allocation14_spill] sm:$0xff] %v8459_v9 }
0x11a6   :  { %4405 = vadd.xlane.f32.xlu1 %v4380_v4  ;;  %3510 = vmatprep.subr.mxu0 %v8147_v51  ;;  %v8465_v4 = vld [vmem:[%s8853_s4 + $0x38] sm:$0xff] }
0x11a7   :  { %3581 = vmatprep.subr.mxu1 %v8153_v46  ;;  %3511 = vmatpush1.msra.mxu0 %v8159_v17  ;;  %9427 = vst [vmem:[#allocation11_spill] sm:$0xff] %v8465_v4 }
0x11a8   :  { %3582 = vmatpush1.msra.mxu1 %v8165_v63  ;;  %3512 = vmatprep.subr.mxu0 %v8171_v62 }
0x11a9   :  { %3583 = vmatprep.subr.mxu1 %v8177_v3  ;;  %3513 = vmatpush1.msra.mxu0 %v8183_v8 }
0x11aa   :  { %3584 = vmatpush1.msra.mxu1 %v8189_v59  ;;  %3514 = vmatprep.subr.mxu0 %v8195_v21 }
0x11ab   :  { %3585 = vmatprep.subr.mxu1 %v8201_v53  ;;  %3515 = vmatpush1.msra.mxu0 %v8207_v13 }
0x11ac   :  { %3586 = vmatpush1.msra.mxu1 %v8213_v54  ;;  %3516 = vmatprep.subr.mxu0 %v8219_v6 }
0x11ad   :  { %3587 = vmatprep.subr.mxu1 %v8225_v0  ;;  %3517 = vmatpush1.msra.mxu0 %v8231_v60 }
0x11ae   :  { %3588 = vmatpush1.msra.mxu1 %v8237_v52  ;;  %3518 = vmatprep.subr.mxu0 %v8243_v11 }
0x11af   :  { %3589 = vmatprep.subr.mxu1 %v8249_v16  ;;  %3519 = vmatpush1.msra.mxu0 %v8255_v1 }
0x11b0   :  { %3590 = vmatpush1.msra.mxu1 %v8261_v48  ;;  %3520 = vmatprep.subr.mxu0 %v8267_v22 }
0x11b1   :  { %3591 = vmatprep.subr.mxu1 %v8273_v23  ;;  %3521 = vmatpush1.msra.mxu0 %v8279_v24 }
0x11b2   :  { %3592 = vmatpush1.msra.mxu1 %v8285_v25  ;;  %3522 = vmatprep.subr.mxu0 %v8291_v26 }
0x11b3   :  { %3593 = vmatprep.subr.mxu1 %v8297_v27  ;;  %3523 = vmatpush1.msra.mxu0 %v8303_v29 }
0x11b4   :  { %3594 = vmatpush1.msra.mxu1 %v8309_v32  ;;  %3524 = vmatprep.subr.mxu0 %v8315_v33 }
0x11b5   :  { %3595 = vmatprep.subr.mxu1 %v8321_v35  ;;  %3525 = vmatpush1.msra.mxu0 %v8327_v36 }
0x11b6   :  { %3596 = vmatpush1.msra.mxu1 %v8333_v37  ;;  %3526 = vmatprep.subr.mxu0 %v8339_v40 }
0x11b7   :  { %3597 = vmatprep.subr.mxu1 %v8345_v43  ;;  %3527 = vmatpush1.msra.mxu0 %v8351_v45 }
0x11b8   :  { %3598 = vmatpush1.msra.mxu1 %v8357_v7  ;;  %3528 = vmatprep.subr.mxu0 %v8363_v18 }
0x11b9   :  { %3599 = vmatprep.subr.mxu1 %v8369_v57  ;;  %3529 = vmatpush1.msra.mxu0 %v8375_v12 }
0x11ba   :  { %3600 = vmatpush1.msra.mxu1 %v8381_v14  ;;  %3530 = vmatprep.subr.mxu0 %v8387_v49 }
0x11bb   :  { %3601 = vmatprep.subr.mxu1 %v8393_v15  ;;  %3531 = vmatpush1.msra.mxu0 %v8399_v10 }
0x11bc   :  { %3602 = vmatpush1.msra.mxu1 %v8405_v61  ;;  %3532 = vmatprep.subr.mxu0 %v8411_v20 }
0x11bd   :  { %3603 = vmatprep.subr.mxu1 %v8417_v19  ;;  %3533 = vmatpush1.msra.mxu0 %v8423_v5 }
0x11be   :  { %3604 = vmatpush1.msra.mxu1 %v8429_v2  ;;  %3534 = vmatprep.subr.mxu0 %v8435_v42 }
0x11bf   :  { %3605 = vmatprep.subr.mxu1 %v8441_v47  ;;  %3535 = vmatpush1.msra.mxu0 %v8447_v41  ;;  %v8471_v41 = vld [vmem:[%s8853_s4 + $0x20] sm:$0xff] }
0x11c0   :  { %3606 = vmatpush1.msra.mxu1 %v8453_v55  ;;  %3536 = vmatprep.subr.mxu0 %v8459_v9  ;;  %9428 = vst [vmem:[#allocation7_spill] sm:$0xff] %v8471_v41  ;;  %v8477_v55 = vld [vmem:[%s8853_s4 + $0x30] sm:$0xff]  ;;  %v8483_v9 = vld [vmem:[%s8853_s4 + $0x8] sm:$0xff] }
0x11c1   :  { %3607 = vmatprep.subr.mxu1 %v8465_v4  ;;  %3537 = vmatpush1.msra.mxu0 %v8471_v41  ;;  %9429 = vst [vmem:[#allocation19_spill] sm:$0xff] %v8477_v55  ;;  %9430 = vst [vmem:[#allocation13_spill] sm:$0xff] %v8483_v9  ;;  %v8489_v4 = vld [vmem:[%s8853_s4 + $0x18] sm:$0xff]  ;;  %v8495_v41 = vld [vmem:[%s8853_s4] sm:$0xff] }
0x11c2   :  { %3608 = vmatpush1.msra.mxu1 %v8477_v55  ;;  %3538 = vmatprep.subr.mxu0 %v8483_v9  ;;  %9431 = vst [vmem:[#allocation20_spill] sm:$0xff] %v8489_v4  ;;  %9432 = vst [vmem:[#allocation15_spill] sm:$0xff] %v8495_v41  ;;  %v8502_v9 = vld [vmem:[%s8853_s4 + $0x10] sm:$0xff] }
0x11c3   :  { %3609 = vmatprep.subr.mxu1 %v8489_v4  ;;  %3539 = vmatpush1.msra.mxu0 %v8495_v41  ;;  %9433 = vst [vmem:[#allocation21_spill] sm:$0xff] %v8502_v9 }
0x11c4   :  { %3572 = vmatprep.mubr.f32.mxu0 %v9410_v28  ;;  %3610 = vmatpush1.msra.mxu1 %v8502_v9 }
0x11c5   :  { %3643 = vmatprep.mubr.f32.mxu1 %v9410_v28  ;;  %3676 = vmatprep.subr.mxu0 %v8110_v30 }
0x11c6   :  { %3747 = vmatprep.subr.mxu1 %v8116_v31 }
0x122f   :  { %v4406_v4 = vpop.xlane.xlu1 %4405 }
0x1230   :  { %4429 = vst.msk [vmem:[%s8856_s7 + $0x48] sm:$0xff] %vm4419_vm0, %v4406_v4 }
0x1264   :  { %v3406_v41 = vpop.f32.mrf.mxu0  ;;  %v3477_v9 = vpop.f32.mrf.mxu1 }
0x1265   :  { %v3407_v55 = vadd.f32 %v3406_v41, %v9414_v34  ;;  %v3478_v20 = vadd.f32 %v3477_v9, %v7157_v44  ;;  %v9437_v9 = vld [vmem:[#allocation5_spill] sm:$0xff] }
0x1266   :  { %v3408_v47 = vpop.f32.mrf.mxu0  ;;  %v3479_v30 = vpop.f32.mrf.mxu1 }
0x1267   :  { %v4522_v42 = vmul.f32 -1.442695, %v3407_v55  ;;  %v3409_v2 = vadd.f32 %v3408_v47, %v9415_v38  ;;  %v3480_v31 = vadd.f32 %v3479_v30, %v9260_v50 }
0x1269   :  { %4830 = vpow2.f32 %v4522_v42  ;;  %v4523_v28 = vmul.f32 -1.442695, %v3409_v2  ;;  %v4524_v5 = vmul.f32 -1.442695, %v3480_v31 }
0x126b   :  { %4832 = vpow2.f32 %v4523_v28 }
0x126c   :  { %4834 = vpow2.f32 %v4524_v5 }
0x1276   :  { %v4831_v19 = vpop.eup %4830 }
0x1277   :  { %v3485_v61 = vadd.f32 1.0, %v4831_v19 }
0x1278   :  { %v4833_v4 = vpop.eup %4832 }
0x1279   :  { %4836 = vrcp.f32 %v3485_v61  ;;  %v3491_v41 = vadd.f32 1.0, %v4833_v4  ;;  %v4835_v55 = vpop.eup %4834  ;;  %v8523_v61 = vld [vmem:[%s8855_s6] ss:$0 sm:$0xff]  ;;  %v9438_v4 = vld [vmem:[#allocation17_spill] sm:$0xff] }
0x127a   :  { %4838 = vtanh.f32 %v3478_v20  ;;  %v3498_v2 = vadd.f32 1.0, %v4835_v55  ;;  %v9440_v55 = vld [vmem:[#allocation9_spill] sm:$0xff] }
0x127b   :  { %4840 = vrcp.f32 %v3491_v41  ;;  %v9439_v41 = vld [vmem:[#allocation12_spill] sm:$0xff] }
0x127c   :  { %4842 = vrcp.f32 %v3498_v2  ;;  %v9443_v2 = vld [vmem:[#allocation14_spill] sm:$0xff] }
0x1286   :  { %v4837_v47 = vpop.eup %4836 }
0x1287   :  { %v4839_v42 = vpop.eup %4838 }
0x1288   :  { %v4841_v38 = vpop.eup %4840  ;;  %v3502_v28 = vmul.f32 %v4839_v42, %v4837_v47  ;;  %v9441_v47 = vld [vmem:[#allocation6_spill] sm:$0xff] }
0x1289   :  { %v3501_v34 = vmul.f32 %v4841_v38, %v8128_v39  ;;  %v4843_v31 = vpop.eup %4842  ;;  %v9435_v38 = vld [vmem:[#allocation3_spill] sm:$0xff]  ;;  %v9436_v39 = vld [vmem:[#allocation8_spill] sm:$0xff]  ;;  %v9442_v42 = vld [vmem:[#allocation18_spill] sm:$0xff] }
0x128b   :  { %v8517_v30 = vadd.f32 %v3502_v28, %v3501_v34  ;;  %v9434_v34 = vld [vmem:[#allocation10_spill] sm:$0xff]  ;;  %v9444_v28 = vld [vmem:[#allocation11_spill] sm:$0xff] }
0x128d   :  { %4844 = vtanh.f32 %v8517_v30 }
0x129a   :  { %v4845_v19 = vpop.eup %4844 }
0x129b   :  { %v3505_v5 = vmul.f32 %v4845_v19, %v4843_v31  ;;  %v9445_v31 = vld [vmem:[#allocation7_spill] sm:$0xff] }
0x129c   :  { %v9446_v19 = vld [vmem:[#allocation19_spill] sm:$0xff] }
0x129d   :  { %3573 = vmatmul.mubr.f32.vlgmr.msra.gmra.mxu0 %v3505_v5  ;;  %3644 = vmatmul.mubr.f32.vlgmr.msra.gmra.mxu1 %v3505_v5  ;;  %v4381_v20 = vmul.f32 %v8523_v61, %v3505_v5  ;;  %v9447_v5 = vld [vmem:[#allocation13_spill] sm:$0xff] }
0x129e   :  { %3677 = vmatpush1.msra.mxu0 %v8135_v58  ;;  %3748 = vmatpush1.msra.mxu1 %v8141_v56 }
0x129f   :  { %4407 = vadd.xlane.f32.xlu0 %v4381_v20  ;;  %3678 = vmatprep.subr.mxu0 %v8147_v51  ;;  %v9448_v20 = vld [vmem:[#allocation20_spill] sm:$0xff] }
0x12a0   :  { %3749 = vmatprep.subr.mxu1 %v8153_v46  ;;  %3679 = vmatpush1.msra.mxu0 %v8159_v17 }
0x12a1   :  { %3750 = vmatpush1.msra.mxu1 %v8165_v63  ;;  %3680 = vmatprep.subr.mxu0 %v8171_v62 }
0x12a2   :  { %3751 = vmatprep.subr.mxu1 %v8177_v3  ;;  %3681 = vmatpush1.msra.mxu0 %v8183_v8 }
0x12a3   :  { %3752 = vmatpush1.msra.mxu1 %v8189_v59  ;;  %3682 = vmatprep.subr.mxu0 %v8195_v21 }
0x12a4   :  { %3753 = vmatprep.subr.mxu1 %v8201_v53  ;;  %3683 = vmatpush1.msra.mxu0 %v8207_v13 }
0x12a5   :  { %3754 = vmatpush1.msra.mxu1 %v8213_v54  ;;  %3684 = vmatprep.subr.mxu0 %v8219_v6 }
0x12a6   :  { %3755 = vmatprep.subr.mxu1 %v8225_v0  ;;  %3685 = vmatpush1.msra.mxu0 %v8231_v60 }
0x12a7   :  { %3756 = vmatpush1.msra.mxu1 %v8237_v52  ;;  %3686 = vmatprep.subr.mxu0 %v8243_v11 }
0x12a8   :  { %3757 = vmatprep.subr.mxu1 %v8249_v16  ;;  %3687 = vmatpush1.msra.mxu0 %v8255_v1 }
0x12a9   :  { %3758 = vmatpush1.msra.mxu1 %v8261_v48  ;;  %3688 = vmatprep.subr.mxu0 %v8267_v22 }
0x12aa   :  { %3759 = vmatprep.subr.mxu1 %v8273_v23  ;;  %3689 = vmatpush1.msra.mxu0 %v8279_v24 }
0x12ab   :  { %3760 = vmatpush1.msra.mxu1 %v8285_v25  ;;  %3690 = vmatprep.subr.mxu0 %v8291_v26 }
0x12ac   :  { %3761 = vmatprep.subr.mxu1 %v8297_v27  ;;  %3691 = vmatpush1.msra.mxu0 %v8303_v29 }
0x12ad   :  { %3762 = vmatpush1.msra.mxu1 %v8309_v32  ;;  %3692 = vmatprep.subr.mxu0 %v8315_v33 }
0x12ae   :  { %3763 = vmatprep.subr.mxu1 %v8321_v35  ;;  %3693 = vmatpush1.msra.mxu0 %v8327_v36 }
0x12af   :  { %3764 = vmatpush1.msra.mxu1 %v8333_v37  ;;  %3694 = vmatprep.subr.mxu0 %v8339_v40 }
0x12b0   :  { %3765 = vmatprep.subr.mxu1 %v8345_v43  ;;  %3695 = vmatpush1.msra.mxu0 %v8351_v45 }
0x12b1   :  { %3766 = vmatpush1.msra.mxu1 %v8357_v7  ;;  %3696 = vmatprep.subr.mxu0 %v8363_v18 }
0x12b2   :  { %3767 = vmatprep.subr.mxu1 %v8369_v57  ;;  %3697 = vmatpush1.msra.mxu0 %v8375_v12 }
0x12b3   :  { %3768 = vmatpush1.msra.mxu1 %v8381_v14  ;;  %3698 = vmatprep.subr.mxu0 %v8387_v49 }
0x12b4   :  { %3769 = vmatprep.subr.mxu1 %v8393_v15  ;;  %3699 = vmatpush1.msra.mxu0 %v8399_v10 }
0x12b5   :  { %3770 = vmatpush1.msra.mxu1 %v9434_v34  ;;  %3700 = vmatprep.subr.mxu0 %v9435_v38 }
0x12b6   :  { %3771 = vmatprep.subr.mxu1 %v9436_v39  ;;  %3701 = vmatpush1.msra.mxu0 %v9437_v9 }
0x12b7   :  { %3772 = vmatpush1.msra.mxu1 %v9438_v4  ;;  %3702 = vmatprep.subr.mxu0 %v9439_v41  ;;  %v9449_v4 = vld [vmem:[#allocation15_spill] sm:$0xff]  ;;  %v9450_v41 = vmov 0.0  }
0x12b8   :  { %3773 = vmatprep.subr.mxu1 %v9440_v55  ;;  %3703 = vmatpush1.msra.mxu0 %v9441_v47  ;;  %v9451_v55 = vld [vmem:[#allocation21_spill] sm:$0xff]  ;;  %v9455_v47 = vld [vmem:[#allocation24_spill] sm:$0xff] }
0x12b9   :  { %3774 = vmatpush1.msra.mxu1 %v9442_v42  ;;  %3704 = vmatprep.subr.mxu0 %v9443_v2  ;;  %v9452_v42 = vld [vmem:[#allocation23_spill] sm:$0xff]  ;;  %v9453_v2 = vld [vmem:[#allocation25_spill] sm:$0xff] }
0x12ba   :  { %3775 = vmatprep.subr.mxu1 %v9444_v28  ;;  %3705 = vmatpush1.msra.mxu0 %v9445_v31 }
0x12bb   :  { %3776 = vmatpush1.msra.mxu1 %v9446_v19  ;;  %3706 = vmatprep.subr.mxu0 %v9447_v5 }
0x12bc   :  { %3777 = vmatprep.subr.mxu1 %v9448_v20  ;;  %3707 = vmatpush1.msra.mxu0 %v9449_v4  ;;  %v9454_v20 = vld [vmem:[#allocation16_spill] sm:$0xff] }
0x12bd   :  { %3740 = vmatprep.mubr.f32.mxu0 %v9450_v41  ;;  %3778 = vmatpush1.msra.mxu1 %v9451_v55 }
0x12be   :  { %3811 = vmatprep.mubr.f32.mxu1 %v9450_v41  ;;  %3844 = vmatprep.subr.mxu0 %v9452_v42 }
0x12bf   :  { %3915 = vmatprep.subr.mxu1 %v9453_v2 }
0x1328   :  { %v4408_v28 = vpop.xlane.xlu0 %4407 }
0x1329   :  { %4430 = vst.msk [vmem:[%s8856_s7 + $0x50] sm:$0xff] %vm4419_vm0, %v4408_v28 }
0x135d   :  { %v3574_v5 = vpop.f32.mrf.mxu0  ;;  %v3645_v55 = vpop.f32.mrf.mxu1 }
0x135e   :  { %v3575_v19 = vadd.f32 %v3574_v5, %v9454_v20  ;;  %v3646_v34 = vadd.f32 %v3645_v55, %v7157_v44 }
0x135f   :  { %v3576_v4 = vpop.f32.mrf.mxu0  ;;  %v3647_v42 = vpop.f32.mrf.mxu1 }
0x1360   :  { %v4525_v31 = vmul.f32 -1.442695, %v3575_v19  ;;  %v3577_v9 = vadd.f32 %v3576_v4, %v9455_v47  ;;  %v3648_v2 = vadd.f32 %v3647_v42, %v9260_v50 }
0x1362   :  { %4846 = vpow2.f32 %v4525_v31  ;;  %v4526_v41 = vmul.f32 -1.442695, %v3577_v9  ;;  %v4527_v39 = vmul.f32 -1.442695, %v3648_v2  ;;  %v9459_v2 = vld [vmem:[#allocation8_spill] sm:$0xff] }
0x1364   :  { %4848 = vpow2.f32 %v4526_v41 }
0x1365   :  { %4850 = vpow2.f32 %v4527_v39 }
0x136f   :  { %v4847_v38 = vpop.eup %4846 }
0x1370   :  { %v3653_v10 = vadd.f32 1.0, %v4847_v38 }
0x1371   :  { %v4849_v28 = vpop.eup %4848 }
0x1372   :  { %4852 = vrcp.f32 %v3653_v10  ;;  %v3659_v5 = vadd.f32 1.0, %v4849_v28  ;;  %v4851_v19 = vpop.eup %4850  ;;  %v9461_v28 = vld [vmem:[#allocation17_spill] sm:$0xff] }
0x1373   :  { %4854 = vtanh.f32 %v3646_v34  ;;  %v3666_v9 = vadd.f32 1.0, %v4851_v19  ;;  %v9457_v34 = vld [vmem:[#allocation10_spill] sm:$0xff]  ;;  %v9463_v19 = vld [vmem:[#allocation9_spill] sm:$0xff] }
0x1374   :  { %4856 = vrcp.f32 %v3659_v5  ;;  %v9462_v5 = vld [vmem:[#allocation12_spill] sm:$0xff] }
0x1375   :  { %4858 = vrcp.f32 %v3666_v9  ;;  %v9466_v9 = vld [vmem:[#allocation14_spill] sm:$0xff] }
0x137f   :  { %v4853_v4 = vpop.eup %4852 }
0x1380   :  { %v4855_v31 = vpop.eup %4854 }
0x1381   :  { %v4857_v47 = vpop.eup %4856  ;;  %v3670_v41 = vmul.f32 %v4855_v31, %v4853_v4  ;;  %v9464_v4 = vld [vmem:[#allocation6_spill] sm:$0xff] }
0x1382   :  { %v3669_v20 = vmul.f32 %v4857_v47, %v8517_v30  ;;  %v4859_v38 = vpop.eup %4858  ;;  %v9456_v30 = vld [vmem:[#allocation4_spill] sm:$0xff]  ;;  %v9458_v47 = vld [vmem:[#allocation3_spill] sm:$0xff]  ;;  %v9465_v31 = vld [vmem:[#allocation18_spill] sm:$0xff] }
0x1384   :  { %v8601_v42 = vadd.f32 %v3670_v41, %v3669_v20  ;;  %v9460_v20 = vld [vmem:[#allocation5_spill] sm:$0xff]  ;;  %v9467_v41 = vld [vmem:[#allocation11_spill] sm:$0xff] }
0x1386   :  { %4860 = vtanh.f32 %v8601_v42 }
0x1393   :  { %v4861_v55 = vpop.eup %4860 }
0x1394   :  { %v3673_v39 = vmul.f32 %v4861_v55, %v4859_v38  ;;  %v9468_v38 = vld [vmem:[#allocation7_spill] sm:$0xff] }
0x1395   :  { %v9469_v55 = vld [vmem:[#allocation19_spill] sm:$0xff] }
0x1396   :  { %3741 = vmatmul.mubr.f32.vlgmr.msra.gmra.mxu0 %v3673_v39  ;;  %3812 = vmatmul.mubr.f32.vlgmr.msra.gmra.mxu1 %v3673_v39  ;;  %v4382_v10 = vmul.f32 %v8523_v61, %v3673_v39  ;;  %v9470_v39 = vld [vmem:[#allocation13_spill] sm:$0xff] }
0x1397   :  { %3845 = vmatpush1.msra.mxu0 %v8135_v58  ;;  %3916 = vmatpush1.msra.mxu1 %v8141_v56 }
0x1398   :  { %4409 = vadd.xlane.f32.xlu1 %v4382_v10  ;;  %3846 = vmatprep.subr.mxu0 %v8147_v51  ;;  %v9471_v10 = vld [vmem:[#allocation20_spill] sm:$0xff] }
0x1399   :  { %3917 = vmatprep.subr.mxu1 %v8153_v46  ;;  %3847 = vmatpush1.msra.mxu0 %v8159_v17 }
0x139a   :  { %3918 = vmatpush1.msra.mxu1 %v8165_v63  ;;  %3848 = vmatprep.subr.mxu0 %v8171_v62 }
0x139b   :  { %3919 = vmatprep.subr.mxu1 %v8177_v3  ;;  %3849 = vmatpush1.msra.mxu0 %v8183_v8 }
0x139c   :  { %3920 = vmatpush1.msra.mxu1 %v8189_v59  ;;  %3850 = vmatprep.subr.mxu0 %v8195_v21 }
0x139d   :  { %3921 = vmatprep.subr.mxu1 %v8201_v53  ;;  %3851 = vmatpush1.msra.mxu0 %v8207_v13 }
0x139e   :  { %3922 = vmatpush1.msra.mxu1 %v8213_v54  ;;  %3852 = vmatprep.subr.mxu0 %v8219_v6 }
0x139f   :  { %3923 = vmatprep.subr.mxu1 %v8225_v0  ;;  %3853 = vmatpush1.msra.mxu0 %v8231_v60 }
0x13a0   :  { %3924 = vmatpush1.msra.mxu1 %v8237_v52  ;;  %3854 = vmatprep.subr.mxu0 %v8243_v11 }
0x13a1   :  { %3925 = vmatprep.subr.mxu1 %v8249_v16  ;;  %3855 = vmatpush1.msra.mxu0 %v8255_v1 }
0x13a2   :  { %3926 = vmatpush1.msra.mxu1 %v8261_v48  ;;  %3856 = vmatprep.subr.mxu0 %v8267_v22 }
0x13a3   :  { %3927 = vmatprep.subr.mxu1 %v8273_v23  ;;  %3857 = vmatpush1.msra.mxu0 %v8279_v24 }
0x13a4   :  { %3928 = vmatpush1.msra.mxu1 %v8285_v25  ;;  %3858 = vmatprep.subr.mxu0 %v8291_v26 }
0x13a5   :  { %3929 = vmatprep.subr.mxu1 %v8297_v27  ;;  %3859 = vmatpush1.msra.mxu0 %v8303_v29 }
0x13a6   :  { %3930 = vmatpush1.msra.mxu1 %v8309_v32  ;;  %3860 = vmatprep.subr.mxu0 %v8315_v33 }
0x13a7   :  { %3931 = vmatprep.subr.mxu1 %v8321_v35  ;;  %3861 = vmatpush1.msra.mxu0 %v8327_v36 }
0x13a8   :  { %3932 = vmatpush1.msra.mxu1 %v8333_v37  ;;  %3862 = vmatprep.subr.mxu0 %v8339_v40 }
0x13a9   :  { %3933 = vmatprep.subr.mxu1 %v8345_v43  ;;  %3863 = vmatpush1.msra.mxu0 %v8351_v45 }
0x13aa   :  { %3934 = vmatpush1.msra.mxu1 %v8357_v7  ;;  %3864 = vmatprep.subr.mxu0 %v8363_v18 }
0x13ab   :  { %3935 = vmatprep.subr.mxu1 %v8369_v57  ;;  %3865 = vmatpush1.msra.mxu0 %v8375_v12 }
0x13ac   :  { %3936 = vmatpush1.msra.mxu1 %v8381_v14  ;;  %3866 = vmatprep.subr.mxu0 %v8387_v49 }
0x13ad   :  { %3937 = vmatprep.subr.mxu1 %v8393_v15  ;;  %3867 = vmatpush1.msra.mxu0 %v9456_v30 }
0x13ae   :  { %3938 = vmatpush1.msra.mxu1 %v9457_v34  ;;  %3868 = vmatprep.subr.mxu0 %v9458_v47 }
0x13af   :  { %3939 = vmatprep.subr.mxu1 %v9459_v2  ;;  %3869 = vmatpush1.msra.mxu0 %v9460_v20 }
0x13b0   :  { %3940 = vmatpush1.msra.mxu1 %v9461_v28  ;;  %3870 = vmatprep.subr.mxu0 %v9462_v5  ;;  %v9472_v28 = vld [vmem:[#allocation15_spill] sm:$0xff]  ;;  %v9473_v5 = vmov 0.0  }
0x13b1   :  { %3941 = vmatprep.subr.mxu1 %v9463_v19  ;;  %3871 = vmatpush1.msra.mxu0 %v9464_v4  ;;  %v9474_v19 = vld [vmem:[#allocation21_spill] sm:$0xff]  ;;  %v9478_v4 = vld [vmem:[#allocation24_spill] sm:$0xff] }
0x13b2   :  { %3942 = vmatpush1.msra.mxu1 %v9465_v31  ;;  %3872 = vmatprep.subr.mxu0 %v9466_v9  ;;  %v9475_v31 = vld [vmem:[#allocation23_spill] sm:$0xff]  ;;  %v9476_v9 = vld [vmem:[#allocation25_spill] sm:$0xff] }
0x13b3   :  { %3943 = vmatprep.subr.mxu1 %v9467_v41  ;;  %3873 = vmatpush1.msra.mxu0 %v9468_v38 }
0x13b4   :  { %3944 = vmatpush1.msra.mxu1 %v9469_v55  ;;  %3874 = vmatprep.subr.mxu0 %v9470_v39 }
0x13b5   :  { %3945 = vmatprep.subr.mxu1 %v9471_v10  ;;  %3875 = vmatpush1.msra.mxu0 %v9472_v28  ;;  %v9477_v10 = vld [vmem:[#allocation16_spill] sm:$0xff] }
0x13b6   :  { %3908 = vmatprep.mubr.f32.mxu0 %v9473_v5  ;;  %3946 = vmatpush1.msra.mxu1 %v9474_v19 }
0x13b7   :  { %3979 = vmatprep.mubr.f32.mxu1 %v9473_v5  ;;  %4012 = vmatprep.subr.mxu0 %v9475_v31 }
0x13b8   :  { %4083 = vmatprep.subr.mxu1 %v9476_v9 }
0x1421   :  { %v4410_v41 = vpop.xlane.xlu1 %4409 }
0x1422   :  { %4431 = vst.msk [vmem:[%s8856_s7 + $0x58] sm:$0xff] %vm4419_vm0, %v4410_v41 }
0x1456   :  { %v3742_v39 = vpop.f32.mrf.mxu0  ;;  %v3813_v19 = vpop.f32.mrf.mxu1 }
0x1457   :  { %v3743_v55 = vadd.f32 %v3742_v39, %v9477_v10  ;;  %v3814_v34 = vadd.f32 %v3813_v19, %v7157_v44 }
0x1458   :  { %v3744_v28 = vpop.f32.mrf.mxu0  ;;  %v3815_v31 = vpop.f32.mrf.mxu1 }
0x1459   :  { %v4528_v38 = vmul.f32 -1.442695, %v3743_v55  ;;  %v3745_v20 = vadd.f32 %v3744_v28, %v9478_v4  ;;  %v3816_v9 = vadd.f32 %v3815_v31, %v9260_v50 }
0x145b   :  { %4862 = vpow2.f32 %v4528_v38  ;;  %v4529_v5 = vmul.f32 -1.442695, %v3745_v20  ;;  %v4530_v2 = vmul.f32 -1.442695, %v3816_v9  ;;  %v9482_v9 = vld [vmem:[#allocation8_spill] sm:$0xff] }
0x145d   :  { %4864 = vpow2.f32 %v4529_v5 }
0x145e   :  { %4866 = vpow2.f32 %v4530_v2 }
0x1468   :  { %v4863_v47 = vpop.eup %4862 }
0x1469   :  { %v3821_v30 = vadd.f32 1.0, %v4863_v47 }
0x146a   :  { %v4865_v41 = vpop.eup %4864 }
0x146b   :  { %4868 = vrcp.f32 %v3821_v30  ;;  %v3827_v39 = vadd.f32 1.0, %v4865_v41  ;;  %v4867_v55 = vpop.eup %4866  ;;  %v9484_v41 = vld [vmem:[#allocation17_spill] sm:$0xff] }
0x146c   :  { %4870 = vtanh.f32 %v3814_v34  ;;  %v3834_v20 = vadd.f32 1.0, %v4867_v55  ;;  %v9480_v34 = vld [vmem:[#allocation10_spill] sm:$0xff]  ;;  %v9486_v55 = vld [vmem:[#allocation9_spill] sm:$0xff] }
0x146d   :  { %4872 = vrcp.f32 %v3827_v39  ;;  %v9485_v39 = vld [vmem:[#allocation12_spill] sm:$0xff] }
0x146e   :  { %4874 = vrcp.f32 %v3834_v20  ;;  %v9489_v20 = vld [vmem:[#allocation14_spill] sm:$0xff] }
0x1478   :  { %v4869_v28 = vpop.eup %4868 }
0x1479   :  { %v4871_v38 = vpop.eup %4870 }
0x147a   :  { %v4873_v4 = vpop.eup %4872  ;;  %v3838_v5 = vmul.f32 %v4871_v38, %v4869_v28  ;;  %v9487_v28 = vld [vmem:[#allocation6_spill] sm:$0xff] }
0x147b   :  { %v3837_v10 = vmul.f32 %v4873_v4, %v8601_v42  ;;  %v4875_v47 = vpop.eup %4874  ;;  %v9479_v42 = vld [vmem:[#allocation4_spill] sm:$0xff]  ;;  %v9481_v4 = vld [vmem:[#allocation3_spill] sm:$0xff]  ;;  %v9488_v38 = vld [vmem:[#allocation18_spill] sm:$0xff] }
0x147d   :  { %v8680_v31 = vadd.f32 %v3838_v5, %v3837_v10  ;;  %v9483_v10 = vld [vmem:[#allocation5_spill] sm:$0xff]  ;;  %v9490_v5 = vld [vmem:[#allocation11_spill] sm:$0xff] }
0x147f   :  { %4876 = vtanh.f32 %v8680_v31 }
0x148c   :  { %v4877_v19 = vpop.eup %4876 }
0x148d   :  { %v3841_v2 = vmul.f32 %v4877_v19, %v4875_v47  ;;  %v9491_v47 = vld [vmem:[#allocation7_spill] sm:$0xff] }
0x148e   :  { %v9492_v19 = vld [vmem:[#allocation19_spill] sm:$0xff] }
0x148f   :  { %3909 = vmatmul.mubr.f32.vlgmr.msra.gmra.mxu0 %v3841_v2  ;;  %3980 = vmatmul.mubr.f32.vlgmr.msra.gmra.mxu1 %v3841_v2  ;;  %v4383_v30 = vmul.f32 %v8523_v61, %v3841_v2  ;;  %v9493_v2 = vld [vmem:[#allocation13_spill] sm:$0xff] }
0x1490   :  { %4013 = vmatpush1.msra.mxu0 %v8135_v58  ;;  %4084 = vmatpush1.msra.mxu1 %v8141_v56 }
0x1491   :  { %4411 = vadd.xlane.f32.xlu0 %v4383_v30  ;;  %4014 = vmatprep.subr.mxu0 %v8147_v51  ;;  %v9494_v30 = vld [vmem:[#allocation20_spill] sm:$0xff] }
0x1492   :  { %4085 = vmatprep.subr.mxu1 %v8153_v46  ;;  %4015 = vmatpush1.msra.mxu0 %v8159_v17 }
0x1493   :  { %4086 = vmatpush1.msra.mxu1 %v8165_v63  ;;  %4016 = vmatprep.subr.mxu0 %v8171_v62 }
0x1494   :  { %4087 = vmatprep.subr.mxu1 %v8177_v3  ;;  %4017 = vmatpush1.msra.mxu0 %v8183_v8 }
0x1495   :  { %4088 = vmatpush1.msra.mxu1 %v8189_v59  ;;  %4018 = vmatprep.subr.mxu0 %v8195_v21 }
0x1496   :  { %4089 = vmatprep.subr.mxu1 %v8201_v53  ;;  %4019 = vmatpush1.msra.mxu0 %v8207_v13 }
0x1497   :  { %4090 = vmatpush1.msra.mxu1 %v8213_v54  ;;  %4020 = vmatprep.subr.mxu0 %v8219_v6 }
0x1498   :  { %4091 = vmatprep.subr.mxu1 %v8225_v0  ;;  %4021 = vmatpush1.msra.mxu0 %v8231_v60 }
0x1499   :  { %4092 = vmatpush1.msra.mxu1 %v8237_v52  ;;  %4022 = vmatprep.subr.mxu0 %v8243_v11 }
0x149a   :  { %4093 = vmatprep.subr.mxu1 %v8249_v16  ;;  %4023 = vmatpush1.msra.mxu0 %v8255_v1 }
0x149b   :  { %4094 = vmatpush1.msra.mxu1 %v8261_v48  ;;  %4024 = vmatprep.subr.mxu0 %v8267_v22 }
0x149c   :  { %4095 = vmatprep.subr.mxu1 %v8273_v23  ;;  %4025 = vmatpush1.msra.mxu0 %v8279_v24 }
0x149d   :  { %4096 = vmatpush1.msra.mxu1 %v8285_v25  ;;  %4026 = vmatprep.subr.mxu0 %v8291_v26 }
0x149e   :  { %4097 = vmatprep.subr.mxu1 %v8297_v27  ;;  %4027 = vmatpush1.msra.mxu0 %v8303_v29 }
0x149f   :  { %4098 = vmatpush1.msra.mxu1 %v8309_v32  ;;  %4028 = vmatprep.subr.mxu0 %v8315_v33 }
0x14a0   :  { %4099 = vmatprep.subr.mxu1 %v8321_v35  ;;  %4029 = vmatpush1.msra.mxu0 %v8327_v36 }
0x14a1   :  { %4100 = vmatpush1.msra.mxu1 %v8333_v37  ;;  %4030 = vmatprep.subr.mxu0 %v8339_v40 }
0x14a2   :  { %4101 = vmatprep.subr.mxu1 %v8345_v43  ;;  %4031 = vmatpush1.msra.mxu0 %v8351_v45 }
0x14a3   :  { %4102 = vmatpush1.msra.mxu1 %v8357_v7  ;;  %4032 = vmatprep.subr.mxu0 %v8363_v18 }
0x14a4   :  { %4103 = vmatprep.subr.mxu1 %v8369_v57  ;;  %4033 = vmatpush1.msra.mxu0 %v8375_v12 }
0x14a5   :  { %4104 = vmatpush1.msra.mxu1 %v8381_v14  ;;  %4034 = vmatprep.subr.mxu0 %v8387_v49 }
0x14a6   :  { %4105 = vmatprep.subr.mxu1 %v8393_v15  ;;  %4035 = vmatpush1.msra.mxu0 %v9479_v42 }
0x14a7   :  { %4106 = vmatpush1.msra.mxu1 %v9480_v34  ;;  %4036 = vmatprep.subr.mxu0 %v9481_v4 }
0x14a8   :  { %4107 = vmatprep.subr.mxu1 %v9482_v9  ;;  %4037 = vmatpush1.msra.mxu0 %v9483_v10 }
0x14a9   :  { %4108 = vmatpush1.msra.mxu1 %v9484_v41  ;;  %4038 = vmatprep.subr.mxu0 %v9485_v39  ;;  %v9495_v41 = vld [vmem:[#allocation15_spill] sm:$0xff]  ;;  %v9496_v39 = vmov 0.0  }
0x14aa   :  { %4109 = vmatprep.subr.mxu1 %v9486_v55  ;;  %4039 = vmatpush1.msra.mxu0 %v9487_v28  ;;  %v9497_v55 = vld [vmem:[#allocation21_spill] sm:$0xff]  ;;  %v9501_v28 = vld [vmem:[#allocation24_spill] sm:$0xff] }
0x14ab   :  { %4110 = vmatpush1.msra.mxu1 %v9488_v38  ;;  %4040 = vmatprep.subr.mxu0 %v9489_v20  ;;  %v9498_v38 = vld [vmem:[#allocation23_spill] sm:$0xff]  ;;  %v9499_v20 = vld [vmem:[#allocation25_spill] sm:$0xff] }
0x14ac   :  { %4111 = vmatprep.subr.mxu1 %v9490_v5  ;;  %4041 = vmatpush1.msra.mxu0 %v9491_v47 }
0x14ad   :  { %4112 = vmatpush1.msra.mxu1 %v9492_v19  ;;  %4042 = vmatprep.subr.mxu0 %v9493_v2 }
0x14ae   :  { %4113 = vmatprep.subr.mxu1 %v9494_v30  ;;  %4043 = vmatpush1.msra.mxu0 %v9495_v41  ;;  %v9500_v30 = vld [vmem:[#allocation16_spill] sm:$0xff] }
0x14af   :  { %4076 = vmatprep.mubr.f32.mxu0 %v9496_v39  ;;  %4114 = vmatpush1.msra.mxu1 %v9497_v55 }
0x14b0   :  { %4147 = vmatprep.mubr.f32.mxu1 %v9496_v39  ;;  %4180 = vmatprep.subr.mxu0 %v9498_v38 }
0x14b1   :  { %4251 = vmatprep.subr.mxu1 %v9499_v20 }
0x151a   :  { %v4412_v5 = vpop.xlane.xlu0 %4411 }
0x151b   :  { %4432 = vst.msk [vmem:[%s8856_s7 + $0x60] sm:$0xff] %vm4419_vm0, %v4412_v5 }
0x154f   :  { %v3910_v2 = vpop.f32.mrf.mxu0  ;;  %v3981_v55 = vpop.f32.mrf.mxu1 }
0x1550   :  { %v3911_v19 = vadd.f32 %v3910_v2, %v9500_v30  ;;  %v3982_v34 = vadd.f32 %v3981_v55, %v7157_v44 }
0x1551   :  { %v3912_v41 = vpop.f32.mrf.mxu0  ;;  %v3983_v38 = vpop.f32.mrf.mxu1 }
0x1552   :  { %v4531_v47 = vmul.f32 -1.442695, %v3911_v19  ;;  %v3913_v10 = vadd.f32 %v3912_v41, %v9501_v28  ;;  %v3984_v20 = vadd.f32 %v3983_v38, %v9260_v50 }
0x1554   :  { %4878 = vpow2.f32 %v4531_v47  ;;  %v4532_v39 = vmul.f32 -1.442695, %v3913_v10  ;;  %v4533_v9 = vmul.f32 -1.442695, %v3984_v20 }
0x1556   :  { %4880 = vpow2.f32 %v4532_v39 }
0x1557   :  { %4882 = vpow2.f32 %v4533_v9 }
0x1561   :  { %v4879_v4 = vpop.eup %4878 }
0x1562   :  { %v3989_v42 = vadd.f32 1.0, %v4879_v4 }
0x1563   :  { %v4881_v5 = vpop.eup %4880 }
0x1564   :  { %4884 = vrcp.f32 %v3989_v42  ;;  %v3995_v2 = vadd.f32 1.0, %v4881_v5  ;;  %v4883_v19 = vpop.eup %4882 }
0x1565   :  { %4886 = vtanh.f32 %v3982_v34  ;;  %v4002_v10 = vadd.f32 1.0, %v4883_v19 }
0x1566   :  { %4888 = vrcp.f32 %v3995_v2 }
0x1567   :  { %4890 = vrcp.f32 %v4002_v10 }
0x1571   :  { %v4885_v41 = vpop.eup %4884 }
0x1572   :  { %v4887_v47 = vpop.eup %4886 }
0x1573   :  { %v4889_v28 = vpop.eup %4888  ;;  %v4006_v39 = vmul.f32 %v4887_v47, %v4885_v41 }
0x1574   :  { %v4005_v30 = vmul.f32 %v4889_v28, %v8680_v31  ;;  %v4891_v4 = vpop.eup %4890 }
0x1576   :  { %v8759_v38 = vadd.f32 %v4006_v39, %v4005_v30 }
0x1578   :  { %4892 = vtanh.f32 %v8759_v38 }
0x1585   :  { %v4893_v55 = vpop.eup %4892 }
0x1586   :  { %v4009_v9 = vmul.f32 %v4893_v55, %v4891_v4 }
0x1588   :  { %4077 = vmatmul.mubr.f32.vlgmr.msra.gmra.mxu0 %v4009_v9  ;;  %4148 = vmatmul.mubr.f32.vlgmr.msra.gmra.mxu1 %v4009_v9  ;;  %v4384_v42 = vmul.f32 %v8523_v61, %v4009_v9 }
0x1589   :  { %4181 = vmatpush1.msra.mxu0 %v8135_v58  ;;  %4252 = vmatpush1.msra.mxu1 %v8141_v56  ;;  %v9502_v58 = vld [vmem:[#allocation4_spill] sm:$0xff]  ;;  %v9503_v56 = vld [vmem:[#allocation10_spill] sm:$0xff] }
0x158a   :  { %4413 = vadd.xlane.f32.xlu1 %v4384_v42  ;;  %4182 = vmatprep.subr.mxu0 %v8147_v51  ;;  %v9504_v51 = vld [vmem:[#allocation3_spill] sm:$0xff] }
0x158b   :  { %4253 = vmatprep.subr.mxu1 %v8153_v46  ;;  %4183 = vmatpush1.msra.mxu0 %v8159_v17  ;;  %v9505_v46 = vld [vmem:[#allocation8_spill] sm:$0xff]  ;;  %v9506_v17 = vld [vmem:[#allocation5_spill] sm:$0xff] }
0x158c   :  { %4254 = vmatpush1.msra.mxu1 %v8165_v63  ;;  %4184 = vmatprep.subr.mxu0 %v8171_v62  ;;  %v9507_v63 = vld [vmem:[#allocation17_spill] sm:$0xff]  ;;  %v9508_v62 = vld [vmem:[#allocation12_spill] sm:$0xff] }
0x158d   :  { %4255 = vmatprep.subr.mxu1 %v8177_v3  ;;  %4185 = vmatpush1.msra.mxu0 %v8183_v8  ;;  %v9509_v3 = vld [vmem:[#allocation9_spill] sm:$0xff]  ;;  %v9510_v8 = vld [vmem:[#allocation6_spill] sm:$0xff] }
0x158e   :  { %4256 = vmatpush1.msra.mxu1 %v8189_v59  ;;  %4186 = vmatprep.subr.mxu0 %v8195_v21  ;;  %v9511_v59 = vld [vmem:[#allocation18_spill] sm:$0xff] }
0x158f   :  { %4257 = vmatprep.subr.mxu1 %v8201_v53  ;;  %4187 = vmatpush1.msra.mxu0 %v8207_v13  ;;  %v9512_v21 = vld [vmem:[#allocation14_spill] sm:$0xff]  ;;  %v9513_v53 = vld [vmem:[#allocation11_spill] sm:$0xff] }
0x1590   :  { %4258 = vmatpush1.msra.mxu1 %v8213_v54  ;;  %4188 = vmatprep.subr.mxu0 %v8219_v6  ;;  %v9514_v13 = vld [vmem:[#allocation7_spill] sm:$0xff]  ;;  %v9516_v6 = vld [vmem:[#allocation13_spill] sm:$0xff] }
0x1591   :  { %4259 = vmatprep.subr.mxu1 %v8225_v0  ;;  %4189 = vmatpush1.msra.mxu0 %v8231_v60  ;;  %v9515_v54 = vld [vmem:[#allocation19_spill] sm:$0xff]  ;;  %v9517_v0 = vld [vmem:[#allocation20_spill] sm:$0xff] }
0x1592   :  { %4260 = vmatpush1.msra.mxu1 %v8237_v52  ;;  %4190 = vmatprep.subr.mxu0 %v8243_v11  ;;  %v9518_v60 = vld [vmem:[#allocation15_spill] sm:$0xff]  ;;  %v9519_v52 = vmov 0.0   ;;  %v9520_v11 = vld [vmem:[#allocation21_spill] sm:$0xff] }
0x1593   :  { %4261 = vmatprep.subr.mxu1 %v8249_v16  ;;  %4191 = vmatpush1.msra.mxu0 %v8255_v1 }
0x1594   :  { %4262 = vmatpush1.msra.mxu1 %v8261_v48  ;;  %4192 = vmatprep.subr.mxu0 %v8267_v22  ;;  %v9521_v48 = vld [vmem:[#allocation16_spill] sm:$0xff] }
0x1595   :  { %4263 = vmatprep.subr.mxu1 %v8273_v23  ;;  %4193 = vmatpush1.msra.mxu0 %v8279_v24 }
0x1596   :  { %4264 = vmatpush1.msra.mxu1 %v8285_v25  ;;  %4194 = vmatprep.subr.mxu0 %v8291_v26  ;;  %v9522_v25 = vld [vmem:[#allocation24_spill] sm:$0xff] }
0x1597   :  { %4265 = vmatprep.subr.mxu1 %v8297_v27  ;;  %4195 = vmatpush1.msra.mxu0 %v8303_v29 }
0x1598   :  { %4266 = vmatpush1.msra.mxu1 %v8309_v32  ;;  %4196 = vmatprep.subr.mxu0 %v8315_v33 }
0x1599   :  { %4267 = vmatprep.subr.mxu1 %v8321_v35  ;;  %4197 = vmatpush1.msra.mxu0 %v8327_v36 }
0x159a   :  { %4268 = vmatpush1.msra.mxu1 %v8333_v37  ;;  %4198 = vmatprep.subr.mxu0 %v8339_v40 }
0x159b   :  { %4269 = vmatprep.subr.mxu1 %v8345_v43  ;;  %4199 = vmatpush1.msra.mxu0 %v8351_v45 }
0x159c   :  { %4270 = vmatpush1.msra.mxu1 %v8357_v7  ;;  %4200 = vmatprep.subr.mxu0 %v8363_v18 }
0x159d   :  { %4271 = vmatprep.subr.mxu1 %v8369_v57  ;;  %4201 = vmatpush1.msra.mxu0 %v8375_v12 }
0x159e   :  { %4272 = vmatpush1.msra.mxu1 %v8381_v14  ;;  %4202 = vmatprep.subr.mxu0 %v8387_v49 }
0x159f   :  { %4273 = vmatprep.subr.mxu1 %v8393_v15  ;;  %4203 = vmatpush1.msra.mxu0 %v9502_v58 }
0x15a0   :  { %4274 = vmatpush1.msra.mxu1 %v9503_v56  ;;  %4204 = vmatprep.subr.mxu0 %v9504_v51 }
0x15a1   :  { %4275 = vmatprep.subr.mxu1 %v9505_v46  ;;  %4205 = vmatpush1.msra.mxu0 %v9506_v17 }
0x15a2   :  { %4276 = vmatpush1.msra.mxu1 %v9507_v63  ;;  %4206 = vmatprep.subr.mxu0 %v9508_v62 }
0x15a3   :  { %4277 = vmatprep.subr.mxu1 %v9509_v3  ;;  %4207 = vmatpush1.msra.mxu0 %v9510_v8 }
0x15a4   :  { %4278 = vmatpush1.msra.mxu1 %v9511_v59  ;;  %4208 = vmatprep.subr.mxu0 %v9512_v21 }
0x15a5   :  { %4279 = vmatprep.subr.mxu1 %v9513_v53  ;;  %4209 = vmatpush1.msra.mxu0 %v9514_v13 }
0x15a6   :  { %4280 = vmatpush1.msra.mxu1 %v9515_v54  ;;  %4210 = vmatprep.subr.mxu0 %v9516_v6 }
0x15a7   :  { %4281 = vmatprep.subr.mxu1 %v9517_v0  ;;  %4211 = vmatpush1.msra.mxu0 %v9518_v60 }
0x15a8   :  { %4244 = vmatprep.mubr.f32.mxu0 %v9519_v52  ;;  %4282 = vmatpush1.msra.mxu1 %v9520_v11 }
0x15a9   :  { %4315 = vmatprep.mubr.f32.mxu1 %v9519_v52 }
0x1613   :  { %v4414_v16 = vpop.xlane.xlu1 %4413 }
0x1614   :  { %4433 = vst.msk [vmem:[%s8856_s7 + $0x68] sm:$0xff] %vm4419_vm0, %v4414_v16 }
0x1648   :  { %v4078_v1 = vpop.f32.mrf.mxu0  ;;  %v4149_v27 = vpop.f32.mrf.mxu1 }
0x1649   :  { %v4079_v22 = vadd.f32 %v4078_v1, %v9521_v48  ;;  %v4150_v37 = vadd.f32 %v4149_v27, %v7157_v44 }
0x164a   :  { %v4080_v23 = vpop.f32.mrf.mxu0  ;;  %v4151_v32 = vpop.f32.mrf.mxu1 }
0x164b   :  { %v4534_v24 = vmul.f32 -1.442695, %v4079_v22  ;;  %v4081_v26 = vadd.f32 %v4080_v23, %v9522_v25  ;;  %v4152_v33 = vadd.f32 %v4151_v32, %v9260_v50 }
0x164d   :  { %4894 = vpow2.f32 %v4534_v24  ;;  %v4535_v29 = vmul.f32 -1.442695, %v4081_v26  ;;  %v4536_v35 = vmul.f32 -1.442695, %v4152_v33 }
0x164f   :  { %4896 = vpow2.f32 %v4535_v29 }
0x1650   :  { %4898 = vpow2.f32 %v4536_v35 }
0x165a   :  { %v4895_v36 = vpop.eup %4894 }
0x165b   :  { %v4157_v40 = vadd.f32 1.0, %v4895_v36 }
0x165c   :  { %v4897_v43 = vpop.eup %4896 }
0x165d   :  { %4900 = vrcp.f32 %v4157_v40  ;;  %v4163_v45 = vadd.f32 1.0, %v4897_v43  ;;  %v4899_v7 = vpop.eup %4898 }
0x165e   :  { %4902 = vtanh.f32 %v4150_v37  ;;  %v4170_v14 = vadd.f32 1.0, %v4899_v7 }
0x165f   :  { %4904 = vrcp.f32 %v4163_v45 }
0x1660   :  { %4906 = vrcp.f32 %v4170_v14 }
0x166a   :  { %v4901_v18 = vpop.eup %4900 }
0x166b   :  { %v4903_v57 = vpop.eup %4902 }
0x166c   :  { %v4905_v12 = vpop.eup %4904  ;;  %v4174_v49 = vmul.f32 %v4903_v57, %v4901_v18 }
0x166d   :  { %v4173_v15 = vmul.f32 %v4905_v12, %v8759_v38  ;;  %v4907_v34 = vpop.eup %4906 }
0x166f   :  { %v4175_v31 = vadd.f32 %v4174_v49, %v4173_v15 }
0x1671   :  { %4908 = vtanh.f32 %v4175_v31 }
0x167e   :  { %v4909_v28 = vpop.eup %4908 }
0x167f   :  { %v4177_v30 = vmul.f32 %v4909_v28, %v4907_v34 }
0x1681   :  { %4245 = vmatmul.mubr.f32.vlgmr.msra.gmra.mxu0 %v4177_v30  ;;  %4316 = vmatmul.mubr.f32.vlgmr.msra.gmra.mxu1 %v4177_v30  ;;  %v4385_v20 = vmul.f32 %v8523_v61, %v4177_v30 }
0x1683   :  { %4415 = vadd.xlane.f32.xlu0 %v4385_v20 }
0x170c   :  { %v4416_v5 = vpop.xlane.xlu0 %4415 }
0x170d   :  { %4434 = vst.msk [vmem:[%s8856_s7 + $0x70] sm:$0xff] %vm4419_vm0, %v4416_v5 }
0x1741   :  { %v4246_v2 = vpop.f32.mrf.mxu0  ;;  %v4317_v39 = vpop.f32.mrf.mxu1 }
0x1742   :  { %v4247_v19 = vadd.f32 %v4246_v2, %v9521_v48  ;;  %v4318_v58 = vadd.f32 %v4317_v39, %v7157_v44 }
0x1743   :  { %v4248_v41 = vpop.f32.mrf.mxu0  ;;  %v4319_v4 = vpop.f32.mrf.mxu1 }
0x1744   :  { %v4537_v47 = vmul.f32 -1.442695, %v4247_v19  ;;  %v4249_v10 = vadd.f32 %v4248_v41, %v9522_v25  ;;  %v4320_v55 = vadd.f32 %v4319_v4, %v9260_v50 }
0x1746   :  { %4910 = vpow2.f32 %v4537_v47  ;;  %v4538_v38 = vmul.f32 -1.442695, %v4249_v10  ;;  %v4539_v9 = vmul.f32 -1.442695, %v4320_v55 }
0x1748   :  { %4912 = vpow2.f32 %v4538_v38 }
0x1749   :  { %4914 = vpow2.f32 %v4539_v9 }
0x1753   :  { %v4911_v42 = vpop.eup %4910 }
0x1754   :  { %v4325_v56 = vadd.f32 1.0, %v4911_v42 }
0x1755   :  { %v4913_v51 = vpop.eup %4912 }
0x1756   :  { %4916 = vrcp.f32 %v4325_v56  ;;  %v4331_v46 = vadd.f32 1.0, %v4913_v51  ;;  %v4915_v17 = vpop.eup %4914 }
0x1757   :  { %4918 = vtanh.f32 %v4318_v58  ;;  %v4338_v8 = vadd.f32 1.0, %v4915_v17 }
0x1758   :  { %4920 = vrcp.f32 %v4331_v46 }
0x1759   :  { %4922 = vrcp.f32 %v4338_v8 }
0x1763   :  { %v4917_v63 = vpop.eup %4916 }
0x1764   :  { %v4919_v62 = vpop.eup %4918 }
0x1765   :  { %v4921_v3 = vpop.eup %4920  ;;  %v4342_v59 = vmul.f32 %v4919_v62, %v4917_v63 }
0x1766   :  { %v4341_v21 = vmul.f32 %v4921_v3, %v4175_v31  ;;  %v4923_v50 = vpop.eup %4922 }
0x1768   :  { %v4343_v53 = vadd.f32 %v4342_v59, %v4341_v21 }
0x176a   :  { %4924 = vtanh.f32 %v4343_v53 }
0x1777   :  { %v4925_v13 = vpop.eup %4924 }
0x1778   :  { %v4345_v44 = vmul.f32 %v4925_v13, %v4923_v50 }
0x177a   :  { %v4386_v54 = vmul.f32 %v8523_v61, %v4345_v44 }
0x177c   :  { %4417 = vadd.xlane.f32.xlu1 %v4386_v54 }
0x1805   :  { %v4418_v6 = vpop.xlane.xlu1 %4417 }
0x1806   :  { %4435 = vst.msk [vmem:[%s8856_s7 + $0x78] sm:$0xff] %vm4419_vm0, %v4418_v6 }

</bundles_post_ra>
